<compile_context>
chip_gen: v7x
topology: tpu7x:2x2x1
jax: 0.10.0
libtpu: 0.0.40
codegen_flags: <defaults>
</compile_context>

<pallas_src>
import functools

import jax
import jax.numpy as jnp
from jax.experimental import pallas as pl
from jax.experimental.pallas import tpu as pltpu


# ----------------------------------------------------------------------------
# Pallas kernels
# ----------------------------------------------------------------------------
def _bigru_layer_kernel(x_ref, wi_ref, wh_ref, bi_ref, bhn_ref, o_ref,
                        xp_ref, fwd_ref):
    """One bidirectional GRU layer in a single grid step.

    x_ref:   (T, N, D)      time-major input
    wi_ref:  (2, D, 3H)     fused input weights  [r|z|n], per direction
    wh_ref:  (2, H, 3H)     fused hidden weights [r|z|n], per direction
    bi_ref:  (2, 1, 3H)     fused biases [b_ir+b_hr | b_iz+b_hz | b_in]
    bhn_ref: (2, 1, H)      hidden bias of the n gate (kept separate)
    o_ref:   (T, N, 2H)     output: fwd in [..., :H], bwd in [..., H:]
    xp_ref:  (2, T, N, 3H)  VMEM scratch: hoisted input projections
    fwd_ref: (T, N, H)      VMEM scratch: staged forward outputs
    """
    T, N, D = x_ref.shape
    H = wh_ref.shape[1]
    H3 = 3 * H

    # ---- hoisted input projection: one large MXU matmul per direction ------
    x_flat = x_ref[...].reshape(T * N, D)
    for d in range(2):
        xp = jnp.dot(x_flat, wi_ref[d],
                     preferred_element_type=jnp.float32) + bi_ref[d]
        xp_ref[d] = xp.reshape(T, N, H3)

    def gru_cell(gx, h, wh, bhn):
        # single fused recurrent matmul per step (PyTorch GRU equations)
        gh = jnp.dot(h, wh, preferred_element_type=jnp.float32)      # (N, 3H)
        r = jax.nn.sigmoid(gx[:, 0:H] + gh[:, 0:H])
        z = jax.nn.sigmoid(gx[:, H:2 * H] + gh[:, H:2 * H])
        n = jnp.tanh(gx[:, 2 * H:H3] + r * (gh[:, 2 * H:H3] + bhn))
        return (1.0 - z) * n + z * h

    # ---- forward direction (outputs staged in VMEM scratch) ----------------
    wh_f = wh_ref[0]
    bhn_f = bhn_ref[0]
    h = jnp.zeros((N, H), jnp.float32)
    for t in range(T):          # T is small & static: full unroll in one step
        h = gru_cell(xp_ref[0, t], h, wh_f, bhn_f)
        fwd_ref[t] = h

    # ---- backward direction, fused with the concatenated output write ------
    wh_b = wh_ref[1]
    bhn_b = bhn_ref[1]
    h = jnp.zeros((N, H), jnp.float32)
    for i in range(T):
        t = T - 1 - i
        h = gru_cell(xp_ref[1, t], h, wh_b, bhn_b)
        o_ref[t] = jnp.concatenate([fwd_ref[t], h], axis=-1)   # full-row store


def bigru_layer(x, wi, wh, bi, bhn):
    """x: (T, N, D) -> (T, N, 2H); both directions in one pallas_call."""
    T, N, D = x.shape
    H = wh.shape[1]
    return pl.pallas_call(
        _bigru_layer_kernel,
        out_shape=jax.ShapeDtypeStruct((T, N, 2 * H), jnp.float32),
        in_specs=[pl.BlockSpec(memory_space=pltpu.MemorySpace.VMEM)] * 5,
        out_specs=pl.BlockSpec(memory_space=pltpu.MemorySpace.VMEM),
        scratch_shapes=[pltpu.VMEM((2, T, N, 3 * H), jnp.float32),
                        pltpu.VMEM((T, N, H), jnp.float32)],
    )(x, wi, wh, bi, bhn)


def _head_kernel(h_ref, fc1_ref, fc2_ref, fcw_ref, fcb_ref, o_ref, *, S, G):
    """Fused word pool+fc1, sentence pool+fc2 and final Linear(2H, O).

    h_ref: (T, S*G, 2H) GRU outputs; slot layout n = s*G + g with G a multiple
    of 8 (padded bag columns are discarded by the caller).
    """
    h = h_ref[...]
    mx = jnp.max(h, axis=0)
    mn = jnp.mean(h, axis=0)
    # fc1(2 -> 1) on stacked [max, mean]   (word_attn=False path)
    wv = fc1_ref[0] * mx + fc1_ref[1] * mn + fc1_ref[2]        # (S*G, 2H)

    if S > 1:
        smx = wv[0:G]
        ssum = wv[0:G]
        for s in range(1, S):
            chunk = wv[s * G:(s + 1) * G]                      # aligned slice
            smx = jnp.maximum(smx, chunk)
            ssum = ssum + chunk
        # fc2(2 -> 1) on stacked [max, mean]   (sent_attn=False path)
        sv = fc2_ref[0] * smx + fc2_ref[1] * (ssum / S) + fc2_ref[2]
    else:
        # matches the torch reference: fc2 is skipped when S == 1
        sv = wv[0:G]

    o_ref[...] = jnp.dot(sv, fcw_ref[...],
                         preferred_element_type=jnp.float32) + fcb_ref[...]


def bigru_head(h, fc1_vec, fc2_vec, fc_w_t, fc_b, S, G):
    O = fc_w_t.shape[1]
    return pl.pallas_call(
        functools.partial(_head_kernel, S=S, G=G),
        out_shape=jax.ShapeDtypeStruct((G, O), jnp.float32),
        in_specs=[pl.BlockSpec(memory_space=pltpu.MemorySpace.VMEM),
                  pl.BlockSpec(memory_space=pltpu.MemorySpace.SMEM),
                  pl.BlockSpec(memory_space=pltpu.MemorySpace.SMEM),
                  pl.BlockSpec(memory_space=pltpu.MemorySpace.VMEM),
                  pl.BlockSpec(memory_space=pltpu.MemorySpace.VMEM)],
        out_specs=pl.BlockSpec(memory_space=pltpu.MemorySpace.VMEM),
    )(h, fc1_vec, fc2_vec, fc_w_t, fc_b)


# ----------------------------------------------------------------------------
# Parameter setup + model wrapper (glue)
# ----------------------------------------------------------------------------
def _uniform(key, shape, bound):
    return jax.random.uniform(key, shape, jnp.float32, -bound, bound)


def _fuse_dir_params(W_ih, W_hh, b_ih, b_hh):
    """PyTorch (r,z,n)-stacked GRU params -> fused, pre-transposed layout."""
    H = W_hh.shape[1]
    wi = W_ih.T                                          # (in, 3H), cols r|z|n
    wh = W_hh.T                                          # (H, 3H)
    bi = jnp.concatenate([b_ih[:2 * H] + b_hh[:2 * H], b_ih[2 * H:]])
    return wi, wh, bi.reshape(1, 3 * H), b_hh[2 * H:].reshape(1, H)


class BiGRUPallas:
    def __init__(self, params, input_size, key):
        self.params = params
        self.add_pos = params['add_pos']
        self.pos_dim = params['pos_dim']
        self.pos_num = 2 * params['pos_limit'] + 3
        self.gru_dim = params['gru_dim']
        self.gru_layers = params['gru_layers']
        self.output_size = params['output_gru']
        self.input_size = input_size + (2 * self.pos_dim if self.add_pos else 0)
        H = self.gru_dim

        keys = iter(jax.random.split(key, 8 * self.gru_layers + 8))

        # Position embedding tables (only used when add_pos=True).
        self.pos1_embedding = jax.random.normal(next(keys), (self.pos_num, self.pos_dim))
        self.pos2_embedding = jax.random.normal(next(keys), (self.pos_num, self.pos_dim))

        bound = 1.0 / (H ** 0.5)
        self.gru_params = []
        for layer in range(self.gru_layers):
            in_dim = self.input_size if layer == 0 else 2 * H
            fused = []
            for _ in range(2):  # forward, backward
                W_ih = _uniform(next(keys), (3 * H, in_dim), bound)
                W_hh = _uniform(next(keys), (3 * H, H), bound)
                b_ih = _uniform(next(keys), (3 * H,), bound)
                b_hh = _uniform(next(keys), (3 * H,), bound)
                fused.append(_fuse_dir_params(W_ih, W_hh, b_ih, b_hh))
            wi = jnp.stack([fused[0][0], fused[1][0]])    # (2, in, 3H)
            wh = jnp.stack([fused[0][1], fused[1][1]])    # (2, H, 3H)
            bi = jnp.stack([fused[0][2], fused[1][2]])    # (2, 1, 3H)
            bhn = jnp.stack([fused[0][3], fused[1][3]])   # (2, 1, H)
            self.gru_params.append((wi, wh, bi, bhn))

        # fc1 / fc2: Linear(2, 1) applied to stacked [max, mean] pooled features.
        b12 = 1.0 / (2 ** 0.5)
        w1 = _uniform(next(keys), (1, 2), b12); bb1 = _uniform(next(keys), (1,), b12)
        w2 = _uniform(next(keys), (1, 2), b12); bb2 = _uniform(next(keys), (1,), b12)
        self.fc1_vec = jnp.array([w1[0, 0], w1[0, 1], bb1[0]], jnp.float32)
        self.fc2_vec = jnp.array([w2[0, 0], w2[0, 1], bb2[0]], jnp.float32)

        # fc: Linear(2H, output_size)
        bf = 1.0 / ((2 * H) ** 0.5)
        W_fc = _uniform(next(keys), (self.output_size, 2 * H), bf)
        b_fc = _uniform(next(keys), (self.output_size,), bf)
        self.fc_w_t = W_fc.T                 # (2H, O)
        self.fc_b = b_fc.reshape(1, -1)      # (1, O)

    def forward(self, bag, pairs, batch_size, max_length):
        """
        bag:   (S, num_bags, T, D) padded bag tensor (== gru_input_sen in torch).
        pairs: list of (doc_idx, ent_a, ent_b) tuples, one per bag.
        Returns bags_res of shape (batch_size, max_length, max_length, output_size).
        """
        bags_res = jnp.zeros(
            (batch_size, max_length, max_length, self.output_size), jnp.float32)
        if bag.size == 0:
            return bags_res

        S, num_bags, T, D = bag.shape
        # pad the bag axis to a multiple of 8: full sublane occupancy and
        # aligned per-sentence-slot blocks in the head kernel
        G_pad = ((num_bags + 7) // 8) * 8
        if G_pad != num_bags:
            bag = jnp.pad(bag, ((0, 0), (0, G_pad - num_bags), (0, 0), (0, 0)))
        N = S * G_pad

        # flatten all sentence slots into one GRU batch, time-major (T, N, D)
        x = bag.reshape(N, T, D).transpose(1, 0, 2)

        h = x
        for layer in range(self.gru_layers):
            wi, wh, bi, bhn = self.gru_params[layer]
            h = bigru_layer(h, wi, wh, bi, bhn)              # (T, N, 2H)
            # TODO(synk): training-mode inter-layer GRU dropout not implemented
            # (eval semantics).

        # fused word pool + fc1, sentence pool + fc2, final Linear(2H, O)
        bag_out = bigru_head(h, self.fc1_vec, self.fc2_vec,
                             self.fc_w_t, self.fc_b, S, G_pad)   # (G_pad, O)

        # vectorized scatter of the per-pair results (replaces the Python loop)
        if pairs:
            P = min(len(pairs), num_bags)
            idx = jnp.asarray(pairs, dtype=jnp.int32)[:P]        # (P, 3)
            bags_res = bags_res.at[idx[:, 0], idx[:, 1], idx[:, 2]].set(
                bag_out[:P])
        return bags_res


# ----------------------------------------------------------------------------
if __name__ == "__main__":
    params = dict(batch=2, add_pos=False, pos_limit=30, pos_dim=4, gpu=-1,
                  output_gru=8, gru_dim=32, gru_layers=2, gru_dropout=0.0,
                  word_attn=False, sent_attn=False)
    input_size = 16

    key = jax.random.PRNGKey(0)
    k_model, k_data = jax.random.split(key)
    model = BiGRUPallas(params, input_size, k_model)

    # Synthetic, already-bagged input (see TODO(synk) at top):
    #   S = max sentences per bag, num_bags = number of entity-pair bags,
    #   T = sentence length, D = token feature size.
    S, num_bags, T = 2, 3, 8
    bag = jax.random.normal(k_data, (S, num_bags, T, input_size), jnp.float32)
    pairs = [(0, 0, 1), (0, 1, 2), (1, 0, 2)]
    batch_size, max_length = 2, 3

    out = model.forward(bag, pairs, batch_size, max_length)
    out = jax.block_until_ready(out)
    assert out.shape == (batch_size, max_length, max_length, params['output_gru'])
    assert bool(jnp.all(jnp.isfinite(out)))
    print("KERNEL_OK")
</pallas_src>

<mosaic_0001>
module attributes {stable_mosaic.version = 11 : i64} {
  func.func @_bigru_layer_kernel(%arg0: memref<8x16x16xf32, #tpu.memory_space<vmem>>, %arg1: memref<2x16x96xf32, #tpu.memory_space<vmem>>, %arg2: memref<2x32x96xf32, #tpu.memory_space<vmem>>, %arg3: memref<2x1x96xf32, #tpu.memory_space<vmem>>, %arg4: memref<2x1x32xf32, #tpu.memory_space<vmem>>, %arg5: memref<8x16x64xf32, #tpu.memory_space<vmem>>, %arg6: memref<2x8x16x96xf32, #tpu.memory_space<vmem>>, %arg7: memref<8x16x32xf32, #tpu.memory_space<vmem>>) attributes {dimension_semantics = [], scalar_prefetch = 0 : i64, scratch_operands = 2 : i64, tpu.core_type = #tpu.core_type<tc>} {
    %c0 = arith.constant 0 : index
    %c0_0 = arith.constant 0 : index
    %c0_1 = arith.constant 0 : index
    %0 = vector.load %arg0[%c0, %c0_0, %c0_1] : memref<8x16x16xf32, #tpu.memory_space<vmem>>, vector<8x16x16xf32>
    %1 = vector.shape_cast %0 : vector<8x16x16xf32> to vector<128x16xf32>
    %c0_2 = arith.constant 0 : index
    %c0_3 = arith.constant 0 : index
    %c0_4 = arith.constant 0 : index
    %2 = vector.load %arg1[%c0_2, %c0_3, %c0_4] : memref<2x16x96xf32, #tpu.memory_space<vmem>>, vector<1x16x96xf32>
    %3 = vector.shape_cast %2 : vector<1x16x96xf32> to vector<16x96xf32>
    %cst = arith.constant dense<0.000000e+00> : vector<128x96xf32>
    %4 = tpu.matmul %1, %3, %cst {dimension_numbers = #tpu.dot_dimension_numbers<[1], [0], [0], [1], [0, 0, 1, 1], [], []>} : vector<128x16xf32>, vector<16x96xf32>, vector<128x96xf32> -> vector<128x96xf32>
    %c0_5 = arith.constant 0 : index
    %c0_6 = arith.constant 0 : index
    %c0_7 = arith.constant 0 : index
    %5 = vector.load %arg3[%c0_5, %c0_6, %c0_7] : memref<2x1x96xf32, #tpu.memory_space<vmem>>, vector<1x1x96xf32>
    %6 = vector.shape_cast %5 : vector<1x1x96xf32> to vector<1x96xf32>
    %7 = vector.broadcast %6 : vector<1x96xf32> to vector<128x96xf32>
    %8 = arith.addf %4, %7 : vector<128x96xf32>
    %9 = vector.shape_cast %8 : vector<128x96xf32> to vector<8x16x96xf32>
    %c0_8 = arith.constant 0 : index
    %c0_9 = arith.constant 0 : index
    %c0_10 = arith.constant 0 : index
    %c0_11 = arith.constant 0 : index
    %10 = vector.load %arg6[%c0_8, %c0_9, %c0_10, %c0_11] : memref<2x8x16x96xf32, #tpu.memory_space<vmem>>, vector<1x8x16x96xf32>
    %11 = vector.shape_cast %10 : vector<1x8x16x96xf32> to vector<8x16x96xf32>
    %12 = vector.shape_cast %9 : vector<8x16x96xf32> to vector<1x8x16x96xf32>
    tpu.vector_store %arg6[%c0_8, %c0_9, %c0_10, %c0_11], %12 {strides = array<i32>} : memref<2x8x16x96xf32, #tpu.memory_space<vmem>>, vector<1x8x16x96xf32>,
    %c1 = arith.constant 1 : index
    %c0_12 = arith.constant 0 : index
    %c0_13 = arith.constant 0 : index
    %13 = vector.load %arg1[%c1, %c0_12, %c0_13] : memref<2x16x96xf32, #tpu.memory_space<vmem>>, vector<1x16x96xf32>
    %14 = vector.shape_cast %13 : vector<1x16x96xf32> to vector<16x96xf32>
    %cst_14 = arith.constant dense<0.000000e+00> : vector<128x96xf32>
    %15 = tpu.matmul %1, %14, %cst_14 {dimension_numbers = #tpu.dot_dimension_numbers<[1], [0], [0], [1], [0, 0, 1, 1], [], []>} : vector<128x16xf32>, vector<16x96xf32>, vector<128x96xf32> -> vector<128x96xf32>
    %c1_15 = arith.constant 1 : index
    %c0_16 = arith.constant 0 : index
    %c0_17 = arith.constant 0 : index
    %16 = vector.load %arg3[%c1_15, %c0_16, %c0_17] : memref<2x1x96xf32, #tpu.memory_space<vmem>>, vector<1x1x96xf32>
    %17 = vector.shape_cast %16 : vector<1x1x96xf32> to vector<1x96xf32>
    %18 = vector.broadcast %17 : vector<1x96xf32> to vector<128x96xf32>
    %19 = arith.addf %15, %18 : vector<128x96xf32>
    %20 = vector.shape_cast %19 : vector<128x96xf32> to vector<8x16x96xf32>
    %c1_18 = arith.constant 1 : index
    %c0_19 = arith.constant 0 : index
    %c0_20 = arith.constant 0 : index
    %c0_21 = arith.constant 0 : index
    %21 = vector.load %arg6[%c1_18, %c0_19, %c0_20, %c0_21] : memref<2x8x16x96xf32, #tpu.memory_space<vmem>>, vector<1x8x16x96xf32>
    %22 = vector.shape_cast %21 : vector<1x8x16x96xf32> to vector<8x16x96xf32>
    %23 = vector.shape_cast %20 : vector<8x16x96xf32> to vector<1x8x16x96xf32>
    tpu.vector_store %arg6[%c1_18, %c0_19, %c0_20, %c0_21], %23 {strides = array<i32>} : memref<2x8x16x96xf32, #tpu.memory_space<vmem>>, vector<1x8x16x96xf32>,
    %c0_22 = arith.constant 0 : index
    %c0_23 = arith.constant 0 : index
    %c0_24 = arith.constant 0 : index
    %24 = vector.load %arg2[%c0_22, %c0_23, %c0_24] : memref<2x32x96xf32, #tpu.memory_space<vmem>>, vector<1x32x96xf32>
    %25 = vector.shape_cast %24 : vector<1x32x96xf32> to vector<32x96xf32>
    %c0_25 = arith.constant 0 : index
    %c0_26 = arith.constant 0 : index
    %c0_27 = arith.constant 0 : index
    %26 = vector.load %arg4[%c0_25, %c0_26, %c0_27] : memref<2x1x32xf32, #tpu.memory_space<vmem>>, vector<1x1x32xf32>
    %27 = vector.shape_cast %26 : vector<1x1x32xf32> to vector<1x32xf32>
    %cst_28 = arith.constant 0.000000e+00 : f32
    %28 = vector.broadcast %cst_28 : f32 to vector<16x32xf32>
    %c0_29 = arith.constant 0 : index
    %c0_30 = arith.constant 0 : index
    %c0_31 = arith.constant 0 : index
    %c0_32 = arith.constant 0 : index
    %29 = vector.load %arg6[%c0_29, %c0_30, %c0_31, %c0_32] : memref<2x8x16x96xf32, #tpu.memory_space<vmem>>, vector<1x1x16x96xf32>
    %30 = vector.shape_cast %29 : vector<1x1x16x96xf32> to vector<16x96xf32>
    %cst_33 = arith.constant dense<0.000000e+00> : vector<16x96xf32>
    %31 = tpu.matmul %28, %25, %cst_33 {dimension_numbers = #tpu.dot_dimension_numbers<[1], [0], [0], [1], [0, 0, 1, 1], [], []>} : vector<16x32xf32>, vector<32x96xf32>, vector<16x96xf32> -> vector<16x96xf32>
    %32 = vector.extract_strided_slice %30 {offsets = [0, 0], sizes = [16, 32], strides = [1, 1]} : vector<16x96xf32> to vector<16x32xf32>
    %33 = vector.extract_strided_slice %31 {offsets = [0, 0], sizes = [16, 32], strides = [1, 1]} : vector<16x96xf32> to vector<16x32xf32>
    %34 = arith.addf %32, %33 : vector<16x32xf32>
    %35 = arith.negf %34 : vector<16x32xf32>
    %36 = math.exp %35 : vector<16x32xf32>
    %cst_34 = arith.constant 1.000000e+00 : f32
    %37 = vector.broadcast %cst_34 : f32 to vector<16x32xf32>
    %38 = arith.addf %37, %36 : vector<16x32xf32>
    %39 = arith.divf %37, %38 : vector<16x32xf32>
    %40 = vector.extract_strided_slice %30 {offsets = [0, 32], sizes = [16, 32], strides = [1, 1]} : vector<16x96xf32> to vector<16x32xf32>
    %41 = vector.extract_strided_slice %31 {offsets = [0, 32], sizes = [16, 32], strides = [1, 1]} : vector<16x96xf32> to vector<16x32xf32>
    %42 = arith.addf %40, %41 : vector<16x32xf32>
    %43 = arith.negf %42 : vector<16x32xf32>
    %44 = math.exp %43 : vector<16x32xf32>
    %cst_35 = arith.constant 1.000000e+00 : f32
    %45 = vector.broadcast %cst_35 : f32 to vector<16x32xf32>
    %46 = arith.addf %45, %44 : vector<16x32xf32>
    %47 = arith.divf %45, %46 : vector<16x32xf32>
    %48 = vector.extract_strided_slice %30 {offsets = [0, 64], sizes = [16, 32], strides = [1, 1]} : vector<16x96xf32> to vector<16x32xf32>
    %49 = vector.extract_strided_slice %31 {offsets = [0, 64], sizes = [16, 32], strides = [1, 1]} : vector<16x96xf32> to vector<16x32xf32>
    %50 = vector.broadcast %27 : vector<1x32xf32> to vector<16x32xf32>
    %51 = arith.addf %49, %50 : vector<16x32xf32>
    %52 = arith.mulf %39, %51 : vector<16x32xf32>
    %53 = arith.addf %48, %52 : vector<16x32xf32>
    %54 = math.tanh %53 : vector<16x32xf32>
    %cst_36 = arith.constant 1.000000e+00 : f32
    %55 = vector.broadcast %cst_36 : f32 to vector<16x32xf32>
    %56 = arith.subf %55, %47 : vector<16x32xf32>
    %57 = arith.mulf %56, %54 : vector<16x32xf32>
    %58 = arith.mulf %47, %28 : vector<16x32xf32>
    %59 = arith.addf %57, %58 : vector<16x32xf32>
    %c0_37 = arith.constant 0 : index
    %c0_38 = arith.constant 0 : index
    %c0_39 = arith.constant 0 : index
    %60 = vector.load %arg7[%c0_37, %c0_38, %c0_39] : memref<8x16x32xf32, #tpu.memory_space<vmem>>, vector<1x16x32xf32>
    %61 = vector.shape_cast %60 : vector<1x16x32xf32> to vector<16x32xf32>
    %62 = vector.shape_cast %59 : vector<16x32xf32> to vector<1x16x32xf32>
    tpu.vector_store %arg7[%c0_37, %c0_38, %c0_39], %62 {strides = array<i32>} : memref<8x16x32xf32, #tpu.memory_space<vmem>>, vector<1x16x32xf32>,
    %c0_40 = arith.constant 0 : index
    %c1_41 = arith.constant 1 : index
    %c0_42 = arith.constant 0 : index
    %c0_43 = arith.constant 0 : index
    %63 = vector.load %arg6[%c0_40, %c1_41, %c0_42, %c0_43] : memref<2x8x16x96xf32, #tpu.memory_space<vmem>>, vector<1x1x16x96xf32>
    %64 = vector.shape_cast %63 : vector<1x1x16x96xf32> to vector<16x96xf32>
    %cst_44 = arith.constant dense<0.000000e+00> : vector<16x96xf32>
    %65 = tpu.matmul %59, %25, %cst_44 {dimension_numbers = #tpu.dot_dimension_numbers<[1], [0], [0], [1], [0, 0, 1, 1], [], []>} : vector<16x32xf32>, vector<32x96xf32>, vector<16x96xf32> -> vector<16x96xf32>
    %66 = vector.extract_strided_slice %64 {offsets = [0, 0], sizes = [16, 32], strides = [1, 1]} : vector<16x96xf32> to vector<16x32xf32>
    %67 = vector.extract_strided_slice %65 {offsets = [0, 0], sizes = [16, 32], strides = [1, 1]} : vector<16x96xf32> to vector<16x32xf32>
    %68 = arith.addf %66, %67 : vector<16x32xf32>
    %69 = arith.negf %68 : vector<16x32xf32>
    %70 = math.exp %69 : vector<16x32xf32>
    %cst_45 = arith.constant 1.000000e+00 : f32
    %71 = vector.broadcast %cst_45 : f32 to vector<16x32xf32>
    %72 = arith.addf %71, %70 : vector<16x32xf32>
    %73 = arith.divf %71, %72 : vector<16x32xf32>
    %74 = vector.extract_strided_slice %64 {offsets = [0, 32], sizes = [16, 32], strides = [1, 1]} : vector<16x96xf32> to vector<16x32xf32>
    %75 = vector.extract_strided_slice %65 {offsets = [0, 32], sizes = [16, 32], strides = [1, 1]} : vector<16x96xf32> to vector<16x32xf32>
    %76 = arith.addf %74, %75 : vector<16x32xf32>
    %77 = arith.negf %76 : vector<16x32xf32>
    %78 = math.exp %77 : vector<16x32xf32>
    %cst_46 = arith.constant 1.000000e+00 : f32
    %79 = vector.broadcast %cst_46 : f32 to vector<16x32xf32>
    %80 = arith.addf %79, %78 : vector<16x32xf32>
    %81 = arith.divf %79, %80 : vector<16x32xf32>
    %82 = vector.extract_strided_slice %64 {offsets = [0, 64], sizes = [16, 32], strides = [1, 1]} : vector<16x96xf32> to vector<16x32xf32>
    %83 = vector.extract_strided_slice %65 {offsets = [0, 64], sizes = [16, 32], strides = [1, 1]} : vector<16x96xf32> to vector<16x32xf32>
    %84 = vector.broadcast %27 : vector<1x32xf32> to vector<16x32xf32>
    %85 = arith.addf %83, %84 : vector<16x32xf32>
    %86 = arith.mulf %73, %85 : vector<16x32xf32>
    %87 = arith.addf %82, %86 : vector<16x32xf32>
    %88 = math.tanh %87 : vector<16x32xf32>
    %cst_47 = arith.constant 1.000000e+00 : f32
    %89 = vector.broadcast %cst_47 : f32 to vector<16x32xf32>
    %90 = arith.subf %89, %81 : vector<16x32xf32>
    %91 = arith.mulf %90, %88 : vector<16x32xf32>
    %92 = arith.mulf %81, %59 : vector<16x32xf32>
    %93 = arith.addf %91, %92 : vector<16x32xf32>
    %c1_48 = arith.constant 1 : index
    %c0_49 = arith.constant 0 : index
    %c0_50 = arith.constant 0 : index
    %94 = vector.load %arg7[%c1_48, %c0_49, %c0_50] : memref<8x16x32xf32, #tpu.memory_space<vmem>>, vector<1x16x32xf32>
    %95 = vector.shape_cast %94 : vector<1x16x32xf32> to vector<16x32xf32>
    %96 = vector.shape_cast %93 : vector<16x32xf32> to vector<1x16x32xf32>
    tpu.vector_store %arg7[%c1_48, %c0_49, %c0_50], %96 {strides = array<i32>} : memref<8x16x32xf32, #tpu.memory_space<vmem>>, vector<1x16x32xf32>,
    %c0_51 = arith.constant 0 : index
    %c2 = arith.constant 2 : index
    %c0_52 = arith.constant 0 : index
    %c0_53 = arith.constant 0 : index
    %97 = vector.load %arg6[%c0_51, %c2, %c0_52, %c0_53] : memref<2x8x16x96xf32, #tpu.memory_space<vmem>>, vector<1x1x16x96xf32>
    %98 = vector.shape_cast %97 : vector<1x1x16x96xf32> to vector<16x96xf32>
    %cst_54 = arith.constant dense<0.000000e+00> : vector<16x96xf32>
    %99 = tpu.matmul %93, %25, %cst_54 {dimension_numbers = #tpu.dot_dimension_numbers<[1], [0], [0], [1], [0, 0, 1, 1], [], []>} : vector<16x32xf32>, vector<32x96xf32>, vector<16x96xf32> -> vector<16x96xf32>
    %100 = vector.extract_strided_slice %98 {offsets = [0, 0], sizes = [16, 32], strides = [1, 1]} : vector<16x96xf32> to vector<16x32xf32>
    %101 = vector.extract_strided_slice %99 {offsets = [0, 0], sizes = [16, 32], strides = [1, 1]} : vector<16x96xf32> to vector<16x32xf32>
    %102 = arith.addf %100, %101 : vector<16x32xf32>
    %103 = arith.negf %102 : vector<16x32xf32>
    %104 = math.exp %103 : vector<16x32xf32>
    %cst_55 = arith.constant 1.000000e+00 : f32
    %105 = vector.broadcast %cst_55 : f32 to vector<16x32xf32>
    %106 = arith.addf %105, %104 : vector<16x32xf32>
    %107 = arith.divf %105, %106 : vector<16x32xf32>
    %108 = vector.extract_strided_slice %98 {offsets = [0, 32], sizes = [16, 32], strides = [1, 1]} : vector<16x96xf32> to vector<16x32xf32>
    %109 = vector.extract_strided_slice %99 {offsets = [0, 32], sizes = [16, 32], strides = [1, 1]} : vector<16x96xf32> to vector<16x32xf32>
    %110 = arith.addf %108, %109 : vector<16x32xf32>
    %111 = arith.negf %110 : vector<16x32xf32>
    %112 = math.exp %111 : vector<16x32xf32>
    %cst_56 = arith.constant 1.000000e+00 : f32
    %113 = vector.broadcast %cst_56 : f32 to vector<16x32xf32>
    %114 = arith.addf %113, %112 : vector<16x32xf32>
    %115 = arith.divf %113, %114 : vector<16x32xf32>
    %116 = vector.extract_strided_slice %98 {offsets = [0, 64], sizes = [16, 32], strides = [1, 1]} : vector<16x96xf32> to vector<16x32xf32>
    %117 = vector.extract_strided_slice %99 {offsets = [0, 64], sizes = [16, 32], strides = [1, 1]} : vector<16x96xf32> to vector<16x32xf32>
    %118 = vector.broadcast %27 : vector<1x32xf32> to vector<16x32xf32>
    %119 = arith.addf %117, %118 : vector<16x32xf32>
    %120 = arith.mulf %107, %119 : vector<16x32xf32>
    %121 = arith.addf %116, %120 : vector<16x32xf32>
    %122 = math.tanh %121 : vector<16x32xf32>
    %cst_57 = arith.constant 1.000000e+00 : f32
    %123 = vector.broadcast %cst_57 : f32 to vector<16x32xf32>
    %124 = arith.subf %123, %115 : vector<16x32xf32>
    %125 = arith.mulf %124, %122 : vector<16x32xf32>
    %126 = arith.mulf %115, %93 : vector<16x32xf32>
    %127 = arith.addf %125, %126 : vector<16x32xf32>
    %c2_58 = arith.constant 2 : index
    %c0_59 = arith.constant 0 : index
    %c0_60 = arith.constant 0 : index
    %128 = vector.load %arg7[%c2_58, %c0_59, %c0_60] : memref<8x16x32xf32, #tpu.memory_space<vmem>>, vector<1x16x32xf32>
    %129 = vector.shape_cast %128 : vector<1x16x32xf32> to vector<16x32xf32>
    %130 = vector.shape_cast %127 : vector<16x32xf32> to vector<1x16x32xf32>
    tpu.vector_store %arg7[%c2_58, %c0_59, %c0_60], %130 {strides = array<i32>} : memref<8x16x32xf32, #tpu.memory_space<vmem>>, vector<1x16x32xf32>,
    %c0_61 = arith.constant 0 : index
    %c3 = arith.constant 3 : index
    %c0_62 = arith.constant 0 : index
    %c0_63 = arith.constant 0 : index
    %131 = vector.load %arg6[%c0_61, %c3, %c0_62, %c0_63] : memref<2x8x16x96xf32, #tpu.memory_space<vmem>>, vector<1x1x16x96xf32>
    %132 = vector.shape_cast %131 : vector<1x1x16x96xf32> to vector<16x96xf32>
    %cst_64 = arith.constant dense<0.000000e+00> : vector<16x96xf32>
    %133 = tpu.matmul %127, %25, %cst_64 {dimension_numbers = #tpu.dot_dimension_numbers<[1], [0], [0], [1], [0, 0, 1, 1], [], []>} : vector<16x32xf32>, vector<32x96xf32>, vector<16x96xf32> -> vector<16x96xf32>
    %134 = vector.extract_strided_slice %132 {offsets = [0, 0], sizes = [16, 32], strides = [1, 1]} : vector<16x96xf32> to vector<16x32xf32>
    %135 = vector.extract_strided_slice %133 {offsets = [0, 0], sizes = [16, 32], strides = [1, 1]} : vector<16x96xf32> to vector<16x32xf32>
    %136 = arith.addf %134, %135 : vector<16x32xf32>
    %137 = arith.negf %136 : vector<16x32xf32>
    %138 = math.exp %137 : vector<16x32xf32>
    %cst_65 = arith.constant 1.000000e+00 : f32
    %139 = vector.broadcast %cst_65 : f32 to vector<16x32xf32>
    %140 = arith.addf %139, %138 : vector<16x32xf32>
    %141 = arith.divf %139, %140 : vector<16x32xf32>
    %142 = vector.extract_strided_slice %132 {offsets = [0, 32], sizes = [16, 32], strides = [1, 1]} : vector<16x96xf32> to vector<16x32xf32>
    %143 = vector.extract_strided_slice %133 {offsets = [0, 32], sizes = [16, 32], strides = [1, 1]} : vector<16x96xf32> to vector<16x32xf32>
    %144 = arith.addf %142, %143 : vector<16x32xf32>
    %145 = arith.negf %144 : vector<16x32xf32>
    %146 = math.exp %145 : vector<16x32xf32>
    %cst_66 = arith.constant 1.000000e+00 : f32
    %147 = vector.broadcast %cst_66 : f32 to vector<16x32xf32>
    %148 = arith.addf %147, %146 : vector<16x32xf32>
    %149 = arith.divf %147, %148 : vector<16x32xf32>
    %150 = vector.extract_strided_slice %132 {offsets = [0, 64], sizes = [16, 32], strides = [1, 1]} : vector<16x96xf32> to vector<16x32xf32>
    %151 = vector.extract_strided_slice %133 {offsets = [0, 64], sizes = [16, 32], strides = [1, 1]} : vector<16x96xf32> to vector<16x32xf32>
    %152 = vector.broadcast %27 : vector<1x32xf32> to vector<16x32xf32>
    %153 = arith.addf %151, %152 : vector<16x32xf32>
    %154 = arith.mulf %141, %153 : vector<16x32xf32>
    %155 = arith.addf %150, %154 : vector<16x32xf32>
    %156 = math.tanh %155 : vector<16x32xf32>
    %cst_67 = arith.constant 1.000000e+00 : f32
    %157 = vector.broadcast %cst_67 : f32 to vector<16x32xf32>
    %158 = arith.subf %157, %149 : vector<16x32xf32>
    %159 = arith.mulf %158, %156 : vector<16x32xf32>
    %160 = arith.mulf %149, %127 : vector<16x32xf32>
    %161 = arith.addf %159, %160 : vector<16x32xf32>
    %c3_68 = arith.constant 3 : index
    %c0_69 = arith.constant 0 : index
    %c0_70 = arith.constant 0 : index
    %162 = vector.load %arg7[%c3_68, %c0_69, %c0_70] : memref<8x16x32xf32, #tpu.memory_space<vmem>>, vector<1x16x32xf32>
    %163 = vector.shape_cast %162 : vector<1x16x32xf32> to vector<16x32xf32>
    %164 = vector.shape_cast %161 : vector<16x32xf32> to vector<1x16x32xf32>
    tpu.vector_store %arg7[%c3_68, %c0_69, %c0_70], %164 {strides = array<i32>} : memref<8x16x32xf32, #tpu.memory_space<vmem>>, vector<1x16x32xf32>,
    %c0_71 = arith.constant 0 : index
    %c4 = arith.constant 4 : index
    %c0_72 = arith.constant 0 : index
    %c0_73 = arith.constant 0 : index
    %165 = vector.load %arg6[%c0_71, %c4, %c0_72, %c0_73] : memref<2x8x16x96xf32, #tpu.memory_space<vmem>>, vector<1x1x16x96xf32>
    %166 = vector.shape_cast %165 : vector<1x1x16x96xf32> to vector<16x96xf32>
    %cst_74 = arith.constant dense<0.000000e+00> : vector<16x96xf32>
    %167 = tpu.matmul %161, %25, %cst_74 {dimension_numbers = #tpu.dot_dimension_numbers<[1], [0], [0], [1], [0, 0, 1, 1], [], []>} : vector<16x32xf32>, vector<32x96xf32>, vector<16x96xf32> -> vector<16x96xf32>
    %168 = vector.extract_strided_slice %166 {offsets = [0, 0], sizes = [16, 32], strides = [1, 1]} : vector<16x96xf32> to vector<16x32xf32>
    %169 = vector.extract_strided_slice %167 {offsets = [0, 0], sizes = [16, 32], strides = [1, 1]} : vector<16x96xf32> to vector<16x32xf32>
    %170 = arith.addf %168, %169 : vector<16x32xf32>
    %171 = arith.negf %170 : vector<16x32xf32>
    %172 = math.exp %171 : vector<16x32xf32>
    %cst_75 = arith.constant 1.000000e+00 : f32
    %173 = vector.broadcast %cst_75 : f32 to vector<16x32xf32>
    %174 = arith.addf %173, %172 : vector<16x32xf32>
    %175 = arith.divf %173, %174 : vector<16x32xf32>
    %176 = vector.extract_strided_slice %166 {offsets = [0, 32], sizes = [16, 32], strides = [1, 1]} : vector<16x96xf32> to vector<16x32xf32>
    %177 = vector.extract_strided_slice %167 {offsets = [0, 32], sizes = [16, 32], strides = [1, 1]} : vector<16x96xf32> to vector<16x32xf32>
    %178 = arith.addf %176, %177 : vector<16x32xf32>
    %179 = arith.negf %178 : vector<16x32xf32>
    %180 = math.exp %179 : vector<16x32xf32>
    %cst_76 = arith.constant 1.000000e+00 : f32
    %181 = vector.broadcast %cst_76 : f32 to vector<16x32xf32>
    %182 = arith.addf %181, %180 : vector<16x32xf32>
    %183 = arith.divf %181, %182 : vector<16x32xf32>
    %184 = vector.extract_strided_slice %166 {offsets = [0, 64], sizes = [16, 32], strides = [1, 1]} : vector<16x96xf32> to vector<16x32xf32>
    %185 = vector.extract_strided_slice %167 {offsets = [0, 64], sizes = [16, 32], strides = [1, 1]} : vector<16x96xf32> to vector<16x32xf32>
    %186 = vector.broadcast %27 : vector<1x32xf32> to vector<16x32xf32>
    %187 = arith.addf %185, %186 : vector<16x32xf32>
    %188 = arith.mulf %175, %187 : vector<16x32xf32>
    %189 = arith.addf %184, %188 : vector<16x32xf32>
    %190 = math.tanh %189 : vector<16x32xf32>
    %cst_77 = arith.constant 1.000000e+00 : f32
    %191 = vector.broadcast %cst_77 : f32 to vector<16x32xf32>
    %192 = arith.subf %191, %183 : vector<16x32xf32>
    %193 = arith.mulf %192, %190 : vector<16x32xf32>
    %194 = arith.mulf %183, %161 : vector<16x32xf32>
    %195 = arith.addf %193, %194 : vector<16x32xf32>
    %c4_78 = arith.constant 4 : index
    %c0_79 = arith.constant 0 : index
    %c0_80 = arith.constant 0 : index
    %196 = vector.load %arg7[%c4_78, %c0_79, %c0_80] : memref<8x16x32xf32, #tpu.memory_space<vmem>>, vector<1x16x32xf32>
    %197 = vector.shape_cast %196 : vector<1x16x32xf32> to vector<16x32xf32>
    %198 = vector.shape_cast %195 : vector<16x32xf32> to vector<1x16x32xf32>
    tpu.vector_store %arg7[%c4_78, %c0_79, %c0_80], %198 {strides = array<i32>} : memref<8x16x32xf32, #tpu.memory_space<vmem>>, vector<1x16x32xf32>,
    %c0_81 = arith.constant 0 : index
    %c5 = arith.constant 5 : index
    %c0_82 = arith.constant 0 : index
    %c0_83 = arith.constant 0 : index
    %199 = vector.load %arg6[%c0_81, %c5, %c0_82, %c0_83] : memref<2x8x16x96xf32, #tpu.memory_space<vmem>>, vector<1x1x16x96xf32>
    %200 = vector.shape_cast %199 : vector<1x1x16x96xf32> to vector<16x96xf32>
    %cst_84 = arith.constant dense<0.000000e+00> : vector<16x96xf32>
    %201 = tpu.matmul %195, %25, %cst_84 {dimension_numbers = #tpu.dot_dimension_numbers<[1], [0], [0], [1], [0, 0, 1, 1], [], []>} : vector<16x32xf32>, vector<32x96xf32>, vector<16x96xf32> -> vector<16x96xf32>
    %202 = vector.extract_strided_slice %200 {offsets = [0, 0], sizes = [16, 32], strides = [1, 1]} : vector<16x96xf32> to vector<16x32xf32>
    %203 = vector.extract_strided_slice %201 {offsets = [0, 0], sizes = [16, 32], strides = [1, 1]} : vector<16x96xf32> to vector<16x32xf32>
    %204 = arith.addf %202, %203 : vector<16x32xf32>
    %205 = arith.negf %204 : vector<16x32xf32>
    %206 = math.exp %205 : vector<16x32xf32>
    %cst_85 = arith.constant 1.000000e+00 : f32
    %207 = vector.broadcast %cst_85 : f32 to vector<16x32xf32>
    %208 = arith.addf %207, %206 : vector<16x32xf32>
    %209 = arith.divf %207, %208 : vector<16x32xf32>
    %210 = vector.extract_strided_slice %200 {offsets = [0, 32], sizes = [16, 32], strides = [1, 1]} : vector<16x96xf32> to vector<16x32xf32>
    %211 = vector.extract_strided_slice %201 {offsets = [0, 32], sizes = [16, 32], strides = [1, 1]} : vector<16x96xf32> to vector<16x32xf32>
    %212 = arith.addf %210, %211 : vector<16x32xf32>
    %213 = arith.negf %212 : vector<16x32xf32>
    %214 = math.exp %213 : vector<16x32xf32>
    %cst_86 = arith.constant 1.000000e+00 : f32
    %215 = vector.broadcast %cst_86 : f32 to vector<16x32xf32>
    %216 = arith.addf %215, %214 : vector<16x32xf32>
    %217 = arith.divf %215, %216 : vector<16x32xf32>
    %218 = vector.extract_strided_slice %200 {offsets = [0, 64], sizes = [16, 32], strides = [1, 1]} : vector<16x96xf32> to vector<16x32xf32>
    %219 = vector.extract_strided_slice %201 {offsets = [0, 64], sizes = [16, 32], strides = [1, 1]} : vector<16x96xf32> to vector<16x32xf32>
    %220 = vector.broadcast %27 : vector<1x32xf32> to vector<16x32xf32>
    %221 = arith.addf %219, %220 : vector<16x32xf32>
    %222 = arith.mulf %209, %221 : vector<16x32xf32>
    %223 = arith.addf %218, %222 : vector<16x32xf32>
    %224 = math.tanh %223 : vector<16x32xf32>
    %cst_87 = arith.constant 1.000000e+00 : f32
    %225 = vector.broadcast %cst_87 : f32 to vector<16x32xf32>
    %226 = arith.subf %225, %217 : vector<16x32xf32>
    %227 = arith.mulf %226, %224 : vector<16x32xf32>
    %228 = arith.mulf %217, %195 : vector<16x32xf32>
    %229 = arith.addf %227, %228 : vector<16x32xf32>
    %c5_88 = arith.constant 5 : index
    %c0_89 = arith.constant 0 : index
    %c0_90 = arith.constant 0 : index
    %230 = vector.load %arg7[%c5_88, %c0_89, %c0_90] : memref<8x16x32xf32, #tpu.memory_space<vmem>>, vector<1x16x32xf32>
    %231 = vector.shape_cast %230 : vector<1x16x32xf32> to vector<16x32xf32>
    %232 = vector.shape_cast %229 : vector<16x32xf32> to vector<1x16x32xf32>
    tpu.vector_store %arg7[%c5_88, %c0_89, %c0_90], %232 {strides = array<i32>} : memref<8x16x32xf32, #tpu.memory_space<vmem>>, vector<1x16x32xf32>,
    %c0_91 = arith.constant 0 : index
    %c6 = arith.constant 6 : index
    %c0_92 = arith.constant 0 : index
    %c0_93 = arith.constant 0 : index
    %233 = vector.load %arg6[%c0_91, %c6, %c0_92, %c0_93] : memref<2x8x16x96xf32, #tpu.memory_space<vmem>>, vector<1x1x16x96xf32>
    %234 = vector.shape_cast %233 : vector<1x1x16x96xf32> to vector<16x96xf32>
    %cst_94 = arith.constant dense<0.000000e+00> : vector<16x96xf32>
    %235 = tpu.matmul %229, %25, %cst_94 {dimension_numbers = #tpu.dot_dimension_numbers<[1], [0], [0], [1], [0, 0, 1, 1], [], []>} : vector<16x32xf32>, vector<32x96xf32>, vector<16x96xf32> -> vector<16x96xf32>
    %236 = vector.extract_strided_slice %234 {offsets = [0, 0], sizes = [16, 32], strides = [1, 1]} : vector<16x96xf32> to vector<16x32xf32>
    %237 = vector.extract_strided_slice %235 {offsets = [0, 0], sizes = [16, 32], strides = [1, 1]} : vector<16x96xf32> to vector<16x32xf32>
    %238 = arith.addf %236, %237 : vector<16x32xf32>
    %239 = arith.negf %238 : vector<16x32xf32>
    %240 = math.exp %239 : vector<16x32xf32>
    %cst_95 = arith.constant 1.000000e+00 : f32
    %241 = vector.broadcast %cst_95 : f32 to vector<16x32xf32>
    %242 = arith.addf %241, %240 : vector<16x32xf32>
    %243 = arith.divf %241, %242 : vector<16x32xf32>
    %244 = vector.extract_strided_slice %234 {offsets = [0, 32], sizes = [16, 32], strides = [1, 1]} : vector<16x96xf32> to vector<16x32xf32>
    %245 = vector.extract_strided_slice %235 {offsets = [0, 32], sizes = [16, 32], strides = [1, 1]} : vector<16x96xf32> to vector<16x32xf32>
    %246 = arith.addf %244, %245 : vector<16x32xf32>
    %247 = arith.negf %246 : vector<16x32xf32>
    %248 = math.exp %247 : vector<16x32xf32>
    %cst_96 = arith.constant 1.000000e+00 : f32
    %249 = vector.broadcast %cst_96 : f32 to vector<16x32xf32>
    %250 = arith.addf %249, %248 : vector<16x32xf32>
    %251 = arith.divf %249, %250 : vector<16x32xf32>
    %252 = vector.extract_strided_slice %234 {offsets = [0, 64], sizes = [16, 32], strides = [1, 1]} : vector<16x96xf32> to vector<16x32xf32>
    %253 = vector.extract_strided_slice %235 {offsets = [0, 64], sizes = [16, 32], strides = [1, 1]} : vector<16x96xf32> to vector<16x32xf32>
    %254 = vector.broadcast %27 : vector<1x32xf32> to vector<16x32xf32>
    %255 = arith.addf %253, %254 : vector<16x32xf32>
    %256 = arith.mulf %243, %255 : vector<16x32xf32>
    %257 = arith.addf %252, %256 : vector<16x32xf32>
    %258 = math.tanh %257 : vector<16x32xf32>
    %cst_97 = arith.constant 1.000000e+00 : f32
    %259 = vector.broadcast %cst_97 : f32 to vector<16x32xf32>
    %260 = arith.subf %259, %251 : vector<16x32xf32>
    %261 = arith.mulf %260, %258 : vector<16x32xf32>
    %262 = arith.mulf %251, %229 : vector<16x32xf32>
    %263 = arith.addf %261, %262 : vector<16x32xf32>
    %c6_98 = arith.constant 6 : index
    %c0_99 = arith.constant 0 : index
    %c0_100 = arith.constant 0 : index
    %264 = vector.load %arg7[%c6_98, %c0_99, %c0_100] : memref<8x16x32xf32, #tpu.memory_space<vmem>>, vector<1x16x32xf32>
    %265 = vector.shape_cast %264 : vector<1x16x32xf32> to vector<16x32xf32>
    %266 = vector.shape_cast %263 : vector<16x32xf32> to vector<1x16x32xf32>
    tpu.vector_store %arg7[%c6_98, %c0_99, %c0_100], %266 {strides = array<i32>} : memref<8x16x32xf32, #tpu.memory_space<vmem>>, vector<1x16x32xf32>,
    %c0_101 = arith.constant 0 : index
    %c7 = arith.constant 7 : index
    %c0_102 = arith.constant 0 : index
    %c0_103 = arith.constant 0 : index
    %267 = vector.load %arg6[%c0_101, %c7, %c0_102, %c0_103] : memref<2x8x16x96xf32, #tpu.memory_space<vmem>>, vector<1x1x16x96xf32>
    %268 = vector.shape_cast %267 : vector<1x1x16x96xf32> to vector<16x96xf32>
    %cst_104 = arith.constant dense<0.000000e+00> : vector<16x96xf32>
    %269 = tpu.matmul %263, %25, %cst_104 {dimension_numbers = #tpu.dot_dimension_numbers<[1], [0], [0], [1], [0, 0, 1, 1], [], []>} : vector<16x32xf32>, vector<32x96xf32>, vector<16x96xf32> -> vector<16x96xf32>
    %270 = vector.extract_strided_slice %268 {offsets = [0, 0], sizes = [16, 32], strides = [1, 1]} : vector<16x96xf32> to vector<16x32xf32>
    %271 = vector.extract_strided_slice %269 {offsets = [0, 0], sizes = [16, 32], strides = [1, 1]} : vector<16x96xf32> to vector<16x32xf32>
    %272 = arith.addf %270, %271 : vector<16x32xf32>
    %273 = arith.negf %272 : vector<16x32xf32>
    %274 = math.exp %273 : vector<16x32xf32>
    %cst_105 = arith.constant 1.000000e+00 : f32
    %275 = vector.broadcast %cst_105 : f32 to vector<16x32xf32>
    %276 = arith.addf %275, %274 : vector<16x32xf32>
    %277 = arith.divf %275, %276 : vector<16x32xf32>
    %278 = vector.extract_strided_slice %268 {offsets = [0, 32], sizes = [16, 32], strides = [1, 1]} : vector<16x96xf32> to vector<16x32xf32>
    %279 = vector.extract_strided_slice %269 {offsets = [0, 32], sizes = [16, 32], strides = [1, 1]} : vector<16x96xf32> to vector<16x32xf32>
    %280 = arith.addf %278, %279 : vector<16x32xf32>
    %281 = arith.negf %280 : vector<16x32xf32>
    %282 = math.exp %281 : vector<16x32xf32>
    %cst_106 = arith.constant 1.000000e+00 : f32
    %283 = vector.broadcast %cst_106 : f32 to vector<16x32xf32>
    %284 = arith.addf %283, %282 : vector<16x32xf32>
    %285 = arith.divf %283, %284 : vector<16x32xf32>
    %286 = vector.extract_strided_slice %268 {offsets = [0, 64], sizes = [16, 32], strides = [1, 1]} : vector<16x96xf32> to vector<16x32xf32>
    %287 = vector.extract_strided_slice %269 {offsets = [0, 64], sizes = [16, 32], strides = [1, 1]} : vector<16x96xf32> to vector<16x32xf32>
    %288 = vector.broadcast %27 : vector<1x32xf32> to vector<16x32xf32>
    %289 = arith.addf %287, %288 : vector<16x32xf32>
    %290 = arith.mulf %277, %289 : vector<16x32xf32>
    %291 = arith.addf %286, %290 : vector<16x32xf32>
    %292 = math.tanh %291 : vector<16x32xf32>
    %cst_107 = arith.constant 1.000000e+00 : f32
    %293 = vector.broadcast %cst_107 : f32 to vector<16x32xf32>
    %294 = arith.subf %293, %285 : vector<16x32xf32>
    %295 = arith.mulf %294, %292 : vector<16x32xf32>
    %296 = arith.mulf %285, %263 : vector<16x32xf32>
    %297 = arith.addf %295, %296 : vector<16x32xf32>
    %c7_108 = arith.constant 7 : index
    %c0_109 = arith.constant 0 : index
    %c0_110 = arith.constant 0 : index
    %298 = vector.load %arg7[%c7_108, %c0_109, %c0_110] : memref<8x16x32xf32, #tpu.memory_space<vmem>>, vector<1x16x32xf32>
    %299 = vector.shape_cast %298 : vector<1x16x32xf32> to vector<16x32xf32>
    %300 = vector.shape_cast %297 : vector<16x32xf32> to vector<1x16x32xf32>
    tpu.vector_store %arg7[%c7_108, %c0_109, %c0_110], %300 {strides = array<i32>} : memref<8x16x32xf32, #tpu.memory_space<vmem>>, vector<1x16x32xf32>,
    %c1_111 = arith.constant 1 : index
    %c0_112 = arith.constant 0 : index
    %c0_113 = arith.constant 0 : index
    %301 = vector.load %arg2[%c1_111, %c0_112, %c0_113] : memref<2x32x96xf32, #tpu.memory_space<vmem>>, vector<1x32x96xf32>
    %302 = vector.shape_cast %301 : vector<1x32x96xf32> to vector<32x96xf32>
    %c1_114 = arith.constant 1 : index
    %c0_115 = arith.constant 0 : index
    %c0_116 = arith.constant 0 : index
    %303 = vector.load %arg4[%c1_114, %c0_115, %c0_116] : memref<2x1x32xf32, #tpu.memory_space<vmem>>, vector<1x1x32xf32>
    %304 = vector.shape_cast %303 : vector<1x1x32xf32> to vector<1x32xf32>
    %cst_117 = arith.constant 0.000000e+00 : f32
    %305 = vector.broadcast %cst_117 : f32 to vector<16x32xf32>
    %c1_118 = arith.constant 1 : index
    %c7_119 = arith.constant 7 : index
    %c0_120 = arith.constant 0 : index
    %c0_121 = arith.constant 0 : index
    %306 = vector.load %arg6[%c1_118, %c7_119, %c0_120, %c0_121] : memref<2x8x16x96xf32, #tpu.memory_space<vmem>>, vector<1x1x16x96xf32>
    %307 = vector.shape_cast %306 : vector<1x1x16x96xf32> to vector<16x96xf32>
    %cst_122 = arith.constant dense<0.000000e+00> : vector<16x96xf32>
    %308 = tpu.matmul %305, %302, %cst_122 {dimension_numbers = #tpu.dot_dimension_numbers<[1], [0], [0], [1], [0, 0, 1, 1], [], []>} : vector<16x32xf32>, vector<32x96xf32>, vector<16x96xf32> -> vector<16x96xf32>
    %309 = vector.extract_strided_slice %307 {offsets = [0, 0], sizes = [16, 32], strides = [1, 1]} : vector<16x96xf32> to vector<16x32xf32>
    %310 = vector.extract_strided_slice %308 {offsets = [0, 0], sizes = [16, 32], strides = [1, 1]} : vector<16x96xf32> to vector<16x32xf32>
    %311 = arith.addf %309, %310 : vector<16x32xf32>
    %312 = arith.negf %311 : vector<16x32xf32>
    %313 = math.exp %312 : vector<16x32xf32>
    %cst_123 = arith.constant 1.000000e+00 : f32
    %314 = vector.broadcast %cst_123 : f32 to vector<16x32xf32>
    %315 = arith.addf %314, %313 : vector<16x32xf32>
    %316 = arith.divf %314, %315 : vector<16x32xf32>
    %317 = vector.extract_strided_slice %307 {offsets = [0, 32], sizes = [16, 32], strides = [1, 1]} : vector<16x96xf32> to vector<16x32xf32>
    %318 = vector.extract_strided_slice %308 {offsets = [0, 32], sizes = [16, 32], strides = [1, 1]} : vector<16x96xf32> to vector<16x32xf32>
    %319 = arith.addf %317, %318 : vector<16x32xf32>
    %320 = arith.negf %319 : vector<16x32xf32>
    %321 = math.exp %320 : vector<16x32xf32>
    %cst_124 = arith.constant 1.000000e+00 : f32
    %322 = vector.broadcast %cst_124 : f32 to vector<16x32xf32>
    %323 = arith.addf %322, %321 : vector<16x32xf32>
    %324 = arith.divf %322, %323 : vector<16x32xf32>
    %325 = vector.extract_strided_slice %307 {offsets = [0, 64], sizes = [16, 32], strides = [1, 1]} : vector<16x96xf32> to vector<16x32xf32>
    %326 = vector.extract_strided_slice %308 {offsets = [0, 64], sizes = [16, 32], strides = [1, 1]} : vector<16x96xf32> to vector<16x32xf32>
    %327 = vector.broadcast %304 : vector<1x32xf32> to vector<16x32xf32>
    %328 = arith.addf %326, %327 : vector<16x32xf32>
    %329 = arith.mulf %316, %328 : vector<16x32xf32>
    %330 = arith.addf %325, %329 : vector<16x32xf32>
    %331 = math.tanh %330 : vector<16x32xf32>
    %cst_125 = arith.constant 1.000000e+00 : f32
    %332 = vector.broadcast %cst_125 : f32 to vector<16x32xf32>
    %333 = arith.subf %332, %324 : vector<16x32xf32>
    %334 = arith.mulf %333, %331 : vector<16x32xf32>
    %335 = arith.mulf %324, %305 : vector<16x32xf32>
    %336 = arith.addf %334, %335 : vector<16x32xf32>
    %c7_126 = arith.constant 7 : index
    %c0_127 = arith.constant 0 : index
    %c0_128 = arith.constant 0 : index
    %337 = vector.load %arg7[%c7_126, %c0_127, %c0_128] : memref<8x16x32xf32, #tpu.memory_space<vmem>>, vector<1x16x32xf32>
    %338 = vector.shape_cast %337 : vector<1x16x32xf32> to vector<16x32xf32>
    %339 = tpu.concatenate %338, %336 in 1 : vector<16x32xf32>, vector<16x32xf32> -> vector<16x64xf32>
    %c7_129 = arith.constant 7 : index
    %c0_130 = arith.constant 0 : index
    %c0_131 = arith.constant 0 : index
    %340 = vector.load %arg5[%c7_129, %c0_130, %c0_131] : memref<8x16x64xf32, #tpu.memory_space<vmem>>, vector<1x16x64xf32>
    %341 = vector.shape_cast %340 : vector<1x16x64xf32> to vector<16x64xf32>
    %342 = vector.shape_cast %339 : vector<16x64xf32> to vector<1x16x64xf32>
    tpu.vector_store %arg5[%c7_129, %c0_130, %c0_131], %342 {strides = array<i32>} : memref<8x16x64xf32, #tpu.memory_space<vmem>>, vector<1x16x64xf32>,
    %c1_132 = arith.constant 1 : index
    %c6_133 = arith.constant 6 : index
    %c0_134 = arith.constant 0 : index
    %c0_135 = arith.constant 0 : index
    %343 = vector.load %arg6[%c1_132, %c6_133, %c0_134, %c0_135] : memref<2x8x16x96xf32, #tpu.memory_space<vmem>>, vector<1x1x16x96xf32>
    %344 = vector.shape_cast %343 : vector<1x1x16x96xf32> to vector<16x96xf32>
    %cst_136 = arith.constant dense<0.000000e+00> : vector<16x96xf32>
    %345 = tpu.matmul %336, %302, %cst_136 {dimension_numbers = #tpu.dot_dimension_numbers<[1], [0], [0], [1], [0, 0, 1, 1], [], []>} : vector<16x32xf32>, vector<32x96xf32>, vector<16x96xf32> -> vector<16x96xf32>
    %346 = vector.extract_strided_slice %344 {offsets = [0, 0], sizes = [16, 32], strides = [1, 1]} : vector<16x96xf32> to vector<16x32xf32>
    %347 = vector.extract_strided_slice %345 {offsets = [0, 0], sizes = [16, 32], strides = [1, 1]} : vector<16x96xf32> to vector<16x32xf32>
    %348 = arith.addf %346, %347 : vector<16x32xf32>
    %349 = arith.negf %348 : vector<16x32xf32>
    %350 = math.exp %349 : vector<16x32xf32>
    %cst_137 = arith.constant 1.000000e+00 : f32
    %351 = vector.broadcast %cst_137 : f32 to vector<16x32xf32>
    %352 = arith.addf %351, %350 : vector<16x32xf32>
    %353 = arith.divf %351, %352 : vector<16x32xf32>
    %354 = vector.extract_strided_slice %344 {offsets = [0, 32], sizes = [16, 32], strides = [1, 1]} : vector<16x96xf32> to vector<16x32xf32>
    %355 = vector.extract_strided_slice %345 {offsets = [0, 32], sizes = [16, 32], strides = [1, 1]} : vector<16x96xf32> to vector<16x32xf32>
    %356 = arith.addf %354, %355 : vector<16x32xf32>
    %357 = arith.negf %356 : vector<16x32xf32>
    %358 = math.exp %357 : vector<16x32xf32>
    %cst_138 = arith.constant 1.000000e+00 : f32
    %359 = vector.broadcast %cst_138 : f32 to vector<16x32xf32>
    %360 = arith.addf %359, %358 : vector<16x32xf32>
    %361 = arith.divf %359, %360 : vector<16x32xf32>
    %362 = vector.extract_strided_slice %344 {offsets = [0, 64], sizes = [16, 32], strides = [1, 1]} : vector<16x96xf32> to vector<16x32xf32>
    %363 = vector.extract_strided_slice %345 {offsets = [0, 64], sizes = [16, 32], strides = [1, 1]} : vector<16x96xf32> to vector<16x32xf32>
    %364 = vector.broadcast %304 : vector<1x32xf32> to vector<16x32xf32>
    %365 = arith.addf %363, %364 : vector<16x32xf32>
    %366 = arith.mulf %353, %365 : vector<16x32xf32>
    %367 = arith.addf %362, %366 : vector<16x32xf32>
    %368 = math.tanh %367 : vector<16x32xf32>
    %cst_139 = arith.constant 1.000000e+00 : f32
    %369 = vector.broadcast %cst_139 : f32 to vector<16x32xf32>
    %370 = arith.subf %369, %361 : vector<16x32xf32>
    %371 = arith.mulf %370, %368 : vector<16x32xf32>
    %372 = arith.mulf %361, %336 : vector<16x32xf32>
    %373 = arith.addf %371, %372 : vector<16x32xf32>
    %c6_140 = arith.constant 6 : index
    %c0_141 = arith.constant 0 : index
    %c0_142 = arith.constant 0 : index
    %374 = vector.load %arg7[%c6_140, %c0_141, %c0_142] : memref<8x16x32xf32, #tpu.memory_space<vmem>>, vector<1x16x32xf32>
    %375 = vector.shape_cast %374 : vector<1x16x32xf32> to vector<16x32xf32>
    %376 = tpu.concatenate %375, %373 in 1 : vector<16x32xf32>, vector<16x32xf32> -> vector<16x64xf32>
    %c6_143 = arith.constant 6 : index
    %c0_144 = arith.constant 0 : index
    %c0_145 = arith.constant 0 : index
    %377 = vector.load %arg5[%c6_143, %c0_144, %c0_145] : memref<8x16x64xf32, #tpu.memory_space<vmem>>, vector<1x16x64xf32>
    %378 = vector.shape_cast %377 : vector<1x16x64xf32> to vector<16x64xf32>
    %379 = vector.shape_cast %376 : vector<16x64xf32> to vector<1x16x64xf32>
    tpu.vector_store %arg5[%c6_143, %c0_144, %c0_145], %379 {strides = array<i32>} : memref<8x16x64xf32, #tpu.memory_space<vmem>>, vector<1x16x64xf32>,
    %c1_146 = arith.constant 1 : index
    %c5_147 = arith.constant 5 : index
    %c0_148 = arith.constant 0 : index
    %c0_149 = arith.constant 0 : index
    %380 = vector.load %arg6[%c1_146, %c5_147, %c0_148, %c0_149] : memref<2x8x16x96xf32, #tpu.memory_space<vmem>>, vector<1x1x16x96xf32>
    %381 = vector.shape_cast %380 : vector<1x1x16x96xf32> to vector<16x96xf32>
    %cst_150 = arith.constant dense<0.000000e+00> : vector<16x96xf32>
    %382 = tpu.matmul %373, %302, %cst_150 {dimension_numbers = #tpu.dot_dimension_numbers<[1], [0], [0], [1], [0, 0, 1, 1], [], []>} : vector<16x32xf32>, vector<32x96xf32>, vector<16x96xf32> -> vector<16x96xf32>
    %383 = vector.extract_strided_slice %381 {offsets = [0, 0], sizes = [16, 32], strides = [1, 1]} : vector<16x96xf32> to vector<16x32xf32>
    %384 = vector.extract_strided_slice %382 {offsets = [0, 0], sizes = [16, 32], strides = [1, 1]} : vector<16x96xf32> to vector<16x32xf32>
    %385 = arith.addf %383, %384 : vector<16x32xf32>
    %386 = arith.negf %385 : vector<16x32xf32>
    %387 = math.exp %386 : vector<16x32xf32>
    %cst_151 = arith.constant 1.000000e+00 : f32
    %388 = vector.broadcast %cst_151 : f32 to vector<16x32xf32>
    %389 = arith.addf %388, %387 : vector<16x32xf32>
    %390 = arith.divf %388, %389 : vector<16x32xf32>
    %391 = vector.extract_strided_slice %381 {offsets = [0, 32], sizes = [16, 32], strides = [1, 1]} : vector<16x96xf32> to vector<16x32xf32>
    %392 = vector.extract_strided_slice %382 {offsets = [0, 32], sizes = [16, 32], strides = [1, 1]} : vector<16x96xf32> to vector<16x32xf32>
    %393 = arith.addf %391, %392 : vector<16x32xf32>
    %394 = arith.negf %393 : vector<16x32xf32>
    %395 = math.exp %394 : vector<16x32xf32>
    %cst_152 = arith.constant 1.000000e+00 : f32
    %396 = vector.broadcast %cst_152 : f32 to vector<16x32xf32>
    %397 = arith.addf %396, %395 : vector<16x32xf32>
    %398 = arith.divf %396, %397 : vector<16x32xf32>
    %399 = vector.extract_strided_slice %381 {offsets = [0, 64], sizes = [16, 32], strides = [1, 1]} : vector<16x96xf32> to vector<16x32xf32>
    %400 = vector.extract_strided_slice %382 {offsets = [0, 64], sizes = [16, 32], strides = [1, 1]} : vector<16x96xf32> to vector<16x32xf32>
    %401 = vector.broadcast %304 : vector<1x32xf32> to vector<16x32xf32>
    %402 = arith.addf %400, %401 : vector<16x32xf32>
    %403 = arith.mulf %390, %402 : vector<16x32xf32>
    %404 = arith.addf %399, %403 : vector<16x32xf32>
    %405 = math.tanh %404 : vector<16x32xf32>
    %cst_153 = arith.constant 1.000000e+00 : f32
    %406 = vector.broadcast %cst_153 : f32 to vector<16x32xf32>
    %407 = arith.subf %406, %398 : vector<16x32xf32>
    %408 = arith.mulf %407, %405 : vector<16x32xf32>
    %409 = arith.mulf %398, %373 : vector<16x32xf32>
    %410 = arith.addf %408, %409 : vector<16x32xf32>
    %c5_154 = arith.constant 5 : index
    %c0_155 = arith.constant 0 : index
    %c0_156 = arith.constant 0 : index
    %411 = vector.load %arg7[%c5_154, %c0_155, %c0_156] : memref<8x16x32xf32, #tpu.memory_space<vmem>>, vector<1x16x32xf32>
    %412 = vector.shape_cast %411 : vector<1x16x32xf32> to vector<16x32xf32>
    %413 = tpu.concatenate %412, %410 in 1 : vector<16x32xf32>, vector<16x32xf32> -> vector<16x64xf32>
    %c5_157 = arith.constant 5 : index
    %c0_158 = arith.constant 0 : index
    %c0_159 = arith.constant 0 : index
    %414 = vector.load %arg5[%c5_157, %c0_158, %c0_159] : memref<8x16x64xf32, #tpu.memory_space<vmem>>, vector<1x16x64xf32>
    %415 = vector.shape_cast %414 : vector<1x16x64xf32> to vector<16x64xf32>
    %416 = vector.shape_cast %413 : vector<16x64xf32> to vector<1x16x64xf32>
    tpu.vector_store %arg5[%c5_157, %c0_158, %c0_159], %416 {strides = array<i32>} : memref<8x16x64xf32, #tpu.memory_space<vmem>>, vector<1x16x64xf32>,
    %c1_160 = arith.constant 1 : index
    %c4_161 = arith.constant 4 : index
    %c0_162 = arith.constant 0 : index
    %c0_163 = arith.constant 0 : index
    %417 = vector.load %arg6[%c1_160, %c4_161, %c0_162, %c0_163] : memref<2x8x16x96xf32, #tpu.memory_space<vmem>>, vector<1x1x16x96xf32>
    %418 = vector.shape_cast %417 : vector<1x1x16x96xf32> to vector<16x96xf32>
    %cst_164 = arith.constant dense<0.000000e+00> : vector<16x96xf32>
    %419 = tpu.matmul %410, %302, %cst_164 {dimension_numbers = #tpu.dot_dimension_numbers<[1], [0], [0], [1], [0, 0, 1, 1], [], []>} : vector<16x32xf32>, vector<32x96xf32>, vector<16x96xf32> -> vector<16x96xf32>
    %420 = vector.extract_strided_slice %418 {offsets = [0, 0], sizes = [16, 32], strides = [1, 1]} : vector<16x96xf32> to vector<16x32xf32>
    %421 = vector.extract_strided_slice %419 {offsets = [0, 0], sizes = [16, 32], strides = [1, 1]} : vector<16x96xf32> to vector<16x32xf32>
    %422 = arith.addf %420, %421 : vector<16x32xf32>
    %423 = arith.negf %422 : vector<16x32xf32>
    %424 = math.exp %423 : vector<16x32xf32>
    %cst_165 = arith.constant 1.000000e+00 : f32
    %425 = vector.broadcast %cst_165 : f32 to vector<16x32xf32>
    %426 = arith.addf %425, %424 : vector<16x32xf32>
    %427 = arith.divf %425, %426 : vector<16x32xf32>
    %428 = vector.extract_strided_slice %418 {offsets = [0, 32], sizes = [16, 32], strides = [1, 1]} : vector<16x96xf32> to vector<16x32xf32>
    %429 = vector.extract_strided_slice %419 {offsets = [0, 32], sizes = [16, 32], strides = [1, 1]} : vector<16x96xf32> to vector<16x32xf32>
    %430 = arith.addf %428, %429 : vector<16x32xf32>
    %431 = arith.negf %430 : vector<16x32xf32>
    %432 = math.exp %431 : vector<16x32xf32>
    %cst_166 = arith.constant 1.000000e+00 : f32
    %433 = vector.broadcast %cst_166 : f32 to vector<16x32xf32>
    %434 = arith.addf %433, %432 : vector<16x32xf32>
    %435 = arith.divf %433, %434 : vector<16x32xf32>
    %436 = vector.extract_strided_slice %418 {offsets = [0, 64], sizes = [16, 32], strides = [1, 1]} : vector<16x96xf32> to vector<16x32xf32>
    %437 = vector.extract_strided_slice %419 {offsets = [0, 64], sizes = [16, 32], strides = [1, 1]} : vector<16x96xf32> to vector<16x32xf32>
    %438 = vector.broadcast %304 : vector<1x32xf32> to vector<16x32xf32>
    %439 = arith.addf %437, %438 : vector<16x32xf32>
    %440 = arith.mulf %427, %439 : vector<16x32xf32>
    %441 = arith.addf %436, %440 : vector<16x32xf32>
    %442 = math.tanh %441 : vector<16x32xf32>
    %cst_167 = arith.constant 1.000000e+00 : f32
    %443 = vector.broadcast %cst_167 : f32 to vector<16x32xf32>
    %444 = arith.subf %443, %435 : vector<16x32xf32>
    %445 = arith.mulf %444, %442 : vector<16x32xf32>
    %446 = arith.mulf %435, %410 : vector<16x32xf32>
    %447 = arith.addf %445, %446 : vector<16x32xf32>
    %c4_168 = arith.constant 4 : index
    %c0_169 = arith.constant 0 : index
    %c0_170 = arith.constant 0 : index
    %448 = vector.load %arg7[%c4_168, %c0_169, %c0_170] : memref<8x16x32xf32, #tpu.memory_space<vmem>>, vector<1x16x32xf32>
    %449 = vector.shape_cast %448 : vector<1x16x32xf32> to vector<16x32xf32>
    %450 = tpu.concatenate %449, %447 in 1 : vector<16x32xf32>, vector<16x32xf32> -> vector<16x64xf32>
    %c4_171 = arith.constant 4 : index
    %c0_172 = arith.constant 0 : index
    %c0_173 = arith.constant 0 : index
    %451 = vector.load %arg5[%c4_171, %c0_172, %c0_173] : memref<8x16x64xf32, #tpu.memory_space<vmem>>, vector<1x16x64xf32>
    %452 = vector.shape_cast %451 : vector<1x16x64xf32> to vector<16x64xf32>
    %453 = vector.shape_cast %450 : vector<16x64xf32> to vector<1x16x64xf32>
    tpu.vector_store %arg5[%c4_171, %c0_172, %c0_173], %453 {strides = array<i32>} : memref<8x16x64xf32, #tpu.memory_space<vmem>>, vector<1x16x64xf32>,
    %c1_174 = arith.constant 1 : index
    %c3_175 = arith.constant 3 : index
    %c0_176 = arith.constant 0 : index
    %c0_177 = arith.constant 0 : index
    %454 = vector.load %arg6[%c1_174, %c3_175, %c0_176, %c0_177] : memref<2x8x16x96xf32, #tpu.memory_space<vmem>>, vector<1x1x16x96xf32>
    %455 = vector.shape_cast %454 : vector<1x1x16x96xf32> to vector<16x96xf32>
    %cst_178 = arith.constant dense<0.000000e+00> : vector<16x96xf32>
    %456 = tpu.matmul %447, %302, %cst_178 {dimension_numbers = #tpu.dot_dimension_numbers<[1], [0], [0], [1], [0, 0, 1, 1], [], []>} : vector<16x32xf32>, vector<32x96xf32>, vector<16x96xf32> -> vector<16x96xf32>
    %457 = vector.extract_strided_slice %455 {offsets = [0, 0], sizes = [16, 32], strides = [1, 1]} : vector<16x96xf32> to vector<16x32xf32>
    %458 = vector.extract_strided_slice %456 {offsets = [0, 0], sizes = [16, 32], strides = [1, 1]} : vector<16x96xf32> to vector<16x32xf32>
    %459 = arith.addf %457, %458 : vector<16x32xf32>
    %460 = arith.negf %459 : vector<16x32xf32>
    %461 = math.exp %460 : vector<16x32xf32>
    %cst_179 = arith.constant 1.000000e+00 : f32
    %462 = vector.broadcast %cst_179 : f32 to vector<16x32xf32>
    %463 = arith.addf %462, %461 : vector<16x32xf32>
    %464 = arith.divf %462, %463 : vector<16x32xf32>
    %465 = vector.extract_strided_slice %455 {offsets = [0, 32], sizes = [16, 32], strides = [1, 1]} : vector<16x96xf32> to vector<16x32xf32>
    %466 = vector.extract_strided_slice %456 {offsets = [0, 32], sizes = [16, 32], strides = [1, 1]} : vector<16x96xf32> to vector<16x32xf32>
    %467 = arith.addf %465, %466 : vector<16x32xf32>
    %468 = arith.negf %467 : vector<16x32xf32>
    %469 = math.exp %468 : vector<16x32xf32>
    %cst_180 = arith.constant 1.000000e+00 : f32
    %470 = vector.broadcast %cst_180 : f32 to vector<16x32xf32>
    %471 = arith.addf %470, %469 : vector<16x32xf32>
    %472 = arith.divf %470, %471 : vector<16x32xf32>
    %473 = vector.extract_strided_slice %455 {offsets = [0, 64], sizes = [16, 32], strides = [1, 1]} : vector<16x96xf32> to vector<16x32xf32>
    %474 = vector.extract_strided_slice %456 {offsets = [0, 64], sizes = [16, 32], strides = [1, 1]} : vector<16x96xf32> to vector<16x32xf32>
    %475 = vector.broadcast %304 : vector<1x32xf32> to vector<16x32xf32>
    %476 = arith.addf %474, %475 : vector<16x32xf32>
    %477 = arith.mulf %464, %476 : vector<16x32xf32>
    %478 = arith.addf %473, %477 : vector<16x32xf32>
    %479 = math.tanh %478 : vector<16x32xf32>
    %cst_181 = arith.constant 1.000000e+00 : f32
    %480 = vector.broadcast %cst_181 : f32 to vector<16x32xf32>
    %481 = arith.subf %480, %472 : vector<16x32xf32>
    %482 = arith.mulf %481, %479 : vector<16x32xf32>
    %483 = arith.mulf %472, %447 : vector<16x32xf32>
    %484 = arith.addf %482, %483 : vector<16x32xf32>
    %c3_182 = arith.constant 3 : index
    %c0_183 = arith.constant 0 : index
    %c0_184 = arith.constant 0 : index
    %485 = vector.load %arg7[%c3_182, %c0_183, %c0_184] : memref<8x16x32xf32, #tpu.memory_space<vmem>>, vector<1x16x32xf32>
    %486 = vector.shape_cast %485 : vector<1x16x32xf32> to vector<16x32xf32>
    %487 = tpu.concatenate %486, %484 in 1 : vector<16x32xf32>, vector<16x32xf32> -> vector<16x64xf32>
    %c3_185 = arith.constant 3 : index
    %c0_186 = arith.constant 0 : index
    %c0_187 = arith.constant 0 : index
    %488 = vector.load %arg5[%c3_185, %c0_186, %c0_187] : memref<8x16x64xf32, #tpu.memory_space<vmem>>, vector<1x16x64xf32>
    %489 = vector.shape_cast %488 : vector<1x16x64xf32> to vector<16x64xf32>
    %490 = vector.shape_cast %487 : vector<16x64xf32> to vector<1x16x64xf32>
    tpu.vector_store %arg5[%c3_185, %c0_186, %c0_187], %490 {strides = array<i32>} : memref<8x16x64xf32, #tpu.memory_space<vmem>>, vector<1x16x64xf32>,
    %c1_188 = arith.constant 1 : index
    %c2_189 = arith.constant 2 : index
    %c0_190 = arith.constant 0 : index
    %c0_191 = arith.constant 0 : index
    %491 = vector.load %arg6[%c1_188, %c2_189, %c0_190, %c0_191] : memref<2x8x16x96xf32, #tpu.memory_space<vmem>>, vector<1x1x16x96xf32>
    %492 = vector.shape_cast %491 : vector<1x1x16x96xf32> to vector<16x96xf32>
    %cst_192 = arith.constant dense<0.000000e+00> : vector<16x96xf32>
    %493 = tpu.matmul %484, %302, %cst_192 {dimension_numbers = #tpu.dot_dimension_numbers<[1], [0], [0], [1], [0, 0, 1, 1], [], []>} : vector<16x32xf32>, vector<32x96xf32>, vector<16x96xf32> -> vector<16x96xf32>
    %494 = vector.extract_strided_slice %492 {offsets = [0, 0], sizes = [16, 32], strides = [1, 1]} : vector<16x96xf32> to vector<16x32xf32>
    %495 = vector.extract_strided_slice %493 {offsets = [0, 0], sizes = [16, 32], strides = [1, 1]} : vector<16x96xf32> to vector<16x32xf32>
    %496 = arith.addf %494, %495 : vector<16x32xf32>
    %497 = arith.negf %496 : vector<16x32xf32>
    %498 = math.exp %497 : vector<16x32xf32>
    %cst_193 = arith.constant 1.000000e+00 : f32
    %499 = vector.broadcast %cst_193 : f32 to vector<16x32xf32>
    %500 = arith.addf %499, %498 : vector<16x32xf32>
    %501 = arith.divf %499, %500 : vector<16x32xf32>
    %502 = vector.extract_strided_slice %492 {offsets = [0, 32], sizes = [16, 32], strides = [1, 1]} : vector<16x96xf32> to vector<16x32xf32>
    %503 = vector.extract_strided_slice %493 {offsets = [0, 32], sizes = [16, 32], strides = [1, 1]} : vector<16x96xf32> to vector<16x32xf32>
    %504 = arith.addf %502, %503 : vector<16x32xf32>
    %505 = arith.negf %504 : vector<16x32xf32>
    %506 = math.exp %505 : vector<16x32xf32>
    %cst_194 = arith.constant 1.000000e+00 : f32
    %507 = vector.broadcast %cst_194 : f32 to vector<16x32xf32>
    %508 = arith.addf %507, %506 : vector<16x32xf32>
    %509 = arith.divf %507, %508 : vector<16x32xf32>
    %510 = vector.extract_strided_slice %492 {offsets = [0, 64], sizes = [16, 32], strides = [1, 1]} : vector<16x96xf32> to vector<16x32xf32>
    %511 = vector.extract_strided_slice %493 {offsets = [0, 64], sizes = [16, 32], strides = [1, 1]} : vector<16x96xf32> to vector<16x32xf32>
    %512 = vector.broadcast %304 : vector<1x32xf32> to vector<16x32xf32>
    %513 = arith.addf %511, %512 : vector<16x32xf32>
    %514 = arith.mulf %501, %513 : vector<16x32xf32>
    %515 = arith.addf %510, %514 : vector<16x32xf32>
    %516 = math.tanh %515 : vector<16x32xf32>
    %cst_195 = arith.constant 1.000000e+00 : f32
    %517 = vector.broadcast %cst_195 : f32 to vector<16x32xf32>
    %518 = arith.subf %517, %509 : vector<16x32xf32>
    %519 = arith.mulf %518, %516 : vector<16x32xf32>
    %520 = arith.mulf %509, %484 : vector<16x32xf32>
    %521 = arith.addf %519, %520 : vector<16x32xf32>
    %c2_196 = arith.constant 2 : index
    %c0_197 = arith.constant 0 : index
    %c0_198 = arith.constant 0 : index
    %522 = vector.load %arg7[%c2_196, %c0_197, %c0_198] : memref<8x16x32xf32, #tpu.memory_space<vmem>>, vector<1x16x32xf32>
    %523 = vector.shape_cast %522 : vector<1x16x32xf32> to vector<16x32xf32>
    %524 = tpu.concatenate %523, %521 in 1 : vector<16x32xf32>, vector<16x32xf32> -> vector<16x64xf32>
    %c2_199 = arith.constant 2 : index
    %c0_200 = arith.constant 0 : index
    %c0_201 = arith.constant 0 : index
    %525 = vector.load %arg5[%c2_199, %c0_200, %c0_201] : memref<8x16x64xf32, #tpu.memory_space<vmem>>, vector<1x16x64xf32>
    %526 = vector.shape_cast %525 : vector<1x16x64xf32> to vector<16x64xf32>
    %527 = vector.shape_cast %524 : vector<16x64xf32> to vector<1x16x64xf32>
    tpu.vector_store %arg5[%c2_199, %c0_200, %c0_201], %527 {strides = array<i32>} : memref<8x16x64xf32, #tpu.memory_space<vmem>>, vector<1x16x64xf32>,
    %c1_202 = arith.constant 1 : index
    %c1_203 = arith.constant 1 : index
    %c0_204 = arith.constant 0 : index
    %c0_205 = arith.constant 0 : index
    %528 = vector.load %arg6[%c1_202, %c1_203, %c0_204, %c0_205] : memref<2x8x16x96xf32, #tpu.memory_space<vmem>>, vector<1x1x16x96xf32>
    %529 = vector.shape_cast %528 : vector<1x1x16x96xf32> to vector<16x96xf32>
    %cst_206 = arith.constant dense<0.000000e+00> : vector<16x96xf32>
    %530 = tpu.matmul %521, %302, %cst_206 {dimension_numbers = #tpu.dot_dimension_numbers<[1], [0], [0], [1], [0, 0, 1, 1], [], []>} : vector<16x32xf32>, vector<32x96xf32>, vector<16x96xf32> -> vector<16x96xf32>
    %531 = vector.extract_strided_slice %529 {offsets = [0, 0], sizes = [16, 32], strides = [1, 1]} : vector<16x96xf32> to vector<16x32xf32>
    %532 = vector.extract_strided_slice %530 {offsets = [0, 0], sizes = [16, 32], strides = [1, 1]} : vector<16x96xf32> to vector<16x32xf32>
    %533 = arith.addf %531, %532 : vector<16x32xf32>
    %534 = arith.negf %533 : vector<16x32xf32>
    %535 = math.exp %534 : vector<16x32xf32>
    %cst_207 = arith.constant 1.000000e+00 : f32
    %536 = vector.broadcast %cst_207 : f32 to vector<16x32xf32>
    %537 = arith.addf %536, %535 : vector<16x32xf32>
    %538 = arith.divf %536, %537 : vector<16x32xf32>
    %539 = vector.extract_strided_slice %529 {offsets = [0, 32], sizes = [16, 32], strides = [1, 1]} : vector<16x96xf32> to vector<16x32xf32>
    %540 = vector.extract_strided_slice %530 {offsets = [0, 32], sizes = [16, 32], strides = [1, 1]} : vector<16x96xf32> to vector<16x32xf32>
    %541 = arith.addf %539, %540 : vector<16x32xf32>
    %542 = arith.negf %541 : vector<16x32xf32>
    %543 = math.exp %542 : vector<16x32xf32>
    %cst_208 = arith.constant 1.000000e+00 : f32
    %544 = vector.broadcast %cst_208 : f32 to vector<16x32xf32>
    %545 = arith.addf %544, %543 : vector<16x32xf32>
    %546 = arith.divf %544, %545 : vector<16x32xf32>
    %547 = vector.extract_strided_slice %529 {offsets = [0, 64], sizes = [16, 32], strides = [1, 1]} : vector<16x96xf32> to vector<16x32xf32>
    %548 = vector.extract_strided_slice %530 {offsets = [0, 64], sizes = [16, 32], strides = [1, 1]} : vector<16x96xf32> to vector<16x32xf32>
    %549 = vector.broadcast %304 : vector<1x32xf32> to vector<16x32xf32>
    %550 = arith.addf %548, %549 : vector<16x32xf32>
    %551 = arith.mulf %538, %550 : vector<16x32xf32>
    %552 = arith.addf %547, %551 : vector<16x32xf32>
    %553 = math.tanh %552 : vector<16x32xf32>
    %cst_209 = arith.constant 1.000000e+00 : f32
    %554 = vector.broadcast %cst_209 : f32 to vector<16x32xf32>
    %555 = arith.subf %554, %546 : vector<16x32xf32>
    %556 = arith.mulf %555, %553 : vector<16x32xf32>
    %557 = arith.mulf %546, %521 : vector<16x32xf32>
    %558 = arith.addf %556, %557 : vector<16x32xf32>
    %c1_210 = arith.constant 1 : index
    %c0_211 = arith.constant 0 : index
    %c0_212 = arith.constant 0 : index
    %559 = vector.load %arg7[%c1_210, %c0_211, %c0_212] : memref<8x16x32xf32, #tpu.memory_space<vmem>>, vector<1x16x32xf32>
    %560 = vector.shape_cast %559 : vector<1x16x32xf32> to vector<16x32xf32>
    %561 = tpu.concatenate %560, %558 in 1 : vector<16x32xf32>, vector<16x32xf32> -> vector<16x64xf32>
    %c1_213 = arith.constant 1 : index
    %c0_214 = arith.constant 0 : index
    %c0_215 = arith.constant 0 : index
    %562 = vector.load %arg5[%c1_213, %c0_214, %c0_215] : memref<8x16x64xf32, #tpu.memory_space<vmem>>, vector<1x16x64xf32>
    %563 = vector.shape_cast %562 : vector<1x16x64xf32> to vector<16x64xf32>
    %564 = vector.shape_cast %561 : vector<16x64xf32> to vector<1x16x64xf32>
    tpu.vector_store %arg5[%c1_213, %c0_214, %c0_215], %564 {strides = array<i32>} : memref<8x16x64xf32, #tpu.memory_space<vmem>>, vector<1x16x64xf32>,
    %c1_216 = arith.constant 1 : index
    %c0_217 = arith.constant 0 : index
    %c0_218 = arith.constant 0 : index
    %c0_219 = arith.constant 0 : index
    %565 = vector.load %arg6[%c1_216, %c0_217, %c0_218, %c0_219] : memref<2x8x16x96xf32, #tpu.memory_space<vmem>>, vector<1x1x16x96xf32>
    %566 = vector.shape_cast %565 : vector<1x1x16x96xf32> to vector<16x96xf32>
    %cst_220 = arith.constant dense<0.000000e+00> : vector<16x96xf32>
    %567 = tpu.matmul %558, %302, %cst_220 {dimension_numbers = #tpu.dot_dimension_numbers<[1], [0], [0], [1], [0, 0, 1, 1], [], []>} : vector<16x32xf32>, vector<32x96xf32>, vector<16x96xf32> -> vector<16x96xf32>
    %568 = vector.extract_strided_slice %566 {offsets = [0, 0], sizes = [16, 32], strides = [1, 1]} : vector<16x96xf32> to vector<16x32xf32>
    %569 = vector.extract_strided_slice %567 {offsets = [0, 0], sizes = [16, 32], strides = [1, 1]} : vector<16x96xf32> to vector<16x32xf32>
    %570 = arith.addf %568, %569 : vector<16x32xf32>
    %571 = arith.negf %570 : vector<16x32xf32>
    %572 = math.exp %571 : vector<16x32xf32>
    %cst_221 = arith.constant 1.000000e+00 : f32
    %573 = vector.broadcast %cst_221 : f32 to vector<16x32xf32>
    %574 = arith.addf %573, %572 : vector<16x32xf32>
    %575 = arith.divf %573, %574 : vector<16x32xf32>
    %576 = vector.extract_strided_slice %566 {offsets = [0, 32], sizes = [16, 32], strides = [1, 1]} : vector<16x96xf32> to vector<16x32xf32>
    %577 = vector.extract_strided_slice %567 {offsets = [0, 32], sizes = [16, 32], strides = [1, 1]} : vector<16x96xf32> to vector<16x32xf32>
    %578 = arith.addf %576, %577 : vector<16x32xf32>
    %579 = arith.negf %578 : vector<16x32xf32>
    %580 = math.exp %579 : vector<16x32xf32>
    %cst_222 = arith.constant 1.000000e+00 : f32
    %581 = vector.broadcast %cst_222 : f32 to vector<16x32xf32>
    %582 = arith.addf %581, %580 : vector<16x32xf32>
    %583 = arith.divf %581, %582 : vector<16x32xf32>
    %584 = vector.extract_strided_slice %566 {offsets = [0, 64], sizes = [16, 32], strides = [1, 1]} : vector<16x96xf32> to vector<16x32xf32>
    %585 = vector.extract_strided_slice %567 {offsets = [0, 64], sizes = [16, 32], strides = [1, 1]} : vector<16x96xf32> to vector<16x32xf32>
    %586 = vector.broadcast %304 : vector<1x32xf32> to vector<16x32xf32>
    %587 = arith.addf %585, %586 : vector<16x32xf32>
    %588 = arith.mulf %575, %587 : vector<16x32xf32>
    %589 = arith.addf %584, %588 : vector<16x32xf32>
    %590 = math.tanh %589 : vector<16x32xf32>
    %cst_223 = arith.constant 1.000000e+00 : f32
    %591 = vector.broadcast %cst_223 : f32 to vector<16x32xf32>
    %592 = arith.subf %591, %583 : vector<16x32xf32>
    %593 = arith.mulf %592, %590 : vector<16x32xf32>
    %594 = arith.mulf %583, %558 : vector<16x32xf32>
    %595 = arith.addf %593, %594 : vector<16x32xf32>
    %c0_224 = arith.constant 0 : index
    %c0_225 = arith.constant 0 : index
    %c0_226 = arith.constant 0 : index
    %596 = vector.load %arg7[%c0_224, %c0_225, %c0_226] : memref<8x16x32xf32, #tpu.memory_space<vmem>>, vector<1x16x32xf32>
    %597 = vector.shape_cast %596 : vector<1x16x32xf32> to vector<16x32xf32>
    %598 = tpu.concatenate %597, %595 in 1 : vector<16x32xf32>, vector<16x32xf32> -> vector<16x64xf32>
    %c0_227 = arith.constant 0 : index
    %c0_228 = arith.constant 0 : index
    %c0_229 = arith.constant 0 : index
    %599 = vector.load %arg5[%c0_227, %c0_228, %c0_229] : memref<8x16x64xf32, #tpu.memory_space<vmem>>, vector<1x16x64xf32>
    %600 = vector.shape_cast %599 : vector<1x16x64xf32> to vector<16x64xf32>
    %601 = vector.shape_cast %598 : vector<16x64xf32> to vector<1x16x64xf32>
    tpu.vector_store %arg5[%c0_227, %c0_228, %c0_229], %601 {strides = array<i32>} : memref<8x16x64xf32, #tpu.memory_space<vmem>>, vector<1x16x64xf32>,
    return
  }
}

</mosaic_0001>

<bundles_post_ra>
// kernel: tpu_custom_call.1
= control target key start
LH: loop header
LB: loop body
LE: loop exit
PB: predicated region body
PF: predicated region fallthrough
CT: control target
= control target key end

     0   :  { %10 = vsyncpa [#allocation5], 0  ;;  %s4375_s0 = inlined_call_operand.hbm [shape: f32[8,16,16], index: 0, kind: input, shape index: {}]   ;;  %s4376_s1 = inlined_call_operand.hbm [shape: f32[2,16,96], index: 1, kind: input, shape index: {}]   ;;  %s4377_s2 = inlined_call_operand.hbm [shape: f32[2,32,96], index: 2, kind: input, shape index: {}]   ;;  %s4378_s3 = inlined_call_operand.vmem [shape: f32[2,1,96], index: 3, kind: input, shape index: {}]   ;;  %s4379_s4 = inlined_call_operand.vmem [shape: f32[2,1,32], index: 4, kind: input, shape index: {}]   ;;  %s4380_s5 = inlined_call_operand.hbm [shape: f32[8,16,64], index: 5, kind: output, shape index: {}]  }
   0x1   :  { %11 = vsyncpa [#allocation8], 0 }
   0x2   :  { %12 = vsyncpa [#allocation6], 0  ;;  %s3765_s18 = smov [#allocation7]   ;;  %s3766_s20 = smov [#allocation4]  }
   0x3   :  { %s30_s19 = sshll.u32 %s3765_s18, 4  ;;  %s18_s21 = sshll.u32 %s3766_s20, 4  ;;  %s31_s19 = int_to_ptr.vmem [resolvable:$true] %s30_s19  ;;  %s3804_s21 = int_to_ptr.vmem [resolvable:$true] %s18_s21 }
   0x4   :  { %s3671_s24 = scalar_lea.hbm %s4376_s1, 512 }
   0x5   :  { %p3672_p0 = scmp.ne.s32.totalorder %s4376_s1, %s3671_s24  ;;  %p3675_p1 = scmp.lt.u32.totalorder %s3671_s24, %s4376_s1 }
   0x7   :  { %p3677_p2 = pnand %p3675_p1, %p3672_p0 }
   0x9   :  { %3680 = shalt.err (!%p3677_p2)
}
   0xa   :  { %s3681_s29 = scalar_lea.vmem %s31_s19, 512  ;;  %p3686_p4 = scmp.lt.s32.totalorder %s31_s19, %s31_s19 }
   0xb   :  { %p3682_p3 = scmp.ne.s32.totalorder %s31_s19, %s3681_s29  ;;  %p3687_p5 = scmp.lt.s32.totalorder %s3681_s29, %s3681_s29 }
   0xd   :  { %p3688_p6 = por %p3687_p5, %p3686_p4 }
   0xf   :  { %p3689_p7 = pnand %p3688_p6, %p3682_p3 }
  0x11   :  { %3692 = shalt.err (!%p3689_p7)
}
  0x12   :  { %s3767_s30 = smov 128   ;;  %s3768_s6 = smov 8  }
  0x13   :  { %36 = dma.hbm_to_vmem [thread:$0]  %s4376_s1, 512, %s31_s19, [#allocation8], %s3767_s30, %s3767_s30, %s3768_s6  }
  0x14   :  { %s3693_s11 = scalar_lea.hbm %s4375_s0, 2048 }
  0x15   :  { %p3694_p8 = scmp.ne.s32.totalorder %s4375_s0, %s3693_s11  ;;  %p3697_p9 = scmp.lt.u32.totalorder %s3693_s11, %s4375_s0 }
  0x17   :  { %p3699_p10 = pnand %p3697_p9, %p3694_p8 }
  0x19   :  { %3702 = shalt.err (!%p3699_p10)
}
  0x1a   :  { %s3703_s16 = scalar_lea.vmem %s3804_s21, 2048  ;;  %p3708_p12 = scmp.lt.s32.totalorder %s3804_s21, %s3804_s21 }
  0x1b   :  { %p3704_p11 = scmp.ne.s32.totalorder %s3804_s21, %s3703_s16  ;;  %p3709_p13 = scmp.lt.s32.totalorder %s3703_s16, %s3703_s16 }
  0x1d   :  { %p3710_p0 = por %p3709_p13, %p3708_p12 }
  0x1f   :  { %p3711_p1 = pnand %p3710_p0, %p3704_p11 }
  0x21   :  { %3714 = shalt.err (!%p3711_p1)
}
  0x22   :  { %24 = dma.hbm_to_vmem [thread:$0]  %s4375_s0, 2048, %s3804_s21, [#allocation5], %s3767_s30, %s3767_s30, %s3768_s6  }
  0x23   :  { %s3769_s18 = smov [#allocation9]   ;;  %s3715_s23 = scalar_lea.hbm %s4377_s2, 1024 }
  0x24   :  { %s42_s19 = sshll.u32 %s3769_s18, 4  ;;  %p3716_p2 = scmp.ne.s32.totalorder %s4377_s2, %s3715_s23  ;;  %s43_s19 = int_to_ptr.vmem [resolvable:$true] %s42_s19 }
  0x25   :  { %p3719_p3 = scmp.lt.u32.totalorder %s3715_s23, %s4377_s2 }
  0x27   :  { %p3721_p4 = pnand %p3719_p3, %p3716_p2 }
  0x29   :  { %3724 = shalt.err (!%p3721_p4)
}
  0x2a   :  { %s3725_s28 = scalar_lea.vmem %s43_s19, 1024  ;;  %p3730_p6 = scmp.lt.s32.totalorder %s43_s19, %s43_s19 }
  0x2b   :  { %p3726_p5 = scmp.ne.s32.totalorder %s43_s19, %s3725_s28  ;;  %p3731_p7 = scmp.lt.s32.totalorder %s3725_s28, %s3725_s28 }
  0x2d   :  { %p3732_p8 = por %p3731_p7, %p3730_p6 }
  0x2f   :  { %p3733_p9 = pnand %p3732_p8, %p3726_p5 }
  0x31   :  { %3736 = shalt.err (!%p3733_p9)
}
  0x32   :  { %48 = dma.hbm_to_vmem [thread:$0]  %s4377_s2, 1024, %s43_s19, [#allocation8], %s3767_s30, %s3767_s30, %s3768_s6  }
  0x33   :  { %3759 = dma.done.wait [#allocation5], 2048  }
  0x34   :  { %3760 = vsyncadd [#allocation5], 4294965248 }
  0x35   :  { %3761 = dma.done.wait [#allocation8], 1536  }
  0x36   :  { %3762 = vsyncadd [#allocation8], 4294965760  ;;  %vm87_vm0 = vcmask 130048   ;;  %v78_v0 = vld [vmem:[#allocation7] sm:$0xff]  ;;  %v79_v1 = vld [vmem:[#allocation7 + $0x8] sm:$0xff]  ;;  %s3770_s7 = smov 64  }
  0x37   :  { %v62_v2 = vld [vmem:[#allocation4] sm:$0xff]  ;;  %v3334_v3 = vpack.c.bf16 %v79_v1, %v78_v0  ;;  %v472_v5 = vld [vmem:[#allocation9 + $0x8] sm:$0xff]  ;;  %v473_v8 = vld [vmem:[#allocation9 + $0x10] sm:$0xff]  ;;  %v3771_v26 = vmov 0.0   ;;  %vm281_vm1 = vcmask 785408   ;;  %s3772_s10 = smov 96  }
  0x38   :  { %3106 = vmatprep.mubr.msk.f32.mxu0 %vm87_vm0, %v62_v2  ;;  %v471_v4 = vld [vmem:[#allocation9] sm:$0xff]  ;;  %3134 = vmatprep.mubr.msk.f32.mxu1 %vm87_vm0, %v62_v2  ;;  %v3860_v7 = vld [vmem:[#allocation4 + $0x8] sm:$0xff]  ;;  %v3863_v9 = vld [vmem:[#allocation4 + $0x10] sm:$0xff]  ;;  %vm478_vm2 = vcmask 261120   ;;  %vm1810_vm3 = vcmask 523264  }
  0x39   :  { %v3858_v6 = vpack.c.bf16 %v472_v5, %v471_v4  ;;  %3335 = vmatprep.subr.bf16.mxu0 %v3334_v3  ;;  %v474_v10 = vld [vmem:[#allocation9 + $0x18] sm:$0xff]  ;;  %v2909_v12 = vld [vmem:[%s4379_s4] ss:$0 sm:$0xff]  ;;  %v3885_v15 = vld [vmem:[#allocation4 + $0x28] sm:$0xff] }
  0x3a   :  { %3337 = vmatpush3.bf16.msra.mxu0 %v3334_v3  ;;  %v3865_v11 = vpack.c.bf16 %v474_v10, %v473_v8  ;;  %v3875_v13 = vld [vmem:[#allocation4 + $0x18] sm:$0xff]  ;;  %v3877_v14 = vld [vmem:[#allocation4 + $0x20] sm:$0xff]  ;;  %576 = vrot.lane.b32.xlu0 %v2909_v12, %s3770_s7  ;;  %v3888_v16 = vld [vmem:[#allocation4 + $0x30] sm:$0xff] }
  0x3b   :  { %3343 = vmatprep.subr.bf16.mxu0 %v3858_v6  ;;  %v3895_v17 = vld [vmem:[#allocation4 + $0x38] sm:$0xff]  ;;  %v3897_v18 = vld [vmem:[#allocation4 + $0x40] sm:$0xff]  ;;  %v3903_v19 = vld [vmem:[#allocation4 + $0x48] sm:$0xff] }
  0x3c   :  { %v3905_v20 = vld [vmem:[#allocation4 + $0x50] sm:$0xff]  ;;  %v3911_v21 = vld [vmem:[#allocation4 + $0x58] sm:$0xff]  ;;  %v3913_v22 = vld [vmem:[#allocation4 + $0x60] sm:$0xff] }
  0x3d   :  { %3107 = vmatmul.mubr.msk.f32.vlgmr.msra.gmra.mrb[0].mxu0 %vm87_vm0, %v3860_v7  ;;  %v3919_v23 = vld [vmem:[#allocation4 + $0x68] sm:$0xff]  ;;  %v3921_v24 = vld [vmem:[#allocation4 + $0x70] sm:$0xff]  ;;  %v3927_v25 = vld [vmem:[#allocation4 + $0x78] sm:$0xff] }
  0x3e   :  { %3345 = vmatpush3.bf16.msra.mxu0 %v3858_v6  ;;  %3109 = vmatprep.mubr.msk.f32.mxu0 %vm87_vm0, %v3863_v9  ;;  %v2872_v27 = vld [vmem:[%s4378_s3] ss:$0 sm:$0xff] }
  0x3f   :  { %3347 = vmatprep.subr.bf16.mxu0 %v3865_v11 }
  0x41   :  { %3110 = vmatmul.mubr.msk.f32.gmra.mrb[2].mxu0 %vm87_vm0, %v3875_v13 }
  0x42   :  { %3112 = vmatprep.mubr.msk.f32.mxu0 %vm87_vm0, %v3877_v14  ;;  %3349 = vmatpush3.bf16.msra.mxu0 %v3865_v11 }
  0x43   :  { %3359 = vmatprep.subr.bf16.mxu0 %v3858_v6 }
  0x45   :  { %3113 = vmatmul.mubr.msk.f32.gmra.mrb[4].mxu0 %vm87_vm0, %v3885_v15 }
  0x46   :  { %3115 = vmatprep.mubr.msk.f32.mxu0 %vm87_vm0, %v3888_v16 }
  0x49   :  { %3116 = vmatmul.mubr.msk.f32.gmra.mrb[6].mxu0 %vm87_vm0, %v3895_v17 }
  0x4a   :  { %3118 = vmatprep.mubr.msk.f32.mxu0 %vm87_vm0, %v3897_v18 }
  0x4d   :  { %3119 = vmatmul.mubr.msk.f32.gmra.mrb[8].mxu0 %vm87_vm0, %v3903_v19 }
  0x4e   :  { %3121 = vmatprep.mubr.msk.f32.mxu0 %vm87_vm0, %v3905_v20 }
  0x51   :  { %3122 = vmatmul.mubr.msk.f32.gmra.mrb[10].mxu0 %vm87_vm0, %v3911_v21 }
  0x52   :  { %3124 = vmatprep.mubr.msk.f32.mxu0 %vm87_vm0, %v3913_v22 }
  0x55   :  { %3125 = vmatmul.mubr.msk.f32.gmra.mrb[12].mxu0 %vm87_vm0, %v3919_v23 }
  0x56   :  { %3127 = vmatprep.mubr.msk.f32.mxu0 %vm87_vm0, %v3921_v24 }
  0x59   :  { %3128 = vmatmul.mubr.msk.f32.gmra.mrb[14].mxu0 %vm87_vm0, %v3927_v25 }
  0x5a   :  { %3166 = vmatprep.mubr.f32.mxu0 %v3771_v26 }
  0x5d   :  { %3167 = vmatmul.mubr.f32.vlgmr.msra.gmra.mrb[16].mxu0 %v3771_v26 }
  0x5e   :  { %3361 = vmatpush3.bf16.msra.mxu0 %v3858_v6 }
  0x5f   :  { %3363 = vmatprep.subr.bf16.mxu0 %v3865_v11 }
  0x62   :  { %3365 = vmatpush3.bf16.msra.mxu0 %v3865_v11 }
  0x63   :  { %3375 = vmatprep.subr.bf16.mxu0 %v3858_v6 }
  0xac   :  { %v3954_v60 = vpop.permute.xlu0 %576 }
 0x110   :  { %v3108_v28 = vpop.f32.mrb[0].mxu0 }
 0x111   :  { %v208_v29 = vadd.f32 %v3108_v28, %v2872_v27  ;;  %v202_v30 = vpop.f32.mrb[1].mxu0 }
 0x112   :  { %v203_v31 = vadd.f32 %v2872_v27, %v202_v30 }
 0x113   :  { %283 = vst.msk [vmem:[#allocation2 + $0x8] sm:$0xff] %vm281_vm1, %v208_v29 }
 0x114   :  { %282 = vst.msk [vmem:[#allocation2] sm:$0xff] %vm281_vm1, %v203_v31  ;;  %v3111_v32 = vpop.f32.mrb[2].mxu0 }
 0x115   :  { %v218_v33 = vadd.f32 %v3111_v32, %v2872_v27  ;;  %v212_v34 = vpop.f32.mrb[3].mxu0 }
 0x116   :  { %v213_v35 = vadd.f32 %v2872_v27, %v212_v34 }
 0x117   :  { %285 = vst.msk [vmem:[#allocation2 + $0x18] sm:$0xff] %vm281_vm1, %v218_v33 }
 0x118   :  { %284 = vst.msk [vmem:[#allocation2 + $0x10] sm:$0xff] %vm281_vm1, %v213_v35  ;;  %v3114_v36 = vpop.f32.mrb[4].mxu0 }
 0x119   :  { %v228_v37 = vadd.f32 %v3114_v36, %v2872_v27  ;;  %v222_v38 = vpop.f32.mrb[5].mxu0 }
 0x11a   :  { %v223_v39 = vadd.f32 %v2872_v27, %v222_v38  ;;  %v477_v1 = vld [vmem:[#allocation2 + $0x8] sm:$0xff] }
 0x11b   :  { %287 = vst.msk [vmem:[#allocation2 + $0x28] sm:$0xff] %vm281_vm1, %v228_v37  ;;  %v476_v3 = vld [vmem:[#allocation2] sm:$0xff] }
 0x11c   :  { %286 = vst.msk [vmem:[#allocation2 + $0x20] sm:$0xff] %vm281_vm1, %v223_v39  ;;  %v3117_v40 = vpop.f32.mrb[6].mxu0  ;;  %v299_v39 = vld [vmem:[#allocation7 + $0x10] sm:$0xff] }
 0x11d   :  { %v238_v41 = vadd.f32 %v3117_v40, %v2872_v27  ;;  %v232_v42 = vpop.f32.mrb[7].mxu0  ;;  %v300_v40 = vld [vmem:[#allocation7 + $0x18] sm:$0xff] }
 0x11e   :  { %v233_v43 = vadd.f32 %v2872_v27, %v232_v42 }
 0x11f   :  { %289 = vst.msk [vmem:[#allocation2 + $0x38] sm:$0xff] %vm281_vm1, %v238_v41  ;;  %v3338_v41 = vpack.c.bf16 %v300_v40, %v299_v39 }
 0x120   :  { %288 = vst.msk [vmem:[#allocation2 + $0x30] sm:$0xff] %vm281_vm1, %v233_v43  ;;  %v3120_v44 = vpop.f32.mrb[8].mxu0 }
 0x121   :  { %v248_v45 = vadd.f32 %v3120_v44, %v2872_v27  ;;  %v242_v46 = vpop.f32.mrb[9].mxu0  ;;  %3339 = vmatprep.subr.bf16.mxu1 %v3338_v41 }
 0x122   :  { %v243_v47 = vadd.f32 %v2872_v27, %v242_v46  ;;  %3341 = vmatpush3.bf16.msra.mxu1 %v3338_v41 }
 0x123   :  { %291 = vst.msk [vmem:[#allocation2 + $0x48] sm:$0xff] %vm281_vm1, %v248_v45  ;;  %3351 = vmatprep.subr.bf16.mxu1 %v3858_v6 }
 0x124   :  { %290 = vst.msk [vmem:[#allocation2 + $0x40] sm:$0xff] %vm281_vm1, %v243_v47  ;;  %v3123_v48 = vpop.f32.mrb[10].mxu0 }
 0x125   :  { %v258_v49 = vadd.f32 %v3123_v48, %v2872_v27  ;;  %v252_v50 = vpop.f32.mrb[11].mxu0  ;;  %3135 = vmatmul.mubr.msk.f32.vlgmr.msra.gmra.mrb[0].mxu1 %vm87_vm0, %v3860_v7 }
 0x126   :  { %v253_v51 = vadd.f32 %v2872_v27, %v252_v50  ;;  %3353 = vmatpush3.bf16.msra.mxu1 %v3858_v6  ;;  %3137 = vmatprep.mubr.msk.f32.mxu1 %vm87_vm0, %v3863_v9 }
 0x127   :  { %293 = vst.msk [vmem:[#allocation2 + $0x58] sm:$0xff] %vm281_vm1, %v258_v49  ;;  %3355 = vmatprep.subr.bf16.mxu1 %v3865_v11 }
 0x128   :  { %292 = vst.msk [vmem:[#allocation2 + $0x50] sm:$0xff] %vm281_vm1, %v253_v51  ;;  %v3126_v52 = vpop.f32.mrb[12].mxu0 }
 0x129   :  { %v268_v53 = vadd.f32 %v3126_v52, %v2872_v27  ;;  %v262_v54 = vpop.f32.mrb[13].mxu0  ;;  %3138 = vmatmul.mubr.msk.f32.gmra.mrb[2].mxu1 %vm87_vm0, %v3875_v13 }
 0x12a   :  { %v263_v55 = vadd.f32 %v2872_v27, %v262_v54  ;;  %3140 = vmatprep.mubr.msk.f32.mxu1 %vm87_vm0, %v3877_v14  ;;  %3357 = vmatpush3.bf16.msra.mxu1 %v3865_v11 }
 0x12b   :  { %295 = vst.msk [vmem:[#allocation2 + $0x68] sm:$0xff] %vm281_vm1, %v268_v53  ;;  %3367 = vmatprep.subr.bf16.mxu1 %v3858_v6 }
 0x12c   :  { %294 = vst.msk [vmem:[#allocation2 + $0x60] sm:$0xff] %vm281_vm1, %v263_v55  ;;  %v3129_v56 = vpop.f32.mrb[14].mxu0 }
 0x12d   :  { %v278_v57 = vadd.f32 %v3129_v56, %v2872_v27  ;;  %v272_v58 = vpop.f32.mrb[15].mxu0  ;;  %3141 = vmatmul.mubr.msk.f32.gmra.mrb[4].mxu1 %vm87_vm0, %v3885_v15 }
 0x12e   :  { %v273_v59 = vadd.f32 %v2872_v27, %v272_v58  ;;  %3143 = vmatprep.mubr.msk.f32.mxu1 %vm87_vm0, %v3888_v16 }
 0x12f   :  { %297 = vst.msk [vmem:[#allocation2 + $0x78] sm:$0xff] %vm281_vm1, %v278_v57 }
 0x130   :  { %296 = vst.msk [vmem:[#allocation2 + $0x70] sm:$0xff] %vm281_vm1, %v273_v59  ;;  %v3168_v61 = vpop.f32.mrb[16].mxu0 }
 0x131   :  { %v548_v62 = vpop.f32.mrb[17].mxu0  ;;  %v580_v63 = vadd.f32 %v3168_v61, %v3954_v60  ;;  %v558_v2 = vadd.f32 %v3168_v61, %v477_v1  ;;  %3144 = vmatmul.mubr.msk.f32.gmra.mrb[6].mxu1 %vm87_vm0, %v3895_v17 }
 0x132   :  { %v579_v0 = vadd.f32 %v3954_v60, %v548_v62  ;;  %v557_v4 = vadd.f32 %v548_v62, %v476_v3  ;;  %3146 = vmatprep.mubr.msk.f32.mxu1 %vm87_vm0, %v3897_v18 }
 0x133   :  { %585 = vrot.lane.b32.xlu1 %v580_v63, %s3770_s7  ;;  %v2908_v5 = vmul.f32 -1.442695, %v558_v2 }
 0x134   :  { %583 = vrot.lane.b32.xlu0 %v579_v0, %s3770_s7  ;;  %v2907_v8 = vmul.f32 -1.442695, %v557_v4 }
 0x135   :  { %3479 = vpow2.f32 %v2908_v5  ;;  %3147 = vmatmul.mubr.msk.f32.gmra.mrb[8].mxu1 %vm87_vm0, %v3903_v19 }
 0x136   :  { %3481 = vpow2.f32 %v2907_v8  ;;  %3149 = vmatprep.mubr.msk.f32.mxu1 %vm87_vm0, %v3905_v20 }
 0x139   :  { %3150 = vmatmul.mubr.msk.f32.gmra.mrb[10].mxu1 %vm87_vm0, %v3911_v21  ;;  %v2890_v21 = vld [vmem:[%s4378_s3 + $0x1] ss:$0 sm:$0xff] }
 0x13a   :  { %3152 = vmatprep.mubr.msk.f32.mxu1 %vm87_vm0, %v3913_v22 }
 0x13d   :  { %3153 = vmatmul.mubr.msk.f32.gmra.mrb[12].mxu1 %vm87_vm0, %v3919_v23 }
 0x13e   :  { %3155 = vmatprep.mubr.msk.f32.mxu1 %vm87_vm0, %v3921_v24 }
 0x13f   :  { %v3480_v10 = vpop.eup %3479 }
 0x140   :  { %v3482_v12 = vpop.eup %3481  ;;  %v566_v27 = vadd.f32 1.0, %v3480_v10 }
 0x141   :  { %v565_v28 = vadd.f32 1.0, %v3482_v12  ;;  %3156 = vmatmul.mubr.msk.f32.gmra.mrb[14].mxu1 %vm87_vm0, %v3927_v25 }
 0x142   :  { %3483 = vrcp.f32 %v566_v27 }
 0x143   :  { %3485 = vrcp.f32 %v565_v28 }
 0x14c   :  { %v3484_v29 = vpop.eup %3483 }
 0x14d   :  { %v3486_v31 = vpop.eup %3485  ;;  %v604_v7 = vsub.f32 1.0, %v3484_v29  ;;  %v616_v14 = vmul.f32 0.0, %v3484_v29 }
 0x14e   :  { %v603_v13 = vsub.f32 1.0, %v3486_v31  ;;  %v615_v17 = vmul.f32 0.0, %v3486_v31 }
 0x1a5   :  { %v586_v30 = vpop.permute.xlu1 %585 }
 0x1a6   :  { %v590_v32 = vmul.f32 %v3484_v29, %v586_v30  ;;  %v584_v33 = vpop.permute.xlu0 %583 }
 0x1a7   :  { %v589_v34 = vmul.f32 %v3486_v31, %v584_v33  ;;  %v631_v33 = vld [vmem:[#allocation2 + $0x18] sm:$0xff] }
 0x1a8   :  { %595 = vrot.lane.b32.xlu0 %v590_v32, %s3770_s7 }
 0x1a9   :  { %593 = vrot.lane.b32.xlu1 %v589_v34, %s3770_s7 }
 0x1f8   :  { %v3136_v22 = vpop.f32.mrb[0].mxu1 }
 0x1f9   :  { %v381_v23 = vadd.f32 %v3136_v22, %v2890_v21  ;;  %v375_v24 = vpop.f32.mrb[1].mxu1 }
 0x1fa   :  { %v376_v25 = vadd.f32 %v2890_v21, %v375_v24 }
 0x1fb   :  { %456 = vst.msk [vmem:[#allocation2 + $0x88] sm:$0xff] %vm281_vm1, %v381_v23 }
 0x1fc   :  { %455 = vst.msk [vmem:[#allocation2 + $0x80] sm:$0xff] %vm281_vm1, %v376_v25  ;;  %v3139_v44 = vpop.f32.mrb[2].mxu1 }
 0x1fd   :  { %v391_v45 = vadd.f32 %v3139_v44, %v2890_v21  ;;  %v385_v46 = vpop.f32.mrb[3].mxu1 }
 0x1fe   :  { %v386_v47 = vadd.f32 %v2890_v21, %v385_v46 }
 0x1ff   :  { %458 = vst.msk [vmem:[#allocation2 + $0x98] sm:$0xff] %vm281_vm1, %v391_v45 }
 0x200   :  { %457 = vst.msk [vmem:[#allocation2 + $0x90] sm:$0xff] %vm281_vm1, %v386_v47  ;;  %v3142_v48 = vpop.f32.mrb[4].mxu1 }
 0x201   :  { %v401_v49 = vadd.f32 %v3142_v48, %v2890_v21  ;;  %v395_v50 = vpop.f32.mrb[5].mxu1 }
 0x202   :  { %v396_v51 = vadd.f32 %v2890_v21, %v395_v50 }
 0x203   :  { %460 = vst.msk [vmem:[#allocation2 + $0xa8] sm:$0xff] %vm281_vm1, %v401_v49 }
 0x204   :  { %459 = vst.msk [vmem:[#allocation2 + $0xa0] sm:$0xff] %vm281_vm1, %v396_v51  ;;  %v3145_v52 = vpop.f32.mrb[6].mxu1 }
 0x205   :  { %v411_v53 = vadd.f32 %v3145_v52, %v2890_v21  ;;  %v405_v54 = vpop.f32.mrb[7].mxu1 }
 0x206   :  { %v406_v55 = vadd.f32 %v2890_v21, %v405_v54 }
 0x207   :  { %462 = vst.msk [vmem:[#allocation2 + $0xb8] sm:$0xff] %vm281_vm1, %v411_v53 }
 0x208   :  { %461 = vst.msk [vmem:[#allocation2 + $0xb0] sm:$0xff] %vm281_vm1, %v406_v55  ;;  %v3148_v56 = vpop.f32.mrb[8].mxu1 }
 0x209   :  { %v421_v57 = vadd.f32 %v3148_v56, %v2890_v21  ;;  %v415_v58 = vpop.f32.mrb[9].mxu1  ;;  %v778_v56 = vld [vmem:[#allocation2 + $0x28] sm:$0xff] }
 0x20a   :  { %v416_v59 = vadd.f32 %v2890_v21, %v415_v58  ;;  %v777_v58 = vld [vmem:[#allocation2 + $0x20] sm:$0xff] }
 0x20b   :  { %464 = vst.msk [vmem:[#allocation2 + $0xc8] sm:$0xff] %vm281_vm1, %v421_v57 }
 0x20c   :  { %463 = vst.msk [vmem:[#allocation2 + $0xc0] sm:$0xff] %vm281_vm1, %v416_v59  ;;  %v3151_v61 = vpop.f32.mrb[10].mxu1 }
 0x20d   :  { %v431_v62 = vadd.f32 %v3151_v61, %v2890_v21  ;;  %v425_v63 = vpop.f32.mrb[11].mxu1 }
 0x20e   :  { %v426_v0 = vadd.f32 %v2890_v21, %v425_v63 }
 0x20f   :  { %466 = vst.msk [vmem:[#allocation2 + $0xd8] sm:$0xff] %vm281_vm1, %v431_v62 }
 0x210   :  { %465 = vst.msk [vmem:[#allocation2 + $0xd0] sm:$0xff] %vm281_vm1, %v426_v0 }
 0x21a   :  { %v596_v35 = vpop.permute.xlu0 %595 }
 0x21b   :  { %v600_v36 = vadd.f32 %v596_v35, %v477_v1  ;;  %v594_v37 = vpop.permute.xlu1 %593  ;;  %v630_v35 = vld [vmem:[#allocation2 + $0x10] sm:$0xff] }
 0x21c   :  { %v599_v38 = vadd.f32 %v594_v37, %v476_v3  ;;  %v3154_v3 = vpop.f32.mrb[12].mxu1 }
 0x21d   :  { %3487 = vtanh.f32 %v600_v36  ;;  %v441_v4 = vadd.f32 %v3154_v3, %v2890_v21  ;;  %v435_v5 = vpop.f32.mrb[13].mxu1 }
 0x21e   :  { %3489 = vtanh.f32 %v599_v38  ;;  %v436_v8 = vadd.f32 %v2890_v21, %v435_v5  ;;  %v3157_v10 = vpop.f32.mrb[14].mxu1 }
 0x21f   :  { %468 = vst.msk [vmem:[#allocation2 + $0xe8] sm:$0xff] %vm281_vm1, %v441_v4  ;;  %v451_v12 = vadd.f32 %v3157_v10, %v2890_v21  ;;  %v445_v27 = vpop.f32.mrb[15].mxu1 }
 0x220   :  { %467 = vst.msk [vmem:[#allocation2 + $0xe0] sm:$0xff] %vm281_vm1, %v436_v8  ;;  %v446_v28 = vadd.f32 %v2890_v21, %v445_v27 }
 0x221   :  { %470 = vst.msk [vmem:[#allocation2 + $0xf8] sm:$0xff] %vm281_vm1, %v451_v12 }
 0x222   :  { %469 = vst.msk [vmem:[#allocation2 + $0xf0] sm:$0xff] %vm281_vm1, %v446_v28 }
 0x227   :  { %v3488_v42 = vpop.eup %3487 }
 0x228   :  { %v3490_v43 = vpop.eup %3489  ;;  %609 = vrot.lane.b32.xlu0 %v3488_v42, %s3772_s10 }
 0x229   :  { %607 = vrot.lane.b32.xlu1 %v3490_v43, %s3772_s10 }
 0x29a   :  { %v610_v9 = vpop.permute.xlu0 %609 }
 0x29b   :  { %v614_v15 = vmul.f32 %v610_v9, %v604_v7  ;;  %v608_v16 = vpop.permute.xlu1 %607 }
 0x29c   :  { %v613_v18 = vmul.f32 %v608_v16, %v603_v13 }
 0x29d   :  { %v4001_v19 = vadd.f32 %v616_v14, %v614_v15 }
 0x29e   :  { %v4003_v20 = vadd.f32 %v615_v17, %v613_v18 }
 0x29f   :  { %623 = vrot.lane.b32.xlu0 %v4001_v19, %s3772_s10 }
 0x2a0   :  { %621 = vrot.lane.b32.xlu1 %v4003_v20, %s3772_s10 }
 0x311   :  { %v624_v1 = vpop.permute.xlu0 %623 }
 0x312   :  { %628 = vst.msk [vmem:[#allocation3 + $0x8] sm:$0xff] %vm478_vm2, %v624_v1  ;;  %v622_v2 = vpop.permute.xlu1 %621 }
 0x313   :  { %627 = vst.msk [vmem:[#allocation3] sm:$0xff] %vm478_vm2, %v622_v2  ;;  %3177 = vmatprep.mubr.msk.f32.mxu1 %vm478_vm2, %v622_v2 }
 0x314   :  { %3178 = vmatmul.mubr.msk.f32.vlgmr.msra.gmra.mrb[16].mxu1 %vm478_vm2, %v624_v1 }
 0x315   :  { %3369 = vmatpush3.bf16.msra.mxu1 %v3858_v6 }
 0x316   :  { %3371 = vmatprep.subr.bf16.mxu1 %v3865_v11 }
 0x319   :  { %3373 = vmatpush3.bf16.msra.mxu1 %v3865_v11 }
 0x31a   :  { %3383 = vmatprep.subr.bf16.mxu1 %v3858_v6 }
 0x3e7   :  { %v3179_v29 = vpop.f32.mrb[16].mxu1 }
 0x3e8   :  { %v726_v30 = vadd.f32 %v3179_v29, %v3954_v60  ;;  %v702_v31 = vpop.f32.mrb[17].mxu1  ;;  %v712_v34 = vadd.f32 %v3179_v29, %v631_v33 }
 0x3e9   :  { %v725_v32 = vadd.f32 %v702_v31, %v3954_v60  ;;  %v711_v36 = vadd.f32 %v702_v31, %v630_v35 }
 0x3ea   :  { %731 = vrot.lane.b32.xlu0 %v726_v30, %s3770_s7  ;;  %v2913_v37 = vmul.f32 -1.442695, %v712_v34 }
 0x3eb   :  { %729 = vrot.lane.b32.xlu1 %v725_v32, %s3770_s7  ;;  %v2912_v38 = vmul.f32 -1.442695, %v711_v36 }
 0x3ec   :  { %3491 = vpow2.f32 %v2913_v37 }
 0x3ed   :  { %3493 = vpow2.f32 %v2912_v38 }
 0x3f6   :  { %v3492_v39 = vpop.eup %3491 }
 0x3f7   :  { %v3494_v40 = vpop.eup %3493  ;;  %v720_v41 = vadd.f32 1.0, %v3492_v39 }
 0x3f8   :  { %v719_v42 = vadd.f32 1.0, %v3494_v40 }
 0x3f9   :  { %3495 = vrcp.f32 %v720_v41 }
 0x3fa   :  { %3497 = vrcp.f32 %v719_v42 }
 0x403   :  { %v3496_v43 = vpop.eup %3495 }
 0x404   :  { %v3498_v9 = vpop.eup %3497  ;;  %v750_v24 = vsub.f32 1.0, %v3496_v43  ;;  %v762_v45 = vmul.f32 %v3496_v43, %v4001_v19 }
 0x405   :  { %v749_v44 = vsub.f32 1.0, %v3498_v9  ;;  %v761_v48 = vmul.f32 %v3498_v9, %v4003_v20 }
 0x45c   :  { %v732_v7 = vpop.permute.xlu0 %731 }
 0x45d   :  { %v736_v13 = vmul.f32 %v3496_v43, %v732_v7  ;;  %v730_v14 = vpop.permute.xlu1 %729 }
 0x45e   :  { %v735_v15 = vmul.f32 %v3498_v9, %v730_v14 }
 0x45f   :  { %741 = vrot.lane.b32.xlu0 %v736_v13, %s3770_s7 }
 0x460   :  { %739 = vrot.lane.b32.xlu1 %v735_v15, %s3770_s7 }
 0x4d1   :  { %v742_v16 = vpop.permute.xlu0 %741 }
 0x4d2   :  { %v746_v17 = vadd.f32 %v742_v16, %v631_v33  ;;  %v740_v18 = vpop.permute.xlu1 %739  ;;  %v925_v16 = vld [vmem:[#allocation2 + $0x38] sm:$0xff] }
 0x4d3   :  { %v745_v21 = vadd.f32 %v740_v18, %v630_v35  ;;  %v924_v18 = vld [vmem:[#allocation2 + $0x30] sm:$0xff] }
 0x4d4   :  { %3499 = vtanh.f32 %v746_v17 }
 0x4d5   :  { %3501 = vtanh.f32 %v745_v21 }
 0x4de   :  { %v3500_v22 = vpop.eup %3499 }
 0x4df   :  { %v3502_v23 = vpop.eup %3501  ;;  %755 = vrot.lane.b32.xlu0 %v3500_v22, %s3772_s10 }
 0x4e0   :  { %753 = vrot.lane.b32.xlu1 %v3502_v23, %s3772_s10 }
 0x551   :  { %v756_v25 = vpop.permute.xlu0 %755 }
 0x552   :  { %v760_v46 = vmul.f32 %v756_v25, %v750_v24  ;;  %v754_v47 = vpop.permute.xlu1 %753 }
 0x553   :  { %v759_v49 = vmul.f32 %v754_v47, %v749_v44 }
 0x554   :  { %v764_v50 = vadd.f32 %v762_v45, %v760_v46 }
 0x555   :  { %v763_v51 = vadd.f32 %v761_v48, %v759_v49 }
 0x556   :  { %769 = vrot.lane.b32.xlu0 %v764_v50, %s3772_s10 }
 0x557   :  { %767 = vrot.lane.b32.xlu1 %v763_v51, %s3772_s10 }
 0x5c8   :  { %v770_v52 = vpop.permute.xlu0 %769 }
 0x5c9   :  { %775 = vst.msk [vmem:[#allocation3 + $0x18] sm:$0xff] %vm478_vm2, %v770_v52  ;;  %v768_v53 = vpop.permute.xlu1 %767 }
 0x5ca   :  { %774 = vst.msk [vmem:[#allocation3 + $0x10] sm:$0xff] %vm478_vm2, %v768_v53  ;;  %3188 = vmatprep.mubr.msk.f32.mxu0 %vm478_vm2, %v768_v53 }
 0x5cb   :  { %3189 = vmatmul.mubr.msk.f32.vlgmr.msra.gmra.mrb[18].mxu0 %vm478_vm2, %v770_v52 }
 0x5cc   :  { %3377 = vmatpush3.bf16.msra.mxu0 %v3858_v6 }
 0x5cd   :  { %3379 = vmatprep.subr.bf16.mxu0 %v3865_v11 }
 0x5d0   :  { %3381 = vmatpush3.bf16.msra.mxu0 %v3865_v11 }
 0x5d1   :  { %3391 = vmatprep.subr.bf16.mxu0 %v3858_v6 }
 0x69e   :  { %v3190_v19 = vpop.f32.mrb[18].mxu0 }
 0x69f   :  { %v873_v20 = vadd.f32 %v3190_v19, %v3954_v60  ;;  %v849_v54 = vpop.f32.mrb[19].mxu0  ;;  %v859_v57 = vadd.f32 %v3190_v19, %v778_v56 }
 0x6a0   :  { %v872_v55 = vadd.f32 %v849_v54, %v3954_v60  ;;  %v858_v59 = vadd.f32 %v849_v54, %v777_v58 }
 0x6a1   :  { %878 = vrot.lane.b32.xlu0 %v873_v20, %s3770_s7  ;;  %v2917_v61 = vmul.f32 -1.442695, %v859_v57 }
 0x6a2   :  { %876 = vrot.lane.b32.xlu1 %v872_v55, %s3770_s7  ;;  %v2916_v62 = vmul.f32 -1.442695, %v858_v59 }
 0x6a3   :  { %3503 = vpow2.f32 %v2917_v61 }
 0x6a4   :  { %3505 = vpow2.f32 %v2916_v62 }
 0x6ad   :  { %v3504_v63 = vpop.eup %3503 }
 0x6ae   :  { %v3506_v0 = vpop.eup %3505  ;;  %v867_v1 = vadd.f32 1.0, %v3504_v63 }
 0x6af   :  { %v866_v2 = vadd.f32 1.0, %v3506_v0 }
 0x6b0   :  { %3507 = vrcp.f32 %v867_v1 }
 0x6b1   :  { %3509 = vrcp.f32 %v866_v2 }
 0x6ba   :  { %v3508_v3 = vpop.eup %3507 }
 0x6bb   :  { %v3510_v5 = vpop.eup %3509  ;;  %v897_v33 = vsub.f32 1.0, %v3508_v3  ;;  %v909_v36 = vmul.f32 %v3508_v3, %v764_v50 }
 0x6bc   :  { %v896_v35 = vsub.f32 1.0, %v3510_v5  ;;  %v908_v39 = vmul.f32 %v3510_v5, %v763_v51 }
 0x713   :  { %v879_v4 = vpop.permute.xlu0 %878 }
 0x714   :  { %v883_v8 = vmul.f32 %v3508_v3, %v879_v4  ;;  %v877_v10 = vpop.permute.xlu1 %876 }
 0x715   :  { %v882_v12 = vmul.f32 %v3510_v5, %v877_v10 }
 0x716   :  { %888 = vrot.lane.b32.xlu0 %v883_v8, %s3770_s7 }
 0x717   :  { %886 = vrot.lane.b32.xlu1 %v882_v12, %s3770_s7 }
 0x788   :  { %v889_v27 = vpop.permute.xlu0 %888 }
 0x789   :  { %v893_v28 = vadd.f32 %v889_v27, %v778_v56  ;;  %v887_v29 = vpop.permute.xlu1 %886  ;;  %v1072_v27 = vld [vmem:[#allocation2 + $0x48] sm:$0xff] }
 0x78a   :  { %v892_v30 = vadd.f32 %v887_v29, %v777_v58  ;;  %v1071_v29 = vld [vmem:[#allocation2 + $0x40] sm:$0xff] }
 0x78b   :  { %3511 = vtanh.f32 %v893_v28 }
 0x78c   :  { %3513 = vtanh.f32 %v892_v30 }
 0x795   :  { %v3512_v31 = vpop.eup %3511 }
 0x796   :  { %v3514_v32 = vpop.eup %3513  ;;  %902 = vrot.lane.b32.xlu0 %v3512_v31, %s3772_s10 }
 0x797   :  { %900 = vrot.lane.b32.xlu1 %v3514_v32, %s3772_s10 }
 0x808   :  { %v903_v34 = vpop.permute.xlu0 %902 }
 0x809   :  { %v907_v37 = vmul.f32 %v903_v34, %v897_v33  ;;  %v901_v38 = vpop.permute.xlu1 %900 }
 0x80a   :  { %v906_v40 = vmul.f32 %v901_v38, %v896_v35 }
 0x80b   :  { %v911_v41 = vadd.f32 %v909_v36, %v907_v37 }
 0x80c   :  { %v910_v42 = vadd.f32 %v908_v39, %v906_v40 }
 0x80d   :  { %916 = vrot.lane.b32.xlu0 %v911_v41, %s3772_s10 }
 0x80e   :  { %914 = vrot.lane.b32.xlu1 %v910_v42, %s3772_s10 }
 0x87f   :  { %v917_v43 = vpop.permute.xlu0 %916 }
 0x880   :  { %922 = vst.msk [vmem:[#allocation3 + $0x28] sm:$0xff] %vm478_vm2, %v917_v43  ;;  %v915_v7 = vpop.permute.xlu1 %914 }
 0x881   :  { %921 = vst.msk [vmem:[#allocation3 + $0x20] sm:$0xff] %vm478_vm2, %v915_v7  ;;  %3199 = vmatprep.mubr.msk.f32.mxu1 %vm478_vm2, %v915_v7 }
 0x882   :  { %3200 = vmatmul.mubr.msk.f32.vlgmr.msra.gmra.mrb[18].mxu1 %vm478_vm2, %v917_v43 }
 0x883   :  { %3385 = vmatpush3.bf16.msra.mxu1 %v3858_v6 }
 0x884   :  { %3387 = vmatprep.subr.bf16.mxu1 %v3865_v11 }
 0x887   :  { %3389 = vmatpush3.bf16.msra.mxu1 %v3865_v11 }
 0x888   :  { %3399 = vmatprep.subr.bf16.mxu1 %v3858_v6 }
 0x955   :  { %v3201_v9 = vpop.f32.mrb[18].mxu1 }
 0x956   :  { %v1020_v13 = vadd.f32 %v3201_v9, %v3954_v60  ;;  %v996_v14 = vpop.f32.mrb[19].mxu1  ;;  %v1006_v17 = vadd.f32 %v3201_v9, %v925_v16 }
 0x957   :  { %v1019_v15 = vadd.f32 %v996_v14, %v3954_v60  ;;  %v1005_v21 = vadd.f32 %v996_v14, %v924_v18 }
 0x958   :  { %1025 = vrot.lane.b32.xlu0 %v1020_v13, %s3770_s7  ;;  %v2921_v22 = vmul.f32 -1.442695, %v1006_v17 }
 0x959   :  { %1023 = vrot.lane.b32.xlu1 %v1019_v15, %s3770_s7  ;;  %v2920_v23 = vmul.f32 -1.442695, %v1005_v21 }
 0x95a   :  { %3515 = vpow2.f32 %v2921_v22 }
 0x95b   :  { %3517 = vpow2.f32 %v2920_v23 }
 0x964   :  { %v3516_v24 = vpop.eup %3515 }
 0x965   :  { %v3518_v25 = vpop.eup %3517  ;;  %v1014_v44 = vadd.f32 1.0, %v3516_v24 }
 0x966   :  { %v1013_v45 = vadd.f32 1.0, %v3518_v25 }
 0x967   :  { %3519 = vrcp.f32 %v1014_v44 }
 0x968   :  { %3521 = vrcp.f32 %v1013_v45 }
 0x971   :  { %v3520_v46 = vpop.eup %3519 }
 0x972   :  { %v3522_v48 = vpop.eup %3521  ;;  %v1044_v56 = vsub.f32 1.0, %v3520_v46  ;;  %v1056_v59 = vmul.f32 %v3520_v46, %v911_v41 }
 0x973   :  { %v1043_v58 = vsub.f32 1.0, %v3522_v48  ;;  %v1055_v63 = vmul.f32 %v3522_v48, %v910_v42 }
 0x9ca   :  { %v1026_v47 = vpop.permute.xlu0 %1025 }
 0x9cb   :  { %v1030_v49 = vmul.f32 %v3520_v46, %v1026_v47  ;;  %v1024_v50 = vpop.permute.xlu1 %1023 }
 0x9cc   :  { %v1029_v51 = vmul.f32 %v3522_v48, %v1024_v50 }
 0x9cd   :  { %1035 = vrot.lane.b32.xlu0 %v1030_v49, %s3770_s7 }
 0x9ce   :  { %1033 = vrot.lane.b32.xlu1 %v1029_v51, %s3770_s7 }
 0xa3f   :  { %v1036_v52 = vpop.permute.xlu0 %1035 }
 0xa40   :  { %v1040_v53 = vadd.f32 %v1036_v52, %v925_v16  ;;  %v1034_v19 = vpop.permute.xlu1 %1033  ;;  %v1219_v52 = vld [vmem:[#allocation2 + $0x58] sm:$0xff] }
 0xa41   :  { %v1039_v20 = vadd.f32 %v1034_v19, %v924_v18  ;;  %v1218_v19 = vld [vmem:[#allocation2 + $0x50] sm:$0xff] }
 0xa42   :  { %3523 = vtanh.f32 %v1040_v53 }
 0xa43   :  { %3525 = vtanh.f32 %v1039_v20 }
 0xa4c   :  { %v3524_v54 = vpop.eup %3523 }
 0xa4d   :  { %v3526_v55 = vpop.eup %3525  ;;  %1049 = vrot.lane.b32.xlu0 %v3524_v54, %s3772_s10 }
 0xa4e   :  { %1047 = vrot.lane.b32.xlu1 %v3526_v55, %s3772_s10 }
 0xabf   :  { %v1050_v57 = vpop.permute.xlu0 %1049 }
 0xac0   :  { %v1054_v61 = vmul.f32 %v1050_v57, %v1044_v56  ;;  %v1048_v62 = vpop.permute.xlu1 %1047 }
 0xac1   :  { %v1053_v0 = vmul.f32 %v1048_v62, %v1043_v58 }
 0xac2   :  { %v1058_v1 = vadd.f32 %v1056_v59, %v1054_v61 }
 0xac3   :  { %v1057_v2 = vadd.f32 %v1055_v63, %v1053_v0 }
 0xac4   :  { %1063 = vrot.lane.b32.xlu0 %v1058_v1, %s3772_s10 }
 0xac5   :  { %1061 = vrot.lane.b32.xlu1 %v1057_v2, %s3772_s10 }
 0xb36   :  { %v1064_v3 = vpop.permute.xlu0 %1063 }
 0xb37   :  { %1069 = vst.msk [vmem:[#allocation3 + $0x38] sm:$0xff] %vm478_vm2, %v1064_v3  ;;  %v1062_v4 = vpop.permute.xlu1 %1061 }
 0xb38   :  { %1068 = vst.msk [vmem:[#allocation3 + $0x30] sm:$0xff] %vm478_vm2, %v1062_v4  ;;  %3210 = vmatprep.mubr.msk.f32.mxu0 %vm478_vm2, %v1062_v4 }
 0xb39   :  { %3211 = vmatmul.mubr.msk.f32.vlgmr.msra.gmra.mrb[20].mxu0 %vm478_vm2, %v1064_v3 }
 0xb3a   :  { %3393 = vmatpush3.bf16.msra.mxu0 %v3858_v6 }
 0xb3b   :  { %3395 = vmatprep.subr.bf16.mxu0 %v3865_v11 }
 0xb3e   :  { %3397 = vmatpush3.bf16.msra.mxu0 %v3865_v11 }
 0xc0c   :  { %v3212_v5 = vpop.f32.mrb[20].mxu0 }
 0xc0d   :  { %v1167_v8 = vadd.f32 %v3212_v5, %v3954_v60  ;;  %v1143_v10 = vpop.f32.mrb[21].mxu0  ;;  %v1153_v28 = vadd.f32 %v3212_v5, %v1072_v27 }
 0xc0e   :  { %v1166_v12 = vadd.f32 %v1143_v10, %v3954_v60  ;;  %v1152_v30 = vadd.f32 %v1143_v10, %v1071_v29  ;;  %v1659_v10 = vld [vmem:[#allocation9 + $0x20] sm:$0xff] }
 0xc0f   :  { %1172 = vrot.lane.b32.xlu0 %v1167_v8, %s3770_s7  ;;  %v2925_v31 = vmul.f32 -1.442695, %v1153_v28 }
 0xc10   :  { %1170 = vrot.lane.b32.xlu1 %v1166_v12, %s3770_s7  ;;  %v2924_v32 = vmul.f32 -1.442695, %v1152_v30  ;;  %v1660_v12 = vld [vmem:[#allocation9 + $0x28] sm:$0xff] }
 0xc11   :  { %3527 = vpow2.f32 %v2925_v31 }
 0xc12   :  { %3529 = vpow2.f32 %v2924_v32 }
 0xc1b   :  { %v3528_v33 = vpop.eup %3527 }
 0xc1c   :  { %v3530_v34 = vpop.eup %3529  ;;  %v1161_v35 = vadd.f32 1.0, %v3528_v33 }
 0xc1d   :  { %v1160_v36 = vadd.f32 1.0, %v3530_v34 }
 0xc1e   :  { %3531 = vrcp.f32 %v1161_v35 }
 0xc1f   :  { %3533 = vrcp.f32 %v1160_v36 }
 0xc28   :  { %v3532_v37 = vpop.eup %3531 }
 0xc29   :  { %v3534_v39 = vpop.eup %3533  ;;  %v1191_v16 = vsub.f32 1.0, %v3532_v37  ;;  %v1203_v21 = vmul.f32 %v3532_v37, %v1058_v1 }
 0xc2a   :  { %v1190_v18 = vsub.f32 1.0, %v3534_v39  ;;  %v1202_v24 = vmul.f32 %v3534_v39, %v1057_v2 }
 0xc81   :  { %v1173_v38 = vpop.permute.xlu0 %1172 }
 0xc82   :  { %v1177_v40 = vmul.f32 %v3532_v37, %v1173_v38  ;;  %v1171_v41 = vpop.permute.xlu1 %1170  ;;  %v2941_v38 = vld [vmem:[%s4379_s4 + $0x1] ss:$0 sm:$0xff]  ;;  %s3773_s4 = smov [#allocation10]  }
 0xc83   :  { %v1176_v42 = vmul.f32 %v3534_v39, %v1171_v41  ;;  %v1661_v39 = vld [vmem:[#allocation9 + $0x30] sm:$0xff]  ;;  %s2859_s14 = sshll.u32 %s3773_s4, 4  ;;  %s2860_s14 = int_to_ptr.vmem [resolvable:$true] %s2859_s14 }
 0xc84   :  { %1182 = vrot.lane.b32.xlu0 %v1177_v40, %s3770_s7  ;;  %v1662_v40 = vld [vmem:[#allocation9 + $0x38] sm:$0xff]  ;;  %s3737_s15 = scalar_lea.vmem %s2860_s14, 2048  ;;  %p3742_p11 = scmp.lt.s32.totalorder %s2860_s14, %s2860_s14 }
 0xc85   :  { %1180 = vrot.lane.b32.xlu1 %v1176_v42, %s3770_s7  ;;  %p3738_p10 = scmp.ne.s32.totalorder %s2860_s14, %s3737_s15  ;;  %p3743_p12 = scmp.lt.s32.totalorder %s3737_s15, %s3737_s15 }
 0xc87   :  { %p3744_p13 = por %p3743_p12, %p3742_p11 }
 0xc89   :  { %p3745_p0 = pnand %p3744_p13, %p3738_p10 }
 0xcf6   :  { %v1183_v43 = vpop.permute.xlu0 %1182 }
 0xcf7   :  { %v1187_v7 = vadd.f32 %v1183_v43, %v1072_v27  ;;  %v1181_v9 = vpop.permute.xlu1 %1180  ;;  %v4116_v27 = vpack.c.bf16 %v1660_v12, %v1659_v10  ;;  %v4133_v43 = vpack.c.bf16 %v1662_v40, %v1661_v39 }
 0xcf8   :  { %v1186_v13 = vadd.f32 %v1181_v9, %v1071_v29 }
 0xcf9   :  { %3535 = vtanh.f32 %v1187_v7  ;;  %3407 = vmatprep.subr.bf16.mxu0 %v4116_v27 }
 0xcfa   :  { %3537 = vtanh.f32 %v1186_v13 }
 0xd03   :  { %v3536_v14 = vpop.eup %3535 }
 0xd04   :  { %v3538_v15 = vpop.eup %3537  ;;  %1196 = vrot.lane.b32.xlu0 %v3536_v14, %s3772_s10 }
 0xd05   :  { %1194 = vrot.lane.b32.xlu1 %v3538_v15, %s3772_s10 }
 0xd76   :  { %v1197_v17 = vpop.permute.xlu0 %1196 }
 0xd77   :  { %v1201_v22 = vmul.f32 %v1197_v17, %v1191_v16  ;;  %v1195_v23 = vpop.permute.xlu1 %1194 }
 0xd78   :  { %v1200_v25 = vmul.f32 %v1195_v23, %v1190_v18  ;;  %v1365_v23 = vld [vmem:[#allocation2 + $0x60] sm:$0xff] }
 0xd79   :  { %v1205_v44 = vadd.f32 %v1203_v21, %v1201_v22  ;;  %v1366_v21 = vld [vmem:[#allocation2 + $0x68] sm:$0xff] }
 0xd7a   :  { %v1204_v45 = vadd.f32 %v1202_v24, %v1200_v25 }
 0xd7b   :  { %1210 = vrot.lane.b32.xlu0 %v1205_v44, %s3772_s10 }
 0xd7c   :  { %1208 = vrot.lane.b32.xlu1 %v1204_v45, %s3772_s10 }
 0xded   :  { %v1211_v46 = vpop.permute.xlu0 %1210 }
 0xdee   :  { %1216 = vst.msk [vmem:[#allocation3 + $0x48] sm:$0xff] %vm478_vm2, %v1211_v46  ;;  %v1209_v47 = vpop.permute.xlu1 %1208 }
 0xdef   :  { %1215 = vst.msk [vmem:[#allocation3 + $0x40] sm:$0xff] %vm478_vm2, %v1209_v47  ;;  %3221 = vmatprep.mubr.msk.f32.mxu1 %vm478_vm2, %v1209_v47  ;;  %v1666_v47 = vld [vmem:[#allocation2 + $0xf0] sm:$0xff] }
 0xdf0   :  { %3222 = vmatmul.mubr.msk.f32.vlgmr.msra.gmra.mrb[20].mxu1 %vm478_vm2, %v1211_v46 }
 0xdf1   :  { %3401 = vmatpush3.bf16.msra.mxu1 %v3858_v6 }
 0xdf2   :  { %3403 = vmatprep.subr.bf16.mxu1 %v3865_v11 }
 0xdf5   :  { %3405 = vmatpush3.bf16.msra.mxu1 %v3865_v11 }
 0xdf6   :  { %3415 = vmatprep.subr.bf16.mxu1 %v4116_v27 }
 0xec3   :  { %v3223_v48 = vpop.f32.mrb[20].mxu1 }
 0xec4   :  { %v1314_v49 = vadd.f32 %v3223_v48, %v3954_v60  ;;  %v1290_v50 = vpop.f32.mrb[21].mxu1  ;;  %v1300_v53 = vadd.f32 %v3223_v48, %v1219_v52 }
 0xec5   :  { %v1313_v51 = vadd.f32 %v1290_v50, %v3954_v60  ;;  %v1299_v20 = vadd.f32 %v1290_v50, %v1218_v19 }
 0xec6   :  { %1319 = vrot.lane.b32.xlu0 %v1314_v49, %s3770_s7  ;;  %v2929_v54 = vmul.f32 -1.442695, %v1300_v53 }
 0xec7   :  { %1317 = vrot.lane.b32.xlu1 %v1313_v51, %s3770_s7  ;;  %v2928_v6 = vmul.f32 -1.442695, %v1299_v20 }
 0xec8   :  { %3539 = vpow2.f32 %v2929_v54 }
 0xec9   :  { %3541 = vpow2.f32 %v2928_v6 }
 0xed2   :  { %v3540_v55 = vpop.eup %3539 }
 0xed3   :  { %v3542_v11 = vpop.eup %3541  ;;  %v1308_v56 = vadd.f32 1.0, %v3540_v55 }
 0xed4   :  { %v1307_v57 = vadd.f32 1.0, %v3542_v11 }
 0xed5   :  { %3543 = vrcp.f32 %v1308_v56 }
 0xed6   :  { %3545 = vrcp.f32 %v1307_v57 }
 0xedf   :  { %v3544_v58 = vpop.eup %3543 }
 0xee0   :  { %v3546_v61 = vpop.eup %3545  ;;  %v1338_v28 = vsub.f32 1.0, %v3544_v58  ;;  %v1350_v31 = vmul.f32 %v3544_v58, %v1205_v44 }
 0xee1   :  { %v1337_v30 = vsub.f32 1.0, %v3546_v61  ;;  %v1349_v34 = vmul.f32 %v3546_v61, %v1204_v45  ;;  %v1667_v45 = vld [vmem:[#allocation2 + $0xf8] sm:$0xff] }
 0xf38   :  { %v1320_v59 = vpop.permute.xlu0 %1319 }
 0xf39   :  { %v1324_v62 = vmul.f32 %v3544_v58, %v1320_v59  ;;  %v1318_v63 = vpop.permute.xlu1 %1317 }
 0xf3a   :  { %v1323_v0 = vmul.f32 %v3546_v61, %v1318_v63 }
 0xf3b   :  { %1329 = vrot.lane.b32.xlu0 %v1324_v62, %s3770_s7 }
 0xf3c   :  { %1327 = vrot.lane.b32.xlu1 %v1323_v0, %s3770_s7 }
 0xfad   :  { %v1330_v1 = vpop.permute.xlu0 %1329 }
 0xfae   :  { %v1334_v2 = vadd.f32 %v1330_v1, %v1219_v52  ;;  %v1328_v3 = vpop.permute.xlu1 %1327 }
 0xfaf   :  { %v1333_v4 = vadd.f32 %v1328_v3, %v1218_v19 }
 0xfb0   :  { %3547 = vtanh.f32 %v1334_v2 }
 0xfb1   :  { %3549 = vtanh.f32 %v1333_v4 }
 0xfba   :  { %v3548_v5 = vpop.eup %3547 }
 0xfbb   :  { %v3550_v8 = vpop.eup %3549  ;;  %1343 = vrot.lane.b32.xlu0 %v3548_v5, %s3772_s10 }
 0xfbc   :  { %1341 = vrot.lane.b32.xlu1 %v3550_v8, %s3772_s10 }
0x102d   :  { %v1344_v29 = vpop.permute.xlu0 %1343 }
0x102e   :  { %v1348_v32 = vmul.f32 %v1344_v29, %v1338_v28  ;;  %v1342_v33 = vpop.permute.xlu1 %1341 }
0x102f   :  { %v1347_v35 = vmul.f32 %v1342_v33, %v1337_v30 }
0x1030   :  { %v4120_v36 = vadd.f32 %v1350_v31, %v1348_v32 }
0x1031   :  { %v4122_v37 = vadd.f32 %v1349_v34, %v1347_v35 }
0x1032   :  { %1357 = vrot.lane.b32.xlu0 %v4120_v36, %s3772_s10 }
0x1033   :  { %1355 = vrot.lane.b32.xlu1 %v4122_v37, %s3772_s10 }
0x1037   :  { %1762 = vrot.lane.b32.xlu1 %v2941_v38, %s3770_s7 }
0x10a4   :  { %v1358_v41 = vpop.permute.xlu0 %1357 }
0x10a5   :  { %1363 = vst.msk [vmem:[#allocation3 + $0x58] sm:$0xff] %vm478_vm2, %v1358_v41  ;;  %v1356_v42 = vpop.permute.xlu1 %1355 }
0x10a6   :  { %1362 = vst.msk [vmem:[#allocation3 + $0x50] sm:$0xff] %vm478_vm2, %v1356_v42  ;;  %3232 = vmatprep.mubr.msk.f32.mxu0 %vm478_vm2, %v1356_v42 }
0x10a7   :  { %3233 = vmatmul.mubr.msk.f32.vlgmr.msra.gmra.mrb[22].mxu0 %vm478_vm2, %v1358_v41 }
0x10a8   :  { %3409 = vmatpush3.bf16.msra.mxu0 %v4116_v27  ;;  %3254 = vmatprep.mubr.f32.mxu0 %v3771_v26 }
0x10a9   :  { %3411 = vmatprep.subr.bf16.mxu0 %v4133_v43  ;;  %v4152_v15 = vpop.permute.xlu1 %1762 }
0x10ac   :  { %3413 = vmatpush3.bf16.msra.mxu0 %v4133_v43 }
0x10ad   :  { %3423 = vmatprep.subr.bf16.mxu0 %v4116_v27 }
0x10af   :  { %3255 = vmatmul.mubr.f32.vlgmr.msra.gmra.mrb[24].mxu0 %v3771_v26 }
0x10b0   :  { %3425 = vmatpush3.bf16.msra.mxu0 %v4116_v27 }
0x10b1   :  { %3427 = vmatprep.subr.bf16.mxu0 %v4133_v43 }
0x10b4   :  { %3429 = vmatpush3.bf16.msra.mxu0 %v4133_v43 }
0x10b5   :  { %3439 = vmatprep.subr.bf16.mxu0 %v4116_v27 }
0x117a   :  { %v3234_v7 = vpop.f32.mrb[22].mxu0 }
0x117b   :  { %v1461_v9 = vadd.f32 %v3234_v7, %v3954_v60  ;;  %v1437_v13 = vpop.f32.mrb[23].mxu0  ;;  %v1447_v22 = vadd.f32 %v3234_v7, %v1366_v21 }
0x117c   :  { %v1460_v14 = vadd.f32 %v1437_v13, %v3954_v60  ;;  %v1446_v24 = vadd.f32 %v1437_v13, %v1365_v23 }
0x117d   :  { %1466 = vrot.lane.b32.xlu1 %v1461_v9, %s3770_s7  ;;  %v2933_v25 = vmul.f32 -1.442695, %v1447_v22 }
0x117e   :  { %1464 = vrot.lane.b32.xlu0 %v1460_v14, %s3770_s7  ;;  %v2932_v44 = vmul.f32 -1.442695, %v1446_v24 }
0x117f   :  { %3551 = vpow2.f32 %v2933_v25 }
0x1180   :  { %3553 = vpow2.f32 %v2932_v44 }
0x1182   :  { %v3256_v26 = vpop.f32.mrb[24].mxu0 }
0x1183   :  { %v1734_v16 = vpop.f32.mrb[25].mxu0  ;;  %v1766_v17 = vadd.f32 %v3256_v26, %v4152_v15  ;;  %v1744_v46 = vadd.f32 %v3256_v26, %v1667_v45 }
0x1184   :  { %v1765_v18 = vadd.f32 %v4152_v15, %v1734_v16  ;;  %v1743_v48 = vadd.f32 %v1734_v16, %v1666_v47 }
0x1185   :  { %1771 = vrot.lane.b32.xlu1 %v1766_v17, %s3770_s7  ;;  %v2940_v49 = vmul.f32 -1.442695, %v1744_v46 }
0x1186   :  { %1769 = vrot.lane.b32.xlu0 %v1765_v18, %s3770_s7  ;;  %v2939_v50 = vmul.f32 -1.442695, %v1743_v48 }
0x1187   :  { %3555 = vpow2.f32 %v2940_v49 }
0x1188   :  { %3557 = vpow2.f32 %v2939_v50 }
0x1189   :  { %v3552_v51 = vpop.eup %3551 }
0x118a   :  { %v3554_v52 = vpop.eup %3553  ;;  %v1455_v53 = vadd.f32 1.0, %v3552_v51 }
0x118b   :  { %v1454_v19 = vadd.f32 1.0, %v3554_v52 }
0x118c   :  { %3559 = vrcp.f32 %v1455_v53  ;;  %v1815_v53 = vld [vmem:[#allocation2 + $0xe8] sm:$0xff] }
0x118d   :  { %3561 = vrcp.f32 %v1454_v19 }
0x1191   :  { %v3556_v20 = vpop.eup %3555 }
0x1192   :  { %v3558_v54 = vpop.eup %3557  ;;  %v1752_v6 = vadd.f32 1.0, %v3556_v20  ;;  %v1814_v20 = vld [vmem:[#allocation2 + $0xe0] sm:$0xff] }
0x1193   :  { %v1751_v55 = vadd.f32 1.0, %v3558_v54 }
0x1194   :  { %3563 = vrcp.f32 %v1752_v6 }
0x1195   :  { %3565 = vrcp.f32 %v1751_v55 }
0x1196   :  { %v3560_v11 = vpop.eup %3559 }
0x1197   :  { %v3562_v57 = vpop.eup %3561  ;;  %v1485_v35 = vsub.f32 1.0, %v3560_v11  ;;  %v1497_v40 = vmul.f32 %v3560_v11, %v4120_v36 }
0x1198   :  { %v1484_v39 = vsub.f32 1.0, %v3562_v57  ;;  %v1496_v7 = vmul.f32 %v3562_v57, %v4122_v37 }
0x119e   :  { %v3564_v62 = vpop.eup %3563 }
0x119f   :  { %v3566_v0 = vpop.eup %3565  ;;  %v1790_v26 = vsub.f32 1.0, %v3564_v62  ;;  %v1802_v18 = vmul.f32 0.0, %v3564_v62 }
0x11a0   :  { %v1789_v17 = vsub.f32 1.0, %v3566_v0  ;;  %v1801_v22 = vmul.f32 0.0, %v3566_v0 }
0x11ef   :  { %v1467_v56 = vpop.permute.xlu1 %1466 }
0x11f0   :  { %v1471_v58 = vmul.f32 %v3560_v11, %v1467_v56  ;;  %v1465_v59 = vpop.permute.xlu0 %1464 }
0x11f1   :  { %v1470_v61 = vmul.f32 %v3562_v57, %v1465_v59 }
0x11f2   :  { %1476 = vrot.lane.b32.xlu1 %v1471_v58, %s3770_s7 }
0x11f3   :  { %1474 = vrot.lane.b32.xlu0 %v1470_v61, %s3770_s7 }
0x11f7   :  { %v1772_v63 = vpop.permute.xlu1 %1771 }
0x11f8   :  { %v1776_v1 = vmul.f32 %v3564_v62, %v1772_v63  ;;  %v1770_v2 = vpop.permute.xlu0 %1769 }
0x11f9   :  { %v1775_v3 = vmul.f32 %v3566_v0, %v1770_v2 }
0x11fa   :  { %1781 = vrot.lane.b32.xlu1 %v1776_v1, %s3770_s7 }
0x11fb   :  { %1779 = vrot.lane.b32.xlu0 %v1775_v3, %s3770_s7 }
0x1264   :  { %v1477_v4 = vpop.permute.xlu1 %1476 }
0x1265   :  { %v1481_v5 = vadd.f32 %v1477_v4, %v1366_v21  ;;  %v1475_v8 = vpop.permute.xlu0 %1474 }
0x1266   :  { %v1480_v10 = vadd.f32 %v1475_v8, %v1365_v23 }
0x1267   :  { %3567 = vtanh.f32 %v1481_v5 }
0x1268   :  { %3569 = vtanh.f32 %v1480_v10 }
0x126c   :  { %v1782_v12 = vpop.permute.xlu1 %1781 }
0x126d   :  { %v1786_v28 = vadd.f32 %v1782_v12, %v1667_v45  ;;  %v1780_v29 = vpop.permute.xlu0 %1779 }
0x126e   :  { %v1785_v30 = vadd.f32 %v1780_v29, %v1666_v47 }
0x126f   :  { %3571 = vtanh.f32 %v1786_v28 }
0x1270   :  { %3573 = vtanh.f32 %v1785_v30 }
0x1271   :  { %v3568_v31 = vpop.eup %3567 }
0x1272   :  { %v3570_v32 = vpop.eup %3569  ;;  %1490 = vrot.lane.b32.xlu1 %v3568_v31, %s3772_s10 }
0x1273   :  { %1488 = vrot.lane.b32.xlu0 %v3570_v32, %s3772_s10 }
0x1279   :  { %v3572_v33 = vpop.eup %3571 }
0x127a   :  { %v3574_v34 = vpop.eup %3573  ;;  %1795 = vrot.lane.b32.xlu1 %v3572_v33, %s3772_s10 }
0x127b   :  { %1793 = vrot.lane.b32.xlu0 %v3574_v34, %s3772_s10 }
0x12e4   :  { %v1491_v38 = vpop.permute.xlu1 %1490 }
0x12e5   :  { %v1495_v41 = vmul.f32 %v1491_v38, %v1485_v35  ;;  %v1489_v42 = vpop.permute.xlu0 %1488 }
0x12e6   :  { %v1494_v9 = vmul.f32 %v1489_v42, %v1484_v39 }
0x12e7   :  { %v4168_v13 = vadd.f32 %v1497_v40, %v1495_v41 }
0x12e8   :  { %v4170_v14 = vadd.f32 %v1496_v7, %v1494_v9 }
0x12e9   :  { %1504 = vrot.lane.b32.xlu1 %v4168_v13, %s3772_s10 }
0x12ea   :  { %1502 = vrot.lane.b32.xlu0 %v4170_v14, %s3772_s10 }
0x12ec   :  { %v1796_v16 = vpop.permute.xlu1 %1795 }
0x12ed   :  { %v1800_v36 = vmul.f32 %v1796_v16, %v1790_v26  ;;  %v1794_v21 = vpop.permute.xlu0 %1793 }
0x12ee   :  { %v1799_v23 = vmul.f32 %v1794_v21, %v1789_v17 }
0x12ef   :  { %v4176_v37 = vadd.f32 %v1802_v18, %v1800_v36  ;;  %v1964_v36 = vld [vmem:[#allocation2 + $0xd8] sm:$0xff] }
0x12f0   :  { %v4178_v24 = vadd.f32 %v1801_v22, %v1799_v23  ;;  %v1963_v22 = vld [vmem:[#allocation2 + $0xd0] sm:$0xff] }
0x12f1   :  { %1820 = vrot.lane.b32.xlu1 %v4176_v37, %s3772_s10 }
0x12f2   :  { %1818 = vrot.lane.b32.xlu0 %v4178_v24, %s3772_s10 }
0x135b   :  { %v1505_v25 = vpop.permute.xlu1 %1504 }
0x135c   :  { %1510 = vst.msk [vmem:[#allocation3 + $0x68] sm:$0xff] %vm478_vm2, %v1505_v25  ;;  %v1503_v44 = vpop.permute.xlu0 %1502 }
0x135d   :  { %1509 = vst.msk [vmem:[#allocation3 + $0x60] sm:$0xff] %vm478_vm2, %v1503_v44  ;;  %3243 = vmatprep.mubr.msk.f32.mxu1 %vm478_vm2, %v1503_v44 }
0x135e   :  { %3244 = vmatmul.mubr.msk.f32.vlgmr.msra.gmra.mrb[22].mxu1 %vm478_vm2, %v1505_v25 }
0x135f   :  { %3417 = vmatpush3.bf16.msra.mxu1 %v4116_v27 }
0x1360   :  { %3419 = vmatprep.subr.bf16.mxu1 %v4133_v43 }
0x1363   :  { %3421 = vmatpush3.bf16.msra.mxu1 %v4133_v43  ;;  %v1821_v46 = vpop.permute.xlu1 %1820  ;;  %v1956_v38 = vld [vmem:[#allocation3 + $0x68] sm:$0xff] }
0x1364   :  { %v1819_v45 = vpop.permute.xlu0 %1818  ;;  %3431 = vmatprep.subr.bf16.mxu1 %v4116_v27  ;;  %v1955_v41 = vld [vmem:[#allocation3 + $0x60] sm:$0xff] }
0x1365   :  { %3265 = vmatprep.mubr.msk.f32.mxu1 %vm478_vm2, %v1819_v45 }
0x1366   :  { %3266 = vmatmul.mubr.msk.f32.vlgmr.msra.gmra.mrb[24].mxu1 %vm478_vm2, %v1821_v46 }
0x1367   :  { %3433 = vmatpush3.bf16.msra.mxu1 %v4116_v27 }
0x1368   :  { %3435 = vmatprep.subr.bf16.mxu1 %v4133_v43 }
0x136b   :  { %3437 = vmatpush3.bf16.msra.mxu1 %v4133_v43 }
0x136c   :  { %3447 = vmatprep.subr.bf16.mxu1 %v4116_v27 }
0x1431   :  { %v4198_v47 = vpop.f32.mrb[22].mxu1 }
0x1432   :  { %v4200_v48 = vpop.f32.mrb[23].mxu1 }
0x1439   :  { %v3267_v49 = vpop.f32.mrb[24].mxu1 }
0x143a   :  { %v1916_v50 = vadd.f32 %v3267_v49, %v4152_v15  ;;  %v1892_v51 = vpop.f32.mrb[25].mxu1  ;;  %v1902_v19 = vadd.f32 %v3267_v49, %v1815_v53 }
0x143b   :  { %v1915_v52 = vadd.f32 %v1892_v51, %v4152_v15  ;;  %v1901_v54 = vadd.f32 %v1892_v51, %v1814_v20 }
0x143c   :  { %1921 = vrot.lane.b32.xlu1 %v1916_v50, %s3770_s7  ;;  %v2945_v6 = vmul.f32 -1.442695, %v1902_v19 }
0x143d   :  { %1919 = vrot.lane.b32.xlu0 %v1915_v52, %s3770_s7  ;;  %v2944_v55 = vmul.f32 -1.442695, %v1901_v54 }
0x143e   :  { %3575 = vpow2.f32 %v2945_v6 }
0x143f   :  { %3577 = vpow2.f32 %v2944_v55 }
0x1448   :  { %v3576_v11 = vpop.eup %3575 }
0x1449   :  { %v3578_v56 = vpop.eup %3577  ;;  %v1910_v57 = vadd.f32 1.0, %v3576_v11 }
0x144a   :  { %v1909_v58 = vadd.f32 1.0, %v3578_v56 }
0x144b   :  { %3579 = vrcp.f32 %v1910_v57 }
0x144c   :  { %3581 = vrcp.f32 %v1909_v58 }
0x1455   :  { %v3580_v59 = vpop.eup %3579 }
0x1456   :  { %v3582_v62 = vpop.eup %3581  ;;  %v1940_v12 = vsub.f32 1.0, %v3580_v59  ;;  %v1952_v30 = vmul.f32 %v3580_v59, %v4176_v37 }
0x1457   :  { %v1939_v29 = vsub.f32 1.0, %v3582_v62  ;;  %v1951_v33 = vmul.f32 %v3582_v62, %v4178_v24 }
0x14ae   :  { %v1922_v61 = vpop.permute.xlu1 %1921 }
0x14af   :  { %v1926_v63 = vmul.f32 %v3580_v59, %v1922_v61  ;;  %v1920_v0 = vpop.permute.xlu0 %1919 }
0x14b0   :  { %v1925_v1 = vmul.f32 %v3582_v62, %v1920_v0 }
0x14b1   :  { %1931 = vrot.lane.b32.xlu1 %v1926_v63, %s3770_s7 }
0x14b2   :  { %1929 = vrot.lane.b32.xlu0 %v1925_v1, %s3770_s7 }
0x1523   :  { %v1932_v2 = vpop.permute.xlu1 %1931 }
0x1524   :  { %v1936_v3 = vadd.f32 %v1932_v2, %v1815_v53  ;;  %v1930_v4 = vpop.permute.xlu0 %1929 }
0x1525   :  { %v1935_v5 = vadd.f32 %v1930_v4, %v1814_v20 }
0x1526   :  { %3583 = vtanh.f32 %v1936_v3 }
0x1527   :  { %3585 = vtanh.f32 %v1935_v5  ;;  %v2105_v5 = vld [vmem:[#allocation3 + $0x58] sm:$0xff] }
0x1530   :  { %v3584_v8 = vpop.eup %3583 }
0x1531   :  { %v3586_v10 = vpop.eup %3585  ;;  %1945 = vrot.lane.b32.xlu1 %v3584_v8, %s3772_s10 }
0x1532   :  { %1943 = vrot.lane.b32.xlu0 %v3586_v10, %s3772_s10 }
0x15a3   :  { %v1946_v28 = vpop.permute.xlu1 %1945 }
0x15a4   :  { %v1950_v31 = vmul.f32 %v1946_v28, %v1940_v12  ;;  %v1944_v32 = vpop.permute.xlu0 %1943  ;;  %v2104_v12 = vld [vmem:[#allocation3 + $0x50] sm:$0xff] }
0x15a5   :  { %v1949_v34 = vmul.f32 %v1944_v32, %v1939_v29 }
0x15a6   :  { %v1954_v35 = vadd.f32 %v1952_v30, %v1950_v31 }
0x15a7   :  { %v1953_v39 = vadd.f32 %v1951_v33, %v1949_v34 }
0x15a8   :  { %v1958_v40 = vsel %vm478_vm2, %v1956_v38, %v1954_v35  ;;  %1969 = vrot.lane.b32.xlu1 %v1954_v35, %s3772_s10 }
0x15a9   :  { %1961 = vst.msk [vmem:[#allocation10 + $0x68] sm:$0xff] %vm1810_vm3, %v1958_v40  ;;  %v1957_v42 = vsel %vm478_vm2, %v1955_v41, %v1953_v39  ;;  %1967 = vrot.lane.b32.xlu0 %v1953_v39, %s3772_s10 }
0x15aa   :  { %1960 = vst.msk [vmem:[#allocation10 + $0x60] sm:$0xff] %vm1810_vm3, %v1957_v42 }
0x161a   :  { %v1970_v9 = vpop.permute.xlu1 %1969 }
0x161b   :  { %v1968_v7 = vpop.permute.xlu0 %1967 }
0x161c   :  { %3276 = vmatprep.mubr.msk.f32.mxu0 %vm478_vm2, %v1968_v7 }
0x161d   :  { %3277 = vmatmul.mubr.msk.f32.vlgmr.msra.gmra.mrb[26].mxu0 %vm478_vm2, %v1970_v9 }
0x161e   :  { %3441 = vmatpush3.bf16.msra.mxu0 %v4116_v27 }
0x161f   :  { %3443 = vmatprep.subr.bf16.mxu0 %v4133_v43 }
0x1622   :  { %3445 = vmatpush3.bf16.msra.mxu0 %v4133_v43 }
0x1623   :  { %3455 = vmatprep.subr.bf16.mxu0 %v4116_v27 }
0x16f0   :  { %v3278_v26 = vpop.f32.mrb[26].mxu0 }
0x16f1   :  { %v2065_v16 = vadd.f32 %v3278_v26, %v4152_v15  ;;  %v2041_v17 = vpop.f32.mrb[27].mxu0  ;;  %v2051_v21 = vadd.f32 %v3278_v26, %v1964_v36 }
0x16f2   :  { %v2064_v18 = vadd.f32 %v2041_v17, %v4152_v15  ;;  %v2050_v23 = vadd.f32 %v2041_v17, %v1963_v22 }
0x16f3   :  { %2070 = vrot.lane.b32.xlu1 %v2065_v16, %s3770_s7  ;;  %v2949_v25 = vmul.f32 -1.442695, %v2051_v21 }
0x16f4   :  { %2068 = vrot.lane.b32.xlu0 %v2064_v18, %s3770_s7  ;;  %v2948_v44 = vmul.f32 -1.442695, %v2050_v23 }
0x16f5   :  { %3587 = vpow2.f32 %v2949_v25 }
0x16f6   :  { %3589 = vpow2.f32 %v2948_v44 }
0x16ff   :  { %v3588_v45 = vpop.eup %3587 }
0x1700   :  { %v3590_v46 = vpop.eup %3589  ;;  %v2059_v49 = vadd.f32 1.0, %v3588_v45 }
0x1701   :  { %v2058_v50 = vadd.f32 1.0, %v3590_v46 }
0x1702   :  { %3591 = vrcp.f32 %v2059_v49 }
0x1703   :  { %3593 = vrcp.f32 %v2058_v50 }
0x170c   :  { %v3592_v51 = vpop.eup %3591 }
0x170d   :  { %v3594_v53 = vpop.eup %3593  ;;  %v2089_v59 = vsub.f32 1.0, %v3592_v51  ;;  %v2101_v63 = vmul.f32 %v3592_v51, %v1954_v35  ;;  %v2113_v35 = vld [vmem:[#allocation2 + $0xc8] sm:$0xff] }
0x170e   :  { %v2088_v62 = vsub.f32 1.0, %v3594_v53  ;;  %v2100_v2 = vmul.f32 %v3594_v53, %v1953_v39  ;;  %v2112_v39 = vld [vmem:[#allocation2 + $0xc0] sm:$0xff] }
0x1765   :  { %v2071_v52 = vpop.permute.xlu1 %2070 }
0x1766   :  { %v2075_v19 = vmul.f32 %v3592_v51, %v2071_v52  ;;  %v2069_v20 = vpop.permute.xlu0 %2068 }
0x1767   :  { %v2074_v54 = vmul.f32 %v3594_v53, %v2069_v20 }
0x1768   :  { %2080 = vrot.lane.b32.xlu1 %v2075_v19, %s3770_s7 }
0x1769   :  { %2078 = vrot.lane.b32.xlu0 %v2074_v54, %s3770_s7 }
0x17da   :  { %v2081_v6 = vpop.permute.xlu1 %2080 }
0x17db   :  { %v2085_v55 = vadd.f32 %v2081_v6, %v1964_v36  ;;  %v2079_v11 = vpop.permute.xlu0 %2078 }
0x17dc   :  { %v2084_v56 = vadd.f32 %v2079_v11, %v1963_v22 }
0x17dd   :  { %3595 = vtanh.f32 %v2085_v55 }
0x17de   :  { %3597 = vtanh.f32 %v2084_v56  ;;  %v2254_v56 = vld [vmem:[#allocation3 + $0x48] sm:$0xff] }
0x17e7   :  { %v3596_v57 = vpop.eup %3595 }
0x17e8   :  { %v3598_v58 = vpop.eup %3597  ;;  %2094 = vrot.lane.b32.xlu1 %v3596_v57, %s3772_s10 }
0x17e9   :  { %2092 = vrot.lane.b32.xlu0 %v3598_v58, %s3772_s10 }
0x185a   :  { %v2095_v61 = vpop.permute.xlu1 %2094 }
0x185b   :  { %v2099_v0 = vmul.f32 %v2095_v61, %v2089_v59  ;;  %v2093_v1 = vpop.permute.xlu0 %2092  ;;  %v2253_v59 = vld [vmem:[#allocation3 + $0x40] sm:$0xff] }
0x185c   :  { %v2098_v3 = vmul.f32 %v2093_v1, %v2088_v62 }
0x185d   :  { %v2103_v4 = vadd.f32 %v2101_v63, %v2099_v0 }
0x185e   :  { %v2102_v8 = vadd.f32 %v2100_v2, %v2098_v3 }
0x185f   :  { %v2107_v10 = vsel %vm478_vm2, %v2105_v5, %v2103_v4  ;;  %2118 = vrot.lane.b32.xlu1 %v2103_v4, %s3772_s10 }
0x1860   :  { %2110 = vst.msk [vmem:[#allocation10 + $0x58] sm:$0xff] %vm1810_vm3, %v2107_v10  ;;  %v2106_v28 = vsel %vm478_vm2, %v2104_v12, %v2102_v8  ;;  %2116 = vrot.lane.b32.xlu0 %v2102_v8, %s3772_s10 }
0x1861   :  { %2109 = vst.msk [vmem:[#allocation10 + $0x50] sm:$0xff] %vm1810_vm3, %v2106_v28 }
0x18d1   :  { %v2119_v30 = vpop.permute.xlu1 %2118 }
0x18d2   :  { %v2117_v29 = vpop.permute.xlu0 %2116 }
0x18d3   :  { %3287 = vmatprep.mubr.msk.f32.mxu1 %vm478_vm2, %v2117_v29 }
0x18d4   :  { %3288 = vmatmul.mubr.msk.f32.vlgmr.msra.gmra.mrb[26].mxu1 %vm478_vm2, %v2119_v30 }
0x18d5   :  { %3449 = vmatpush3.bf16.msra.mxu1 %v4116_v27 }
0x18d6   :  { %3451 = vmatprep.subr.bf16.mxu1 %v4133_v43 }
0x18d9   :  { %3453 = vmatpush3.bf16.msra.mxu1 %v4133_v43 }
0x18da   :  { %3463 = vmatprep.subr.bf16.mxu1 %v4116_v27 }
0x19a7   :  { %v3289_v31 = vpop.f32.mrb[26].mxu1 }
0x19a8   :  { %v2214_v32 = vadd.f32 %v3289_v31, %v4152_v15  ;;  %v2190_v33 = vpop.f32.mrb[27].mxu1  ;;  %v2200_v38 = vadd.f32 %v3289_v31, %v2113_v35 }
0x19a9   :  { %v2213_v34 = vadd.f32 %v2190_v33, %v4152_v15  ;;  %v2199_v40 = vadd.f32 %v2190_v33, %v2112_v39 }
0x19aa   :  { %2219 = vrot.lane.b32.xlu1 %v2214_v32, %s3770_s7  ;;  %v2953_v41 = vmul.f32 -1.442695, %v2200_v38 }
0x19ab   :  { %2217 = vrot.lane.b32.xlu0 %v2213_v34, %s3770_s7  ;;  %v2952_v42 = vmul.f32 -1.442695, %v2199_v40 }
0x19ac   :  { %3599 = vpow2.f32 %v2953_v41 }
0x19ad   :  { %3601 = vpow2.f32 %v2952_v42 }
0x19b6   :  { %v3600_v7 = vpop.eup %3599 }
0x19b7   :  { %v3602_v9 = vpop.eup %3601  ;;  %v2208_v26 = vadd.f32 1.0, %v3600_v7 }
0x19b8   :  { %v2207_v16 = vadd.f32 1.0, %v3602_v9 }
0x19b9   :  { %3603 = vrcp.f32 %v2208_v26 }
0x19ba   :  { %3605 = vrcp.f32 %v2207_v16 }
0x19c3   :  { %v3604_v17 = vpop.eup %3603 }
0x19c4   :  { %v3606_v36 = vpop.eup %3605  ;;  %v2238_v51 = vsub.f32 1.0, %v3604_v17  ;;  %v2250_v19 = vmul.f32 %v3604_v17, %v2103_v4  ;;  %v2262_v4 = vld [vmem:[#allocation2 + $0xb8] sm:$0xff] }
0x19c5   :  { %v2237_v53 = vsub.f32 1.0, %v3606_v36  ;;  %v2249_v6 = vmul.f32 %v3606_v36, %v2102_v8  ;;  %v2261_v8 = vld [vmem:[#allocation2 + $0xb0] sm:$0xff] }
0x1a1c   :  { %v2220_v18 = vpop.permute.xlu1 %2219 }
0x1a1d   :  { %v2224_v21 = vmul.f32 %v3604_v17, %v2220_v18  ;;  %v2218_v22 = vpop.permute.xlu0 %2217 }
0x1a1e   :  { %v2223_v23 = vmul.f32 %v3606_v36, %v2218_v22 }
0x1a1f   :  { %2229 = vrot.lane.b32.xlu1 %v2224_v21, %s3770_s7 }
0x1a20   :  { %2227 = vrot.lane.b32.xlu0 %v2223_v23, %s3770_s7 }
0x1a91   :  { %v2230_v25 = vpop.permute.xlu1 %2229 }
0x1a92   :  { %v2234_v44 = vadd.f32 %v2230_v25, %v2113_v35  ;;  %v2228_v45 = vpop.permute.xlu0 %2227 }
0x1a93   :  { %v2233_v46 = vadd.f32 %v2228_v45, %v2112_v39 }
0x1a94   :  { %3607 = vtanh.f32 %v2234_v44 }
0x1a95   :  { %3609 = vtanh.f32 %v2233_v46  ;;  %v2403_v46 = vld [vmem:[#allocation3 + $0x38] sm:$0xff] }
0x1a9e   :  { %v3608_v49 = vpop.eup %3607 }
0x1a9f   :  { %v3610_v50 = vpop.eup %3609  ;;  %2243 = vrot.lane.b32.xlu1 %v3608_v49, %s3772_s10 }
0x1aa0   :  { %2241 = vrot.lane.b32.xlu0 %v3610_v50, %s3772_s10 }
0x1b11   :  { %v2244_v52 = vpop.permute.xlu1 %2243 }
0x1b12   :  { %v2248_v20 = vmul.f32 %v2244_v52, %v2238_v51  ;;  %v2242_v54 = vpop.permute.xlu0 %2241  ;;  %v2402_v51 = vld [vmem:[#allocation3 + $0x30] sm:$0xff] }
0x1b13   :  { %v2247_v55 = vmul.f32 %v2242_v54, %v2237_v53 }
0x1b14   :  { %v2252_v11 = vadd.f32 %v2250_v19, %v2248_v20 }
0x1b15   :  { %v2251_v57 = vadd.f32 %v2249_v6, %v2247_v55 }
0x1b16   :  { %v2256_v58 = vsel %vm478_vm2, %v2254_v56, %v2252_v11  ;;  %2267 = vrot.lane.b32.xlu1 %v2252_v11, %s3772_s10 }
0x1b17   :  { %2259 = vst.msk [vmem:[#allocation10 + $0x48] sm:$0xff] %vm1810_vm3, %v2256_v58  ;;  %v2255_v61 = vsel %vm478_vm2, %v2253_v59, %v2251_v57  ;;  %2265 = vrot.lane.b32.xlu0 %v2251_v57, %s3772_s10 }
0x1b18   :  { %2258 = vst.msk [vmem:[#allocation10 + $0x40] sm:$0xff] %vm1810_vm3, %v2255_v61 }
0x1b88   :  { %v2268_v63 = vpop.permute.xlu1 %2267 }
0x1b89   :  { %v2266_v62 = vpop.permute.xlu0 %2265 }
0x1b8a   :  { %3298 = vmatprep.mubr.msk.f32.mxu0 %vm478_vm2, %v2266_v62 }
0x1b8b   :  { %3299 = vmatmul.mubr.msk.f32.vlgmr.msra.gmra.mrb[28].mxu0 %vm478_vm2, %v2268_v63 }
0x1b8c   :  { %3457 = vmatpush3.bf16.msra.mxu0 %v4116_v27 }
0x1b8d   :  { %3459 = vmatprep.subr.bf16.mxu0 %v4133_v43 }
0x1b90   :  { %3461 = vmatpush3.bf16.msra.mxu0 %v4133_v43 }
0x1c5e   :  { %v3300_v0 = vpop.f32.mrb[28].mxu0 }
0x1c5f   :  { %v2363_v1 = vadd.f32 %v3300_v0, %v4152_v15  ;;  %v2339_v2 = vpop.f32.mrb[29].mxu0  ;;  %v2349_v5 = vadd.f32 %v3300_v0, %v2262_v4 }
0x1c60   :  { %v2362_v3 = vadd.f32 %v2339_v2, %v4152_v15  ;;  %v2348_v10 = vadd.f32 %v2339_v2, %v2261_v8 }
0x1c61   :  { %2368 = vrot.lane.b32.xlu1 %v2363_v1, %s3770_s7  ;;  %v2957_v12 = vmul.f32 -1.442695, %v2349_v5 }
0x1c62   :  { %2366 = vrot.lane.b32.xlu0 %v2362_v3, %s3770_s7  ;;  %v2956_v28 = vmul.f32 -1.442695, %v2348_v10 }
0x1c63   :  { %3611 = vpow2.f32 %v2957_v12 }
0x1c64   :  { %3613 = vpow2.f32 %v2956_v28 }
0x1c6d   :  { %v3612_v29 = vpop.eup %3611 }
0x1c6e   :  { %v3614_v30 = vpop.eup %3613  ;;  %v2357_v31 = vadd.f32 1.0, %v3612_v29 }
0x1c6f   :  { %v2356_v32 = vadd.f32 1.0, %v3614_v30 }
0x1c70   :  { %3615 = vrcp.f32 %v2357_v31 }
0x1c71   :  { %3617 = vrcp.f32 %v2356_v32 }
0x1c7a   :  { %v3616_v33 = vpop.eup %3615 }
0x1c7b   :  { %v3618_v35 = vpop.eup %3617  ;;  %v2387_v17 = vsub.f32 1.0, %v3616_v33  ;;  %v2399_v21 = vmul.f32 %v3616_v33, %v2252_v11  ;;  %v2411_v11 = vld [vmem:[#allocation2 + $0xa8] sm:$0xff] }
0x1c7c   :  { %v2386_v36 = vsub.f32 1.0, %v3618_v35  ;;  %v2398_v25 = vmul.f32 %v3618_v35, %v2251_v57  ;;  %v2410_v57 = vld [vmem:[#allocation2 + $0xa0] sm:$0xff] }
0x1cd3   :  { %v2369_v34 = vpop.permute.xlu1 %2368 }
0x1cd4   :  { %v2373_v38 = vmul.f32 %v3616_v33, %v2369_v34  ;;  %v2367_v39 = vpop.permute.xlu0 %2366 }
0x1cd5   :  { %v2372_v40 = vmul.f32 %v3618_v35, %v2367_v39 }
0x1cd6   :  { %2378 = vrot.lane.b32.xlu1 %v2373_v38, %s3770_s7 }
0x1cd7   :  { %2376 = vrot.lane.b32.xlu0 %v2372_v40, %s3770_s7 }
0x1d48   :  { %v2379_v41 = vpop.permute.xlu1 %2378 }
0x1d49   :  { %v2383_v42 = vadd.f32 %v2379_v41, %v2262_v4  ;;  %v2377_v7 = vpop.permute.xlu0 %2376 }
0x1d4a   :  { %v2382_v9 = vadd.f32 %v2377_v7, %v2261_v8 }
0x1d4b   :  { %3619 = vtanh.f32 %v2383_v42  ;;  %v2552_v42 = vld [vmem:[#allocation3 + $0x28] sm:$0xff] }
0x1d4c   :  { %3621 = vtanh.f32 %v2382_v9 }
0x1d55   :  { %v3620_v26 = vpop.eup %3619 }
0x1d56   :  { %v3622_v16 = vpop.eup %3621  ;;  %2392 = vrot.lane.b32.xlu1 %v3620_v26, %s3772_s10  ;;  %v2551_v26 = vld [vmem:[#allocation3 + $0x20] sm:$0xff] }
0x1d57   :  { %2390 = vrot.lane.b32.xlu0 %v3622_v16, %s3772_s10 }
0x1dc8   :  { %v2393_v18 = vpop.permute.xlu1 %2392 }
0x1dc9   :  { %v2397_v22 = vmul.f32 %v2393_v18, %v2387_v17  ;;  %v2391_v23 = vpop.permute.xlu0 %2390 }
0x1dca   :  { %v2396_v44 = vmul.f32 %v2391_v23, %v2386_v36 }
0x1dcb   :  { %v2401_v45 = vadd.f32 %v2399_v21, %v2397_v22 }
0x1dcc   :  { %v2400_v49 = vadd.f32 %v2398_v25, %v2396_v44  ;;  %v2560_v25 = vld [vmem:[#allocation2 + $0x98] sm:$0xff] }
0x1dcd   :  { %v2405_v50 = vsel %vm478_vm2, %v2403_v46, %v2401_v45  ;;  %2416 = vrot.lane.b32.xlu1 %v2401_v45, %s3772_s10 }
0x1dce   :  { %2408 = vst.msk [vmem:[#allocation10 + $0x38] sm:$0xff] %vm1810_vm3, %v2405_v50  ;;  %v2404_v52 = vsel %vm478_vm2, %v2402_v51, %v2400_v49  ;;  %2414 = vrot.lane.b32.xlu0 %v2400_v49, %s3772_s10 }
0x1dcf   :  { %2407 = vst.msk [vmem:[#allocation10 + $0x30] sm:$0xff] %vm1810_vm3, %v2404_v52 }
0x1e3f   :  { %v2417_v19 = vpop.permute.xlu1 %2416 }
0x1e40   :  { %v2415_v53 = vpop.permute.xlu0 %2414 }
0x1e41   :  { %3309 = vmatprep.mubr.msk.f32.mxu1 %vm478_vm2, %v2415_v53 }
0x1e42   :  { %3310 = vmatmul.mubr.msk.f32.vlgmr.msra.gmra.mrb[28].mxu1 %vm478_vm2, %v2417_v19 }
0x1e43   :  { %3465 = vmatpush3.bf16.msra.mxu1 %v4116_v27 }
0x1e44   :  { %3467 = vmatprep.subr.bf16.mxu1 %v4133_v43 }
0x1e47   :  { %3469 = vmatpush3.bf16.msra.mxu1 %v4133_v43 }
0x1f15   :  { %v3311_v20 = vpop.f32.mrb[28].mxu1 }
0x1f16   :  { %v2512_v54 = vadd.f32 %v3311_v20, %v4152_v15  ;;  %v2488_v6 = vpop.f32.mrb[29].mxu1  ;;  %v2498_v56 = vadd.f32 %v3311_v20, %v2411_v11 }
0x1f17   :  { %v2511_v55 = vadd.f32 %v2488_v6, %v4152_v15  ;;  %v2497_v58 = vadd.f32 %v2488_v6, %v2410_v57 }
0x1f18   :  { %2517 = vrot.lane.b32.xlu1 %v2512_v54, %s3770_s7  ;;  %v2961_v59 = vmul.f32 -1.442695, %v2498_v56 }
0x1f19   :  { %2515 = vrot.lane.b32.xlu0 %v2511_v55, %s3770_s7  ;;  %v2960_v27 = vmul.f32 -1.442695, %v2497_v58 }
0x1f1a   :  { %3623 = vpow2.f32 %v2961_v59 }
0x1f1b   :  { %3625 = vpow2.f32 %v2960_v27 }
0x1f24   :  { %v3624_v61 = vpop.eup %3623 }
0x1f25   :  { %v3626_v43 = vpop.eup %3625  ;;  %v2506_v62 = vadd.f32 1.0, %v3624_v61 }
0x1f26   :  { %v2505_v63 = vadd.f32 1.0, %v3626_v43 }
0x1f27   :  { %3627 = vrcp.f32 %v2506_v62 }
0x1f28   :  { %3629 = vrcp.f32 %v2505_v63 }
0x1f31   :  { %v3628_v0 = vpop.eup %3627 }
0x1f32   :  { %v3630_v2 = vpop.eup %3629  ;;  %v2536_v31 = vsub.f32 1.0, %v3628_v0  ;;  %v2548_v34 = vmul.f32 %v3628_v0, %v2401_v45  ;;  %v2559_v45 = vld [vmem:[#allocation2 + $0x90] sm:$0xff] }
0x1f33   :  { %v2535_v33 = vsub.f32 1.0, %v3630_v2  ;;  %v2547_v39 = vmul.f32 %v3630_v2, %v2400_v49 }
0x1f8a   :  { %v2518_v1 = vpop.permute.xlu1 %2517 }
0x1f8b   :  { %v2522_v3 = vmul.f32 %v3628_v0, %v2518_v1  ;;  %v2516_v4 = vpop.permute.xlu0 %2515 }
0x1f8c   :  { %v2521_v5 = vmul.f32 %v3630_v2, %v2516_v4 }
0x1f8d   :  { %2527 = vrot.lane.b32.xlu1 %v2522_v3, %s3770_s7 }
0x1f8e   :  { %2525 = vrot.lane.b32.xlu0 %v2521_v5, %s3770_s7 }
0x1fff   :  { %v2528_v8 = vpop.permute.xlu1 %2527 }
0x2000   :  { %v2532_v10 = vadd.f32 %v2528_v8, %v2411_v11  ;;  %v2526_v12 = vpop.permute.xlu0 %2525 }
0x2001   :  { %v2531_v28 = vadd.f32 %v2526_v12, %v2410_v57 }
0x2002   :  { %3631 = vtanh.f32 %v2532_v10  ;;  %v2701_v10 = vld [vmem:[#allocation3 + $0x18] sm:$0xff] }
0x2003   :  { %3633 = vtanh.f32 %v2531_v28 }
0x200c   :  { %v3632_v29 = vpop.eup %3631 }
0x200d   :  { %v3634_v30 = vpop.eup %3633  ;;  %2541 = vrot.lane.b32.xlu1 %v3632_v29, %s3772_s10  ;;  %v2700_v29 = vld [vmem:[#allocation3 + $0x10] sm:$0xff] }
0x200e   :  { %2539 = vrot.lane.b32.xlu0 %v3634_v30, %s3772_s10 }
0x207f   :  { %v2542_v32 = vpop.permute.xlu1 %2541 }
0x2080   :  { %v2546_v35 = vmul.f32 %v2542_v32, %v2536_v31  ;;  %v2540_v38 = vpop.permute.xlu0 %2539  ;;  %v1608_v31 = vadd.f32 %v4198_v47, %v3954_v60  ;;  %v1607_v32 = vadd.f32 %v4200_v48, %v3954_v60 }
0x2081   :  { %v2545_v40 = vmul.f32 %v2540_v38, %v2535_v33  ;;  %v1513_v33 = vld [vmem:[#allocation2 + $0x78] sm:$0xff] }
0x2082   :  { %v2550_v41 = vadd.f32 %v2548_v34, %v2546_v35  ;;  %v1594_v34 = vadd.f32 %v4198_v47, %v1513_v33  ;;  %v1512_v35 = vld [vmem:[#allocation2 + $0x70] sm:$0xff] }
0x2083   :  { %v2549_v7 = vadd.f32 %v2547_v39, %v2545_v40  ;;  %v1593_v38 = vadd.f32 %v4200_v48, %v1512_v35 }
0x2084   :  { %v2554_v9 = vsel %vm478_vm2, %v2552_v42, %v2550_v41  ;;  %2565 = vrot.lane.b32.xlu1 %v2550_v41, %s3772_s10  ;;  %v2937_v39 = vmul.f32 -1.442695, %v1594_v34 }
0x2085   :  { %2557 = vst.msk [vmem:[#allocation10 + $0x28] sm:$0xff] %vm1810_vm3, %v2554_v9  ;;  %v2553_v16 = vsel %vm478_vm2, %v2551_v26, %v2549_v7  ;;  %2563 = vrot.lane.b32.xlu0 %v2549_v7, %s3772_s10  ;;  %v2936_v40 = vmul.f32 -1.442695, %v1593_v38 }
0x2086   :  { %2556 = vst.msk [vmem:[#allocation10 + $0x20] sm:$0xff] %vm1810_vm3, %v2553_v16 }
0x20f6   :  { %v2566_v18 = vpop.permute.xlu1 %2565 }
0x20f7   :  { %v2564_v17 = vpop.permute.xlu0 %2563 }
0x20f8   :  { %3320 = vmatprep.mubr.msk.f32.mxu0 %vm478_vm2, %v2564_v17 }
0x20f9   :  { %3321 = vmatmul.mubr.msk.f32.vlgmr.msra.gmra.mrb[30].mxu0 %vm478_vm2, %v2566_v18 }
0x21cc   :  { %v3322_v36 = vpop.f32.mrb[30].mxu0 }
0x21cd   :  { %v2661_v21 = vadd.f32 %v3322_v36, %v4152_v15  ;;  %v2637_v22 = vpop.f32.mrb[31].mxu0  ;;  %v2647_v44 = vadd.f32 %v3322_v36, %v2560_v25 }
0x21ce   :  { %v2660_v23 = vadd.f32 %v2637_v22, %v4152_v15  ;;  %v2646_v46 = vadd.f32 %v2637_v22, %v2559_v45 }
0x21cf   :  { %2666 = vrot.lane.b32.xlu1 %v2661_v21, %s3770_s7  ;;  %v2965_v49 = vmul.f32 -1.442695, %v2647_v44  ;;  %v2708_v44 = vld [vmem:[#allocation2 + $0x88] sm:$0xff] }
0x21d0   :  { %2664 = vrot.lane.b32.xlu0 %v2660_v23, %s3770_s7  ;;  %v2964_v50 = vmul.f32 -1.442695, %v2646_v46  ;;  %v2707_v46 = vld [vmem:[#allocation2 + $0x80] sm:$0xff] }
0x21d1   :  { %3635 = vpow2.f32 %v2965_v49 }
0x21d2   :  { %3637 = vpow2.f32 %v2964_v50 }
0x21db   :  { %v3636_v51 = vpop.eup %3635 }
0x21dc   :  { %v3638_v52 = vpop.eup %3637  ;;  %v2655_v53 = vadd.f32 1.0, %v3636_v51 }
0x21dd   :  { %v2654_v19 = vadd.f32 1.0, %v3638_v52 }
0x21de   :  { %3639 = vrcp.f32 %v2655_v53 }
0x21df   :  { %3641 = vrcp.f32 %v2654_v19 }
0x21e8   :  { %v3640_v20 = vpop.eup %3639 }
0x21e9   :  { %v3642_v6 = vpop.eup %3641  ;;  %v2685_v62 = vsub.f32 1.0, %v3640_v20  ;;  %v2697_v1 = vmul.f32 %v3640_v20, %v2550_v41 }
0x21ea   :  { %v2684_v0 = vsub.f32 1.0, %v3642_v6  ;;  %v2696_v4 = vmul.f32 %v3642_v6, %v2549_v7 }
0x2241   :  { %v2667_v54 = vpop.permute.xlu1 %2666 }
0x2242   :  { %v2671_v55 = vmul.f32 %v3640_v20, %v2667_v54  ;;  %v2665_v11 = vpop.permute.xlu0 %2664 }
0x2243   :  { %v2670_v56 = vmul.f32 %v3642_v6, %v2665_v11 }
0x2244   :  { %2676 = vrot.lane.b32.xlu1 %v2671_v55, %s3770_s7 }
0x2245   :  { %2674 = vrot.lane.b32.xlu0 %v2670_v56, %s3770_s7 }
0x22b6   :  { %v2677_v57 = vpop.permute.xlu1 %2676 }
0x22b7   :  { %v2681_v58 = vadd.f32 %v2677_v57, %v2560_v25  ;;  %v2675_v59 = vpop.permute.xlu0 %2674 }
0x22b8   :  { %v2680_v27 = vadd.f32 %v2675_v59, %v2559_v45 }
0x22b9   :  { %3643 = vtanh.f32 %v2681_v58 }
0x22ba   :  { %3645 = vtanh.f32 %v2680_v27 }
0x22bb   :  { %3647 = vpow2.f32 %v2937_v39 }
0x22bc   :  { %3649 = vpow2.f32 %v2936_v40 }
0x22c3   :  { %v3644_v61 = vpop.eup %3643 }
0x22c4   :  { %v3646_v43 = vpop.eup %3645  ;;  %2690 = vrot.lane.b32.xlu1 %v3644_v61, %s3772_s10 }
0x22c5   :  { %2688 = vrot.lane.b32.xlu0 %v3646_v43, %s3772_s10  ;;  %v3648_v41 = vpop.eup %3647 }
0x22c6   :  { %v3650_v42 = vpop.eup %3649  ;;  %v1602_v7 = vadd.f32 1.0, %v3648_v41 }
0x22c7   :  { %v1601_v9 = vadd.f32 1.0, %v3650_v42 }
0x22c8   :  { %3651 = vrcp.f32 %v1602_v7 }
0x22c9   :  { %3653 = vrcp.f32 %v1601_v9 }
0x22d2   :  { %v3652_v47 = vpop.eup %3651 }
0x22d3   :  { %v3654_v17 = vpop.eup %3653 }
0x2336   :  { %v2691_v63 = vpop.permute.xlu1 %2690 }
0x2337   :  { %v2695_v2 = vmul.f32 %v2691_v63, %v2685_v62  ;;  %v2689_v3 = vpop.permute.xlu0 %2688 }
0x2338   :  { %v2694_v5 = vmul.f32 %v2689_v3, %v2684_v0 }
0x2339   :  { %v4306_v8 = vadd.f32 %v2697_v1, %v2695_v2  ;;  %v1632_v2 = vsub.f32 1.0, %v3652_v47 }
0x233a   :  { %v4308_v12 = vadd.f32 %v2696_v4, %v2694_v5  ;;  %v1631_v4 = vsub.f32 1.0, %v3654_v17  ;;  %v1644_v5 = vmul.f32 %v3652_v47, %v4168_v13 }
0x233b   :  { %v2703_v28 = vsel %vm478_vm2, %v2701_v10, %v4306_v8  ;;  %2713 = vrot.lane.b32.xlu1 %v4306_v8, %s3772_s10 }
0x233c   :  { %2706 = vst.msk [vmem:[#allocation10 + $0x18] sm:$0xff] %vm1810_vm3, %v2703_v28  ;;  %v2702_v30 = vsel %vm478_vm2, %v2700_v29, %v4308_v12  ;;  %2711 = vrot.lane.b32.xlu0 %v4308_v12, %s3772_s10  ;;  %v1643_v29 = vmul.f32 %v3654_v17, %v4170_v14 }
0x233d   :  { %2705 = vst.msk [vmem:[#allocation10 + $0x10] sm:$0xff] %vm1810_vm3, %v2702_v30 }
0x233f   :  { %1613 = vrot.lane.b32.xlu1 %v1608_v31, %s3770_s7 }
0x2340   :  { %1611 = vrot.lane.b32.xlu0 %v1607_v32, %s3770_s7 }
0x23ad   :  { %v2714_v60 = vpop.permute.xlu1 %2713 }
0x23ae   :  { %v2712_v26 = vpop.permute.xlu0 %2711 }
0x23af   :  { %3331 = vmatprep.mubr.msk.f32.mxu1 %vm478_vm2, %v2712_v26 }
0x23b0   :  { %3332 = vmatmul.mubr.msk.f32.vlgmr.msra.gmra.mrb[30].mxu1 %vm478_vm2, %v2714_v60 }
0x23b1   :  { %v1614_v16 = vpop.permute.xlu1 %1613 }
0x23b2   :  { %v1618_v48 = vmul.f32 %v3652_v47, %v1614_v16  ;;  %v1612_v18 = vpop.permute.xlu0 %1611 }
0x23b3   :  { %v1617_v36 = vmul.f32 %v3654_v17, %v1612_v18  ;;  %v2849_v17 = vld [vmem:[#allocation3 + $0x8] sm:$0xff] }
0x23b4   :  { %1623 = vrot.lane.b32.xlu1 %v1618_v48, %s3770_s7 }
0x23b5   :  { %1621 = vrot.lane.b32.xlu0 %v1617_v36, %s3770_s7  ;;  %v2848_v36 = vld [vmem:[#allocation3] sm:$0xff] }
0x2426   :  { %v1624_v54 = vpop.permute.xlu1 %1623 }
0x2427   :  { %v1622_v6 = vpop.permute.xlu0 %1621 }
0x2428   :  { %v1627_v55 = vadd.f32 %v1622_v6, %v1512_v35 }
0x2483   :  { %v3333_v21 = vpop.f32.mrb[30].mxu1 }
0x2484   :  { %v2809_v22 = vadd.f32 %v3333_v21, %v4152_v15  ;;  %v2785_v23 = vpop.f32.mrb[31].mxu1  ;;  %v2795_v45 = vadd.f32 %v3333_v21, %v2708_v44 }
0x2485   :  { %v2808_v25 = vadd.f32 %v2785_v23, %v4152_v15  ;;  %v2794_v49 = vadd.f32 %v2785_v23, %v2707_v46  ;;  %v1628_v15 = vadd.f32 %v1624_v54, %v1513_v33 }
0x2486   :  { %2814 = vrot.lane.b32.xlu1 %v2809_v22, %s3770_s7  ;;  %v2969_v50 = vmul.f32 -1.442695, %v2795_v45 }
0x2487   :  { %2812 = vrot.lane.b32.xlu0 %v2808_v25, %s3770_s7  ;;  %v2968_v51 = vmul.f32 -1.442695, %v2794_v49 }
0x2488   :  { %3655 = vpow2.f32 %v2969_v50 }
0x2489   :  { %3657 = vpow2.f32 %v2968_v51 }
0x2492   :  { %v3656_v52 = vpop.eup %3655 }
0x2493   :  { %v3658_v53 = vpop.eup %3657  ;;  %v2803_v19 = vadd.f32 1.0, %v3656_v52 }
0x2494   :  { %v2802_v20 = vadd.f32 1.0, %v3658_v53 }
0x2495   :  { %3659 = vrcp.f32 %v2803_v19 }
0x2496   :  { %3661 = vrcp.f32 %v2802_v20 }
0x2497   :  { %3663 = vtanh.f32 %v1628_v15 }
0x2498   :  { %3665 = vtanh.f32 %v1627_v55 }
0x249f   :  { %v3660_v11 = vpop.eup %3659 }
0x24a0   :  { %v3662_v57 = vpop.eup %3661  ;;  %v2833_v14 = vsub.f32 1.0, %v3660_v11  ;;  %v2845_v40 = vmul.f32 %v3660_v11, %v4306_v8 }
0x24a1   :  { %v3664_v61 = vpop.eup %3663  ;;  %v2832_v39 = vsub.f32 1.0, %v3662_v57  ;;  %v2844_v7 = vmul.f32 %v3662_v57, %v4308_v12 }
0x24a2   :  { %v3666_v43 = vpop.eup %3665 }
0x24f8   :  { %v2815_v56 = vpop.permute.xlu1 %2814 }
0x24f9   :  { %v2819_v58 = vmul.f32 %v3660_v11, %v2815_v56  ;;  %v2813_v59 = vpop.permute.xlu0 %2812 }
0x24fa   :  { %v2818_v27 = vmul.f32 %v3662_v57, %v2813_v59 }
0x24fb   :  { %2824 = vrot.lane.b32.xlu1 %v2819_v58, %s3770_s7 }
0x24fc   :  { %2822 = vrot.lane.b32.xlu0 %v2818_v27, %s3770_s7 }
0x24ff   :  { %1637 = vrot.lane.b32.xlu1 %v3664_v61, %s3772_s10 }
0x2500   :  { %1635 = vrot.lane.b32.xlu0 %v3666_v43, %s3772_s10 }
0x256d   :  { %v2825_v62 = vpop.permute.xlu1 %2824 }
0x256e   :  { %v2829_v63 = vadd.f32 %v2825_v62, %v2708_v44  ;;  %v2823_v0 = vpop.permute.xlu0 %2822 }
0x256f   :  { %v2828_v1 = vadd.f32 %v2823_v0, %v2707_v46 }
0x2570   :  { %3667 = vtanh.f32 %v2829_v63 }
0x2571   :  { %3669 = vtanh.f32 %v2828_v1  ;;  %v1638_v3 = vpop.permute.xlu1 %1637 }
0x2572   :  { %v1642_v10 = vmul.f32 %v1638_v3, %v1632_v2  ;;  %v1636_v28 = vpop.permute.xlu0 %1635 }
0x2573   :  { %v1641_v30 = vmul.f32 %v1636_v28, %v1631_v4 }
0x2574   :  { %v1646_v31 = vadd.f32 %v1644_v5, %v1642_v10 }
0x2575   :  { %v1645_v32 = vadd.f32 %v1643_v29, %v1641_v30 }
0x2576   :  { %1651 = vrot.lane.b32.xlu1 %v1646_v31, %s3772_s10 }
0x2577   :  { %1649 = vrot.lane.b32.xlu0 %v1645_v32, %s3772_s10 }
0x257a   :  { %v3668_v33 = vpop.eup %3667 }
0x257b   :  { %v3670_v34 = vpop.eup %3669  ;;  %2838 = vrot.lane.b32.xlu1 %v3668_v33, %s3772_s10 }
0x257c   :  { %2836 = vrot.lane.b32.xlu0 %v3670_v34, %s3772_s10 }
0x25e8   :  { %v1652_v35 = vpop.permute.xlu1 %1651 }
0x25e9   :  { %1657 = vst.msk [vmem:[#allocation3 + $0x78] sm:$0xff] %vm478_vm2, %v1652_v35  ;;  %v1650_v13 = vpop.permute.xlu0 %1649 }
0x25ea   :  { %1656 = vst.msk [vmem:[#allocation3 + $0x70] sm:$0xff] %vm478_vm2, %v1650_v13 }
0x25ed   :  { %v2839_v38 = vpop.permute.xlu1 %2838 }
0x25ee   :  { %v2843_v41 = vmul.f32 %v2839_v38, %v2833_v14  ;;  %v2837_v42 = vpop.permute.xlu0 %2836 }
0x25ef   :  { %v2842_v9 = vmul.f32 %v2837_v42, %v2832_v39 }
0x25f0   :  { %v1806_v60 = vld [vmem:[#allocation3 + $0x78] sm:$0xff]  ;;  %v2847_v26 = vadd.f32 %v2845_v40, %v2843_v41 }
0x25f1   :  { %v1808_v47 = vsel %vm478_vm2, %v1806_v60, %v4176_v37  ;;  %v1805_v16 = vld [vmem:[#allocation3 + $0x70] sm:$0xff]  ;;  %v2846_v48 = vadd.f32 %v2844_v7, %v2842_v9 }
0x25f2   :  { %1812 = vst.msk [vmem:[#allocation10 + $0x78] sm:$0xff] %vm1810_vm3, %v1808_v47  ;;  %v1807_v8 = vsel %vm478_vm2, %v1805_v16, %v4178_v24  ;;  %v2851_v18 = vsel %vm478_vm2, %v2849_v17, %v2847_v26 }
0x25f3   :  { %1811 = vst.msk [vmem:[#allocation10 + $0x70] sm:$0xff] %vm1810_vm3, %v1807_v8  ;;  %2853 = vst.msk [vmem:[#allocation10 + $0x8] sm:$0xff] %vm1810_vm3, %v2851_v18  ;;  %v2850_v12 = vsel %vm478_vm2, %v2848_v36, %v2846_v48 }
0x25f4   :  { %2852 = vst.msk [vmem:[#allocation10] sm:$0xff] %vm1810_vm3, %v2850_v12 }
0x25f5   :  { %3748 = shalt.err (!%p3745_p0)
}
0x25f6   :  { %s3749_s17 = scalar_lea.hbm %s4380_s5, 2048 }
0x25f7   :  { %p3750_p1 = scmp.ne.s32.totalorder %s4380_s5, %s3749_s17  ;;  %p3753_p2 = scmp.lt.u32.totalorder %s3749_s17, %s4380_s5 }
0x25f9   :  { %p3755_p3 = pnand %p3753_p2, %p3750_p1 }
0x25fb   :  { %3758 = shalt.err (!%p3755_p3)
}
0x25fc   :  { %2865 = dma.vmem_to_hbm [thread:$0]  %s2860_s14, 2048, %s4380_s5, [#allocation6], %s3767_s30, %s3767_s30, %s3768_s6  }
0x25fd   :  { %3763 = dma.done.wait [#allocation6], 2048  }
0x25fe   :  { %3764 = vsyncadd [#allocation6], 4294965248 }
0x25ff   :  { %2869 = vsyncpa [#allocation5], 1 }
0x2600   :  { %2870 = vsyncpa [#allocation8], 1 }
0x2601   :  { %2871 = vsyncpa [#allocation6], 1 }

</bundles_post_ra>
